<compile_context>
chip_gen: v6e
topology: v6e:2x2x1
jax: 0.10.0
libtpu: 0.0.40
codegen_flags: <defaults>
</compile_context>

<pallas_src>
import math
from functools import partial

import jax
import jax.numpy as jnp
from jax import lax
from jax.experimental import pallas as pl
from jax.experimental.pallas import tpu as pltpu


# ------------------------------------------------------------------
# In-kernel helpers (values already resident in VMEM / vregs)
# ------------------------------------------------------------------

def _layer_norm(x, gamma, beta, *, eps, inv_d):
    """PyTorch nn.LayerNorm over the last dim (biased variance, eps in rsqrt)."""
    mu = jnp.sum(x, axis=-1, keepdims=True) * inv_d
    xc = x - mu
    var = jnp.sum(xc * xc, axis=-1, keepdims=True) * inv_d
    return xc * lax.rsqrt(var + eps) * gamma + beta


def _mha(xq, xkv, wq, wk, wv, *, n_heads, d_k, scale):
    """Batched-head cross attention.  xq (Lq, D), xkv (Lk, D); weights are
    (in, out) = (D, D), no bias.  Returns (Lq, D)."""
    lq, lk = xq.shape[0], xkv.shape[0]
    q = jnp.dot(xq, wq, preferred_element_type=jnp.float32)
    k = jnp.dot(xkv, wk, preferred_element_type=jnp.float32)
    v = jnp.dot(xkv, wv, preferred_element_type=jnp.float32)
    # Head axis leading -> one batched matmul per attention step (no per-head
    # lane slices, no lane-dim concatenation).
    q = q.reshape(lq, n_heads, d_k).transpose(1, 0, 2)   # (H, Lq, dk)
    k = k.reshape(lk, n_heads, d_k).transpose(1, 0, 2)   # (H, Lk, dk)
    v = v.reshape(lk, n_heads, d_k).transpose(1, 0, 2)   # (H, Lk, dk)
    s = jnp.einsum("hqd,hkd->hqk", q, k,
                   preferred_element_type=jnp.float32) * scale
    s = s - jnp.max(s, axis=-1, keepdims=True)
    p = jnp.exp(s)
    p = p * pl.reciprocal(jnp.sum(p, axis=-1, keepdims=True), approx=True)
    o = jnp.einsum("hqk,hkd->hqd", p, v,
                   preferred_element_type=jnp.float32)   # (H, Lq, dk)
    return o.transpose(1, 0, 2).reshape(lq, n_heads * d_k)


# ------------------------------------------------------------------
# Fused forward kernel: grid = (batch, n_processing_blocks)
#   step (b, blk): run processing block `blk` on batch element `b`
#   step (b, NB-1): additionally run readout block + final norm + output head
# ------------------------------------------------------------------

def _fused_forward_kernel(
        tok_ref, resid0_ref,
        pa_wq_ref, pa_wk_ref, pa_wv_ref,
        ru_wq_ref, ru_wk_ref, ru_wv_ref, ru_ow_ref, ru_ob_ref,
        pb_g_ref, pb_b_ref,
        ro_wq_ref, ro_wk_ref, ro_wv_ref, ro_ow_ref, ro_ob_ref,
        n1_g_ref, n1_b_ref, n2_g_ref, n2_b_ref,
        ffn_w1_ref, ffn_b1_ref, ffn_w2_ref, ffn_b2_ref,
        fn_g_ref, fn_b_ref,
        op_w_ref, op_b_ref,
        logits_ref,
        resid_sc,
        *, n_blocks, n_heads, d_k, eps, seq_len, kv_len):
    d_model = n_heads * d_k
    inv_d = 1.0 / float(d_model)
    scale = 1.0 / math.sqrt(d_k)
    mha = partial(_mha, n_heads=n_heads, d_k=d_k, scale=scale)
    ln = partial(_layer_norm, eps=eps, inv_d=inv_d)

    blk = pl.program_id(1)

    # New batch element: (re)initialise residual state from the learned param.
    @pl.when(blk == 0)
    def _():
        resid_sc[...] = resid0_ref[0]

    tok = tok_ref[0]            # (S, D) -- fixed token embeddings (VMEM-resident)
    resid = resid_sc[...]       # (R, D) -- evolving residual state

    # ---- one processing block (weights of block `blk` only are resident) ----
    attn = mha(tok, resid, pa_wq_ref[0], pa_wk_ref[0], pa_wv_ref[0])      # (S, D)
    ru = mha(resid, attn, ru_wq_ref[0], ru_wk_ref[0], ru_wv_ref[0])       # (R, D)
    ru = jnp.dot(ru, ru_ow_ref[0],
                 preferred_element_type=jnp.float32) + ru_ob_ref[0]       # (R, D)
    resid = ln(resid + ru, pb_g_ref[0], pb_b_ref[0])
    resid_sc[...] = resid

    # ---- readout block + final norm + output head (last block step only) ----
    @pl.when(blk == n_blocks - 1)
    def _():
        attn_r = mha(resid, tok,
                     ro_wq_ref[...], ro_wk_ref[...], ro_wv_ref[...])      # (R, D)
        upd = jnp.dot(attn_r, ro_ow_ref[...],
                      preferred_element_type=jnp.float32) + ro_ob_ref[...]
        if seq_len != kv_len:
            if seq_len <= kv_len:
                upd_s = upd[:seq_len, :]
            else:
                # TODO(synk): replace the zero-concat pad with a masked row
                # write into a pre-zeroed scratch for large seq_len.
                upd_s = jnp.concatenate(
                    [upd, jnp.zeros((seq_len - kv_len, d_model), upd.dtype)],
                    axis=0)
        else:
            upd_s = upd
        t1 = ln(tok + upd_s, n1_g_ref[...], n1_b_ref[...])                # (S, D)
        ff = jnp.maximum(
            jnp.dot(t1, ffn_w1_ref[...],
                    preferred_element_type=jnp.float32) + ffn_b1_ref[...], 0.0)
        ff = jnp.dot(ff, ffn_w2_ref[...],
                     preferred_element_type=jnp.float32) + ffn_b2_ref[...]
        t2 = ln(t1 + ff, n2_g_ref[...], n2_b_ref[...])
        fin = ln(t2, fn_g_ref[...], fn_b_ref[...])                        # (S, D)
        logits_ref[0] = (jnp.dot(fin, op_w_ref[...],
                                 preferred_element_type=jnp.float32)
                         + op_b_ref[...])                                 # (S, Vp)


# ------------------------------------------------------------------
# Forward wrapper
# ------------------------------------------------------------------

def residual_transformer_forward(params, input_ids, cfg):
    D = cfg["d_model"]
    H = cfg["n_heads"]
    R = cfg["fixed_kv_length"]
    V = cfg["vocab_size"]
    Fd = cfg["d_ff"]
    NB = cfg["n_processing_blocks"]
    B, S = input_ids.shape
    d_k = D // H
    Vp = max(128, ((V + 127) // 128) * 128)   # lane-dense logits store

    # Glue in plain JAX: embedding gather + sinusoidal positional encoding.
    # TODO(synk): fuse the gather (pl.Element row gather via scalar prefetch)
    # and the PE add into the kernel to avoid the (B,S,D) HBM round-trip.
    tok = jnp.take(params["embedding"], input_ids, axis=0) + params["pe"][:S][None]

    blk = params["blocks"]
    ro = params["readout"]

    op_w = params["out_proj_w"]
    op_b = params["out_proj_b"]
    if Vp != V:
        op_w = jnp.pad(op_w, ((0, 0), (0, Vp - V)))
        op_b = jnp.pad(op_b, ((0, 0), (0, Vp - V)))

    kernel = partial(_fused_forward_kernel, n_blocks=NB, n_heads=H, d_k=d_k,
                     eps=1e-5, seq_len=S, kv_len=R)

    def cspec(shape):                     # grid-invariant input
        zeros = (0,) * len(shape)
        return pl.BlockSpec(shape, lambda b, k, _z=zeros: _z)

    def bspec(shape):                     # per-processing-block input
        tail = (0,) * (len(shape) - 1)
        return pl.BlockSpec(shape, lambda b, k, _t=tail: (k,) + _t)

    in_specs = [
        pl.BlockSpec((1, S, D), lambda b, k: (b, 0, 0)),    # token embeddings
        cspec((1, R, D)),                                   # initial residual
        bspec((1, D, D)), bspec((1, D, D)), bspec((1, D, D)),   # proc-attn q/k/v
        bspec((1, D, D)), bspec((1, D, D)), bspec((1, D, D)),   # resid-upd q/k/v
        bspec((1, D, D)), bspec((1, 1, D)),                     # resid-upd out w/b
        bspec((1, 1, D)), bspec((1, 1, D)),                     # block norm g/b
        cspec((D, D)), cspec((D, D)), cspec((D, D)),            # readout q/k/v
        cspec((D, D)), cspec((1, D)),                           # readout out w/b
        cspec((1, D)), cspec((1, D)), cspec((1, D)), cspec((1, D)),  # norm1/norm2
        cspec((D, Fd)), cspec((1, Fd)), cspec((Fd, D)), cspec((1, D)),  # FFN
        cspec((1, D)), cspec((1, D)),                           # final norm
        cspec((D, Vp)), cspec((1, Vp)),                          # output head
    ]

    # Scoped-VMEM limit from the resident buffers (x2 for double buffering,
    # generous headroom for in-kernel intermediates), clamped to chip limits.
    def _bytes(*shapes):
        return sum(4 * math.prod(s) for s in shapes)
    resident = (2 * _bytes((1, S, D), (1, R, D), (1, S, Vp))
                + 2 * _bytes(*([(1, D, D)] * 7 + [(1, 1, D)] * 3))
                + 2 * _bytes((D, D), (D, D), (D, D), (D, D),
                             (D, Fd), (Fd, D), (D, Vp))
                + _bytes((R, D)))
    vmem_limit = int(min(64 * 1024 * 1024, max(32 * 1024 * 1024, 8 * resident)))

    logits = pl.pallas_call(
        kernel,
        out_shape=jax.ShapeDtypeStruct((B, S, Vp), jnp.float32),
        grid_spec=pltpu.PrefetchScalarGridSpec(
            num_scalar_prefetch=0,
            grid=(B, NB),
            in_specs=in_specs,
            out_specs=pl.BlockSpec((1, S, Vp), lambda b, k: (b, 0, 0)),
            scratch_shapes=[pltpu.VMEM((R, D), jnp.float32)]),
        compiler_params=pltpu.CompilerParams(
            dimension_semantics=("parallel", "arbitrary"),
            vmem_limit_bytes=vmem_limit),
    )(tok, params["initial_residual"],
      blk["pa_wq"], blk["pa_wk"], blk["pa_wv"],
      blk["ru_wq"], blk["ru_wk"], blk["ru_wv"], blk["ru_out_w"], blk["ru_out_b"],
      blk["norm_g"], blk["norm_b"],
      ro["wq"], ro["wk"], ro["wv"], ro["out_w"], ro["out_b"],
      ro["norm1_g"], ro["norm1_b"], ro["norm2_g"], ro["norm2_b"],
      ro["ffn_w1"], ro["ffn_b1"], ro["ffn_w2"], ro["ffn_b2"],
      params["final_norm_g"], params["final_norm_b"],
      op_w, op_b)

    return logits[..., :V] if Vp != V else logits        # (B, S, V)


# ------------------------------------------------------------------
# Parameter initialisation.  Linear weights are stored pre-transposed to
# (in, out) so the kernel does native (M,K)x(K,N) contractions; per-block
# weights are pre-stacked on a leading n_blocks axis.
# ------------------------------------------------------------------

def make_positional_encoding(max_len, d_model):
    position = jnp.arange(max_len, dtype=jnp.float32)[:, None]
    div_term = jnp.exp(jnp.arange(0, d_model, 2, dtype=jnp.float32)
                       * (-math.log(10000.0) / d_model))
    pe = jnp.zeros((max_len, d_model), dtype=jnp.float32)
    pe = pe.at[:, 0::2].set(jnp.sin(position * div_term))
    pe = pe.at[:, 1::2].set(jnp.cos(position * div_term))
    return pe


def init_params(key, cfg):
    D, V, Fd = cfg["d_model"], cfg["vocab_size"], cfg["d_ff"]
    R, NB = cfg["fixed_kv_length"], cfg["n_processing_blocks"]
    keys = iter(jax.random.split(key, 64))

    def normal(shape, std=0.02):
        return std * jax.random.normal(next(keys), shape, dtype=jnp.float32)

    return {
        "embedding": normal((V, D)),
        "pe": make_positional_encoding(cfg["max_len"], D),
        # residual_init_strategy == 'learned'
        "initial_residual": cfg["residual_init_scale"]
                            * jax.random.normal(next(keys), (1, R, D),
                                                dtype=jnp.float32),
        "blocks": {
            "pa_wq": normal((NB, D, D)), "pa_wk": normal((NB, D, D)),
            "pa_wv": normal((NB, D, D)),
            "ru_wq": normal((NB, D, D)), "ru_wk": normal((NB, D, D)),
            "ru_wv": normal((NB, D, D)),
            "ru_out_w": normal((NB, D, D)),
            "ru_out_b": jnp.zeros((NB, 1, D), jnp.float32),
            "norm_g": jnp.ones((NB, 1, D), jnp.float32),
            "norm_b": jnp.zeros((NB, 1, D), jnp.float32),
        },
        "readout": {
            "wq": normal((D, D)), "wk": normal((D, D)), "wv": normal((D, D)),
            "out_w": normal((D, D)), "out_b": jnp.zeros((1, D), jnp.float32),
            "norm1_g": jnp.ones((1, D), jnp.float32),
            "norm1_b": jnp.zeros((1, D), jnp.float32),
            "norm2_g": jnp.ones((1, D), jnp.float32),
            "norm2_b": jnp.zeros((1, D), jnp.float32),
            "ffn_w1": normal((D, Fd)), "ffn_b1": jnp.zeros((1, Fd), jnp.float32),
            "ffn_w2": normal((Fd, D)), "ffn_b2": jnp.zeros((1, D), jnp.float32),
        },
        "final_norm_g": jnp.ones((1, D), jnp.float32),
        "final_norm_b": jnp.zeros((1, D), jnp.float32),
        "out_proj_w": normal((D, V)),
        "out_proj_b": jnp.zeros((1, V), jnp.float32),
    }


# ------------------------------------------------------------------
# main
# ------------------------------------------------------------------

if __name__ == "__main__":
    cfg = dict(
        vocab_size=64,
        d_model=32,
        n_heads=4,
        d_ff=64,
        fixed_kv_length=16,
        n_processing_blocks=2,
        max_len=64,
        residual_init_scale=0.02,
    )
    key = jax.random.PRNGKey(0)
    k_param, k_data = jax.random.split(key)
    params = init_params(k_param, cfg)

    batch, seq_len = 2, 8
    input_ids = jax.random.randint(k_data, (batch, seq_len), 0, cfg["vocab_size"],
                                   dtype=jnp.int32)

    fwd = jax.jit(partial(residual_transformer_forward, cfg=cfg))
    logits = fwd(params, input_ids)
    jax.block_until_ready(logits)

    assert logits.shape == (batch, seq_len, cfg["vocab_size"])
    assert bool(jnp.all(jnp.isfinite(logits)))
    print("KERNEL_OK")
</pallas_src>

<mosaic_0001>
module attributes {stable_mosaic.version = 11 : i64} {
  func.func @_fused_forward_kernel(%arg0: i32, %arg1: i32, %arg2: memref<1x8x32xf32, #tpu.memory_space<vmem>>, %arg3: memref<1x16x32xf32, #tpu.memory_space<vmem>>, %arg4: memref<1x32x32xf32, #tpu.memory_space<vmem>>, %arg5: memref<1x32x32xf32, #tpu.memory_space<vmem>>, %arg6: memref<1x32x32xf32, #tpu.memory_space<vmem>>, %arg7: memref<1x32x32xf32, #tpu.memory_space<vmem>>, %arg8: memref<1x32x32xf32, #tpu.memory_space<vmem>>, %arg9: memref<1x32x32xf32, #tpu.memory_space<vmem>>, %arg10: memref<1x32x32xf32, #tpu.memory_space<vmem>>, %arg11: memref<1x1x32xf32, #tpu.memory_space<vmem>>, %arg12: memref<1x1x32xf32, #tpu.memory_space<vmem>>, %arg13: memref<1x1x32xf32, #tpu.memory_space<vmem>>, %arg14: memref<32x32xf32, #tpu.memory_space<vmem>>, %arg15: memref<32x32xf32, #tpu.memory_space<vmem>>, %arg16: memref<32x32xf32, #tpu.memory_space<vmem>>, %arg17: memref<32x32xf32, #tpu.memory_space<vmem>>, %arg18: memref<1x32xf32, #tpu.memory_space<vmem>>, %arg19: memref<1x32xf32, #tpu.memory_space<vmem>>, %arg20: memref<1x32xf32, #tpu.memory_space<vmem>>, %arg21: memref<1x32xf32, #tpu.memory_space<vmem>>, %arg22: memref<1x32xf32, #tpu.memory_space<vmem>>, %arg23: memref<32x64xf32, #tpu.memory_space<vmem>>, %arg24: memref<1x64xf32, #tpu.memory_space<vmem>>, %arg25: memref<64x32xf32, #tpu.memory_space<vmem>>, %arg26: memref<1x32xf32, #tpu.memory_space<vmem>>, %arg27: memref<1x32xf32, #tpu.memory_space<vmem>>, %arg28: memref<1x32xf32, #tpu.memory_space<vmem>>, %arg29: memref<32x128xf32, #tpu.memory_space<vmem>>, %arg30: memref<1x128xf32, #tpu.memory_space<vmem>>, %arg31: memref<1x8x128xf32, #tpu.memory_space<vmem>>, %arg32: memref<16x32xf32, #tpu.memory_space<vmem>>) attributes {dimension_semantics = [#tpu.dimension_semantics<parallel>, #tpu.dimension_semantics<arbitrary>], iteration_bounds = array<i64: 2, 2>, scalar_prefetch = 0 : i64, scratch_operands = 1 : i64, tpu.core_type = #tpu.core_type<tc>, window_params = [{transform_indices = @transform_0, window_bounds = array<i64: 1, 8, 32>}, {pipeline_mode = #tpu.pipeline_mode<synchronous>, transform_indices = @transform_1, window_bounds = array<i64: 1, 16, 32>}, {transform_indices = @transform_2, window_bounds = array<i64: 1, 32, 32>}, {transform_indices = @transform_3, window_bounds = array<i64: 1, 32, 32>}, {transform_indices = @transform_4, window_bounds = array<i64: 1, 32, 32>}, {transform_indices = @transform_5, window_bounds = array<i64: 1, 32, 32>}, {transform_indices = @transform_6, window_bounds = array<i64: 1, 32, 32>}, {transform_indices = @transform_7, window_bounds = array<i64: 1, 32, 32>}, {transform_indices = @transform_8, window_bounds = array<i64: 1, 32, 32>}, {transform_indices = @transform_9, window_bounds = array<i64: 1, 1, 32>}, {transform_indices = @transform_10, window_bounds = array<i64: 1, 1, 32>}, {transform_indices = @transform_11, window_bounds = array<i64: 1, 1, 32>}, {pipeline_mode = #tpu.pipeline_mode<synchronous>, transform_indices = @transform_12, window_bounds = array<i64: 32, 32>}, {pipeline_mode = #tpu.pipeline_mode<synchronous>, transform_indices = @transform_13, window_bounds = array<i64: 32, 32>}, {pipeline_mode = #tpu.pipeline_mode<synchronous>, transform_indices = @transform_14, window_bounds = array<i64: 32, 32>}, {pipeline_mode = #tpu.pipeline_mode<synchronous>, transform_indices = @transform_15, window_bounds = array<i64: 32, 32>}, {pipeline_mode = #tpu.pipeline_mode<synchronous>, transform_indices = @transform_16, window_bounds = array<i64: 1, 32>}, {pipeline_mode = #tpu.pipeline_mode<synchronous>, transform_indices = @transform_17, window_bounds = array<i64: 1, 32>}, {pipeline_mode = #tpu.pipeline_mode<synchronous>, transform_indices = @transform_18, window_bounds = array<i64: 1, 32>}, {pipeline_mode = #tpu.pipeline_mode<synchronous>, transform_indices = @transform_19, window_bounds = array<i64: 1, 32>}, {pipeline_mode = #tpu.pipeline_mode<synchronous>, transform_indices = @transform_20, window_bounds = array<i64: 1, 32>}, {pipeline_mode = #tpu.pipeline_mode<synchronous>, transform_indices = @transform_21, window_bounds = array<i64: 32, 64>}, {pipeline_mode = #tpu.pipeline_mode<synchronous>, transform_indices = @transform_22, window_bounds = array<i64: 1, 64>}, {pipeline_mode = #tpu.pipeline_mode<synchronous>, transform_indices = @transform_23, window_bounds = array<i64: 64, 32>}, {pipeline_mode = #tpu.pipeline_mode<synchronous>, transform_indices = @transform_24, window_bounds = array<i64: 1, 32>}, {pipeline_mode = #tpu.pipeline_mode<synchronous>, transform_indices = @transform_25, window_bounds = array<i64: 1, 32>}, {pipeline_mode = #tpu.pipeline_mode<synchronous>, transform_indices = @transform_26, window_bounds = array<i64: 1, 32>}, {pipeline_mode = #tpu.pipeline_mode<synchronous>, transform_indices = @transform_27, window_bounds = array<i64: 32, 128>}, {pipeline_mode = #tpu.pipeline_mode<synchronous>, transform_indices = @transform_28, window_bounds = array<i64: 1, 128>}, {transform_indices = @transform_29, window_bounds = array<i64: 1, 8, 128>}]} {
    %c0_i32 = arith.constant 0 : i32
    %0 = arith.cmpi eq, %arg1, %c0_i32 : i32
    %1 = arith.extui %0 : i1 to i32
    %c0_i32_0 = arith.constant 0 : i32
    %2 = arith.cmpi ne, %1, %c0_i32_0 : i32
    scf.if %2 {
      %c0_59 = arith.constant 0 : index
      %c0_60 = arith.constant 0 : index
      %c0_61 = arith.constant 0 : index
      %104 = vector.load %arg3[%c0_59, %c0_60, %c0_61] : memref<1x16x32xf32, #tpu.memory_space<vmem>>, vector<1x16x32xf32>
      %105 = vector.shape_cast %104 : vector<1x16x32xf32> to vector<16x32xf32>
      %c0_62 = arith.constant 0 : index
      %c0_63 = arith.constant 0 : index
      %106 = vector.load %arg32[%c0_62, %c0_63] : memref<16x32xf32, #tpu.memory_space<vmem>>, vector<16x32xf32>
      tpu.vector_store %arg32[%c0_62, %c0_63], %105 {strides = array<i32>} : memref<16x32xf32, #tpu.memory_space<vmem>>, vector<16x32xf32>,
    } else {
    }
    %c0 = arith.constant 0 : index
    %c0_1 = arith.constant 0 : index
    %c0_2 = arith.constant 0 : index
    %3 = vector.load %arg2[%c0, %c0_1, %c0_2] : memref<1x8x32xf32, #tpu.memory_space<vmem>>, vector<1x8x32xf32>
    %4 = vector.shape_cast %3 : vector<1x8x32xf32> to vector<8x32xf32>
    %c0_3 = arith.constant 0 : index
    %c0_4 = arith.constant 0 : index
    %5 = vector.load %arg32[%c0_3, %c0_4] : memref<16x32xf32, #tpu.memory_space<vmem>>, vector<16x32xf32>
    %c0_5 = arith.constant 0 : index
    %c0_6 = arith.constant 0 : index
    %c0_7 = arith.constant 0 : index
    %6 = vector.load %arg4[%c0_5, %c0_6, %c0_7] : memref<1x32x32xf32, #tpu.memory_space<vmem>>, vector<1x32x32xf32>
    %7 = vector.shape_cast %6 : vector<1x32x32xf32> to vector<32x32xf32>
    %c0_8 = arith.constant 0 : index
    %c0_9 = arith.constant 0 : index
    %c0_10 = arith.constant 0 : index
    %8 = vector.load %arg5[%c0_8, %c0_9, %c0_10] : memref<1x32x32xf32, #tpu.memory_space<vmem>>, vector<1x32x32xf32>
    %9 = vector.shape_cast %8 : vector<1x32x32xf32> to vector<32x32xf32>
    %c0_11 = arith.constant 0 : index
    %c0_12 = arith.constant 0 : index
    %c0_13 = arith.constant 0 : index
    %10 = vector.load %arg6[%c0_11, %c0_12, %c0_13] : memref<1x32x32xf32, #tpu.memory_space<vmem>>, vector<1x32x32xf32>
    %11 = vector.shape_cast %10 : vector<1x32x32xf32> to vector<32x32xf32>
    %cst = arith.constant dense<0.000000e+00> : vector<8x32xf32>
    %12 = tpu.matmul %4, %7, %cst {dimension_numbers = #tpu.dot_dimension_numbers<[1], [0], [0], [1], [0, 0, 1, 1], [], []>} : vector<8x32xf32>, vector<32x32xf32>, vector<8x32xf32> -> vector<8x32xf32>
    %cst_14 = arith.constant dense<0.000000e+00> : vector<16x32xf32>
    %13 = tpu.matmul %5, %9, %cst_14 {dimension_numbers = #tpu.dot_dimension_numbers<[1], [0], [0], [1], [0, 0, 1, 1], [], []>} : vector<16x32xf32>, vector<32x32xf32>, vector<16x32xf32> -> vector<16x32xf32>
    %cst_15 = arith.constant dense<0.000000e+00> : vector<16x32xf32>
    %14 = tpu.matmul %5, %11, %cst_15 {dimension_numbers = #tpu.dot_dimension_numbers<[1], [0], [0], [1], [0, 0, 1, 1], [], []>} : vector<16x32xf32>, vector<32x32xf32>, vector<16x32xf32> -> vector<16x32xf32>
    %15 = vector.shape_cast %12 : vector<8x32xf32> to vector<8x4x8xf32>
    %16 = tpu.transpose %15, [1, 0, 2] : vector<8x4x8xf32> -> vector<4x8x8xf32>
    %17 = vector.shape_cast %13 : vector<16x32xf32> to vector<16x4x8xf32>
    %18 = tpu.transpose %17, [1, 0, 2] : vector<16x4x8xf32> -> vector<4x16x8xf32>
    %19 = vector.shape_cast %14 : vector<16x32xf32> to vector<16x4x8xf32>
    %20 = tpu.transpose %19, [1, 0, 2] : vector<16x4x8xf32> -> vector<4x16x8xf32>
    "tpu.trace_start"() <{level = 10 : i32, message = "hqd,hkd->hqk"}> : () -> ()
    %cst_16 = arith.constant dense<0.000000e+00> : vector<4x8x16xf32>
    %21 = tpu.matmul %16, %18, %cst_16 {dimension_numbers = #tpu.dot_dimension_numbers<[2], [2], [1], [1], [0, 0, 0, 1, 1, 1], [0], [0]>} : vector<4x8x8xf32>, vector<4x16x8xf32>, vector<4x8x16xf32> -> vector<4x8x16xf32>
    "tpu.trace_stop"() : () -> ()
    %cst_17 = arith.constant 0.353553385 : f32
    %22 = vector.broadcast %cst_17 : f32 to vector<4x8x16xf32>
    %23 = arith.mulf %21, %22 : vector<4x8x16xf32>
    %cst_18 = arith.constant dense<0xFF800000> : vector<4x8xf32>
    %24 = vector.multi_reduction <maximumf>, %23, %cst_18 [2] : vector<4x8x16xf32> to vector<4x8xf32>
    %25 = vector.shape_cast %24 : vector<4x8xf32> to vector<4x8x1xf32>
    %26 = vector.broadcast %25 : vector<4x8x1xf32> to vector<4x8x16xf32>
    %27 = arith.subf %23, %26 : vector<4x8x16xf32>
    %28 = math.exp %27 : vector<4x8x16xf32>
    %cst_19 = arith.constant dense<0.000000e+00> : vector<4x8xf32>
    %29 = vector.multi_reduction <add>, %28, %cst_19 [2] : vector<4x8x16xf32> to vector<4x8xf32>
    %30 = vector.shape_cast %29 : vector<4x8xf32> to vector<4x8x1xf32>
    %31 = tpu.reciprocal %30 {approx = true} : vector<4x8x1xf32> -> vector<4x8x1xf32>
    %32 = vector.broadcast %31 : vector<4x8x1xf32> to vector<4x8x16xf32>
    %33 = arith.mulf %28, %32 : vector<4x8x16xf32>
    "tpu.trace_start"() <{level = 10 : i32, message = "hqk,hkd->hqd"}> : () -> ()
    %cst_20 = arith.constant dense<0.000000e+00> : vector<4x8x8xf32>
    %34 = tpu.matmul %33, %20, %cst_20 {dimension_numbers = #tpu.dot_dimension_numbers<[2], [1], [1], [2], [0, 0, 0, 1, 1, 2], [0], [0]>} : vector<4x8x16xf32>, vector<4x16x8xf32>, vector<4x8x8xf32> -> vector<4x8x8xf32>
    "tpu.trace_stop"() : () -> ()
    %35 = tpu.transpose %34, [1, 0, 2] : vector<4x8x8xf32> -> vector<8x4x8xf32>
    %36 = vector.shape_cast %35 : vector<8x4x8xf32> to vector<8x32xf32>
    %c0_21 = arith.constant 0 : index
    %c0_22 = arith.constant 0 : index
    %c0_23 = arith.constant 0 : index
    %37 = vector.load %arg7[%c0_21, %c0_22, %c0_23] : memref<1x32x32xf32, #tpu.memory_space<vmem>>, vector<1x32x32xf32>
    %38 = vector.shape_cast %37 : vector<1x32x32xf32> to vector<32x32xf32>
    %c0_24 = arith.constant 0 : index
    %c0_25 = arith.constant 0 : index
    %c0_26 = arith.constant 0 : index
    %39 = vector.load %arg8[%c0_24, %c0_25, %c0_26] : memref<1x32x32xf32, #tpu.memory_space<vmem>>, vector<1x32x32xf32>
    %40 = vector.shape_cast %39 : vector<1x32x32xf32> to vector<32x32xf32>
    %c0_27 = arith.constant 0 : index
    %c0_28 = arith.constant 0 : index
    %c0_29 = arith.constant 0 : index
    %41 = vector.load %arg9[%c0_27, %c0_28, %c0_29] : memref<1x32x32xf32, #tpu.memory_space<vmem>>, vector<1x32x32xf32>
    %42 = vector.shape_cast %41 : vector<1x32x32xf32> to vector<32x32xf32>
    %cst_30 = arith.constant dense<0.000000e+00> : vector<16x32xf32>
    %43 = tpu.matmul %5, %38, %cst_30 {dimension_numbers = #tpu.dot_dimension_numbers<[1], [0], [0], [1], [0, 0, 1, 1], [], []>} : vector<16x32xf32>, vector<32x32xf32>, vector<16x32xf32> -> vector<16x32xf32>
    %cst_31 = arith.constant dense<0.000000e+00> : vector<8x32xf32>
    %44 = tpu.matmul %36, %40, %cst_31 {dimension_numbers = #tpu.dot_dimension_numbers<[1], [0], [0], [1], [0, 0, 1, 1], [], []>} : vector<8x32xf32>, vector<32x32xf32>, vector<8x32xf32> -> vector<8x32xf32>
    %cst_32 = arith.constant dense<0.000000e+00> : vector<8x32xf32>
    %45 = tpu.matmul %36, %42, %cst_32 {dimension_numbers = #tpu.dot_dimension_numbers<[1], [0], [0], [1], [0, 0, 1, 1], [], []>} : vector<8x32xf32>, vector<32x32xf32>, vector<8x32xf32> -> vector<8x32xf32>
    %46 = vector.shape_cast %43 : vector<16x32xf32> to vector<16x4x8xf32>
    %47 = tpu.transpose %46, [1, 0, 2] : vector<16x4x8xf32> -> vector<4x16x8xf32>
    %48 = vector.shape_cast %44 : vector<8x32xf32> to vector<8x4x8xf32>
    %49 = tpu.transpose %48, [1, 0, 2] : vector<8x4x8xf32> -> vector<4x8x8xf32>
    %50 = vector.shape_cast %45 : vector<8x32xf32> to vector<8x4x8xf32>
    %51 = tpu.transpose %50, [1, 0, 2] : vector<8x4x8xf32> -> vector<4x8x8xf32>
    "tpu.trace_start"() <{level = 10 : i32, message = "hqd,hkd->hqk"}> : () -> ()
    %cst_33 = arith.constant dense<0.000000e+00> : vector<4x16x8xf32>
    %52 = tpu.matmul %47, %49, %cst_33 {dimension_numbers = #tpu.dot_dimension_numbers<[2], [2], [1], [1], [0, 0, 0, 1, 1, 1], [0], [0]>} : vector<4x16x8xf32>, vector<4x8x8xf32>, vector<4x16x8xf32> -> vector<4x16x8xf32>
    "tpu.trace_stop"() : () -> ()
    %cst_34 = arith.constant 0.353553385 : f32
    %53 = vector.broadcast %cst_34 : f32 to vector<4x16x8xf32>
    %54 = arith.mulf %52, %53 : vector<4x16x8xf32>
    %cst_35 = arith.constant dense<0xFF800000> : vector<4x16xf32>
    %55 = vector.multi_reduction <maximumf>, %54, %cst_35 [2] : vector<4x16x8xf32> to vector<4x16xf32>
    %56 = vector.shape_cast %55 : vector<4x16xf32> to vector<4x16x1xf32>
    %57 = vector.broadcast %56 : vector<4x16x1xf32> to vector<4x16x8xf32>
    %58 = arith.subf %54, %57 : vector<4x16x8xf32>
    %59 = math.exp %58 : vector<4x16x8xf32>
    %cst_36 = arith.constant dense<0.000000e+00> : vector<4x16xf32>
    %60 = vector.multi_reduction <add>, %59, %cst_36 [2] : vector<4x16x8xf32> to vector<4x16xf32>
    %61 = vector.shape_cast %60 : vector<4x16xf32> to vector<4x16x1xf32>
    %62 = tpu.reciprocal %61 {approx = true} : vector<4x16x1xf32> -> vector<4x16x1xf32>
    %63 = vector.broadcast %62 : vector<4x16x1xf32> to vector<4x16x8xf32>
    %64 = arith.mulf %59, %63 : vector<4x16x8xf32>
    "tpu.trace_start"() <{level = 10 : i32, message = "hqk,hkd->hqd"}> : () -> ()
    %cst_37 = arith.constant dense<0.000000e+00> : vector<4x16x8xf32>
    %65 = tpu.matmul %64, %51, %cst_37 {dimension_numbers = #tpu.dot_dimension_numbers<[2], [1], [1], [2], [0, 0, 0, 1, 1, 2], [0], [0]>} : vector<4x16x8xf32>, vector<4x8x8xf32>, vector<4x16x8xf32> -> vector<4x16x8xf32>
    "tpu.trace_stop"() : () -> ()
    %66 = tpu.transpose %65, [1, 0, 2] : vector<4x16x8xf32> -> vector<16x4x8xf32>
    %67 = vector.shape_cast %66 : vector<16x4x8xf32> to vector<16x32xf32>
    %c0_38 = arith.constant 0 : index
    %c0_39 = arith.constant 0 : index
    %c0_40 = arith.constant 0 : index
    %68 = vector.load %arg10[%c0_38, %c0_39, %c0_40] : memref<1x32x32xf32, #tpu.memory_space<vmem>>, vector<1x32x32xf32>
    %69 = vector.shape_cast %68 : vector<1x32x32xf32> to vector<32x32xf32>
    %cst_41 = arith.constant dense<0.000000e+00> : vector<16x32xf32>
    %70 = tpu.matmul %67, %69, %cst_41 {dimension_numbers = #tpu.dot_dimension_numbers<[1], [0], [0], [1], [0, 0, 1, 1], [], []>} : vector<16x32xf32>, vector<32x32xf32>, vector<16x32xf32> -> vector<16x32xf32>
    %c0_42 = arith.constant 0 : index
    %c0_43 = arith.constant 0 : index
    %c0_44 = arith.constant 0 : index
    %71 = vector.load %arg11[%c0_42, %c0_43, %c0_44] : memref<1x1x32xf32, #tpu.memory_space<vmem>>, vector<1x1x32xf32>
    %72 = vector.shape_cast %71 : vector<1x1x32xf32> to vector<1x32xf32>
    %73 = vector.broadcast %72 : vector<1x32xf32> to vector<16x32xf32>
    %74 = arith.addf %70, %73 : vector<16x32xf32>
    %75 = arith.addf %5, %74 : vector<16x32xf32>
    %c0_45 = arith.constant 0 : index
    %c0_46 = arith.constant 0 : index
    %c0_47 = arith.constant 0 : index
    %76 = vector.load %arg12[%c0_45, %c0_46, %c0_47] : memref<1x1x32xf32, #tpu.memory_space<vmem>>, vector<1x1x32xf32>
    %77 = vector.shape_cast %76 : vector<1x1x32xf32> to vector<1x32xf32>
    %c0_48 = arith.constant 0 : index
    %c0_49 = arith.constant 0 : index
    %c0_50 = arith.constant 0 : index
    %78 = vector.load %arg13[%c0_48, %c0_49, %c0_50] : memref<1x1x32xf32, #tpu.memory_space<vmem>>, vector<1x1x32xf32>
    %79 = vector.shape_cast %78 : vector<1x1x32xf32> to vector<1x32xf32>
    %cst_51 = arith.constant dense<0.000000e+00> : vector<16xf32>
    %80 = vector.multi_reduction <add>, %75, %cst_51 [1] : vector<16x32xf32> to vector<16xf32>
    %81 = vector.shape_cast %80 : vector<16xf32> to vector<16x1xf32>
    %cst_52 = arith.constant 3.125000e-02 : f32
    %82 = vector.broadcast %cst_52 : f32 to vector<16x1xf32>
    %83 = arith.mulf %81, %82 : vector<16x1xf32>
    %84 = vector.broadcast %83 : vector<16x1xf32> to vector<16x32xf32>
    %85 = arith.subf %75, %84 : vector<16x32xf32>
    %86 = arith.mulf %85, %85 : vector<16x32xf32>
    %cst_53 = arith.constant dense<0.000000e+00> : vector<16xf32>
    %87 = vector.multi_reduction <add>, %86, %cst_53 [1] : vector<16x32xf32> to vector<16xf32>
    %88 = vector.shape_cast %87 : vector<16xf32> to vector<16x1xf32>
    %cst_54 = arith.constant 3.125000e-02 : f32
    %89 = vector.broadcast %cst_54 : f32 to vector<16x1xf32>
    %90 = arith.mulf %88, %89 : vector<16x1xf32>
    %cst_55 = arith.constant 9.99999974E-6 : f32
    %91 = vector.broadcast %cst_55 : f32 to vector<16x1xf32>
    %92 = arith.addf %90, %91 : vector<16x1xf32>
    %93 = math.rsqrt %92 : vector<16x1xf32>
    %94 = vector.broadcast %93 : vector<16x1xf32> to vector<16x32xf32>
    %95 = arith.mulf %85, %94 : vector<16x32xf32>
    %96 = vector.broadcast %77 : vector<1x32xf32> to vector<16x32xf32>
    %97 = arith.mulf %95, %96 : vector<16x32xf32>
    %98 = vector.broadcast %79 : vector<1x32xf32> to vector<16x32xf32>
    %99 = arith.addf %97, %98 : vector<16x32xf32>
    %c0_56 = arith.constant 0 : index
    %c0_57 = arith.constant 0 : index
    %100 = vector.load %arg32[%c0_56, %c0_57] : memref<16x32xf32, #tpu.memory_space<vmem>>, vector<16x32xf32>
    tpu.vector_store %arg32[%c0_56, %c0_57], %99 {strides = array<i32>} : memref<16x32xf32, #tpu.memory_space<vmem>>, vector<16x32xf32>,
    %c1_i32 = arith.constant 1 : i32
    %101 = arith.cmpi eq, %arg1, %c1_i32 : i32
    %102 = arith.extui %101 : i1 to i32
    %c0_i32_58 = arith.constant 0 : i32
    %103 = arith.cmpi ne, %102, %c0_i32_58 : i32
    scf.if %103 {
      %c0_59 = arith.constant 0 : index
      %c0_60 = arith.constant 0 : index
      %104 = vector.load %arg14[%c0_59, %c0_60] : memref<32x32xf32, #tpu.memory_space<vmem>>, vector<32x32xf32>
      %c0_61 = arith.constant 0 : index
      %c0_62 = arith.constant 0 : index
      %105 = vector.load %arg15[%c0_61, %c0_62] : memref<32x32xf32, #tpu.memory_space<vmem>>, vector<32x32xf32>
      %c0_63 = arith.constant 0 : index
      %c0_64 = arith.constant 0 : index
      %106 = vector.load %arg16[%c0_63, %c0_64] : memref<32x32xf32, #tpu.memory_space<vmem>>, vector<32x32xf32>
      %cst_65 = arith.constant dense<0.000000e+00> : vector<16x32xf32>
      %107 = tpu.matmul %99, %104, %cst_65 {dimension_numbers = #tpu.dot_dimension_numbers<[1], [0], [0], [1], [0, 0, 1, 1], [], []>} : vector<16x32xf32>, vector<32x32xf32>, vector<16x32xf32> -> vector<16x32xf32>
      %cst_66 = arith.constant dense<0.000000e+00> : vector<8x32xf32>
      %108 = tpu.matmul %4, %105, %cst_66 {dimension_numbers = #tpu.dot_dimension_numbers<[1], [0], [0], [1], [0, 0, 1, 1], [], []>} : vector<8x32xf32>, vector<32x32xf32>, vector<8x32xf32> -> vector<8x32xf32>
      %cst_67 = arith.constant dense<0.000000e+00> : vector<8x32xf32>
      %109 = tpu.matmul %4, %106, %cst_67 {dimension_numbers = #tpu.dot_dimension_numbers<[1], [0], [0], [1], [0, 0, 1, 1], [], []>} : vector<8x32xf32>, vector<32x32xf32>, vector<8x32xf32> -> vector<8x32xf32>
      %110 = vector.shape_cast %107 : vector<16x32xf32> to vector<16x4x8xf32>
      %111 = tpu.transpose %110, [1, 0, 2] : vector<16x4x8xf32> -> vector<4x16x8xf32>
      %112 = vector.shape_cast %108 : vector<8x32xf32> to vector<8x4x8xf32>
      %113 = tpu.transpose %112, [1, 0, 2] : vector<8x4x8xf32> -> vector<4x8x8xf32>
      %114 = vector.shape_cast %109 : vector<8x32xf32> to vector<8x4x8xf32>
      %115 = tpu.transpose %114, [1, 0, 2] : vector<8x4x8xf32> -> vector<4x8x8xf32>
      "tpu.trace_start"() <{level = 10 : i32, message = "hqd,hkd->hqk"}> : () -> ()
      %cst_68 = arith.constant dense<0.000000e+00> : vector<4x16x8xf32>
      %116 = tpu.matmul %111, %113, %cst_68 {dimension_numbers = #tpu.dot_dimension_numbers<[2], [2], [1], [1], [0, 0, 0, 1, 1, 1], [0], [0]>} : vector<4x16x8xf32>, vector<4x8x8xf32>, vector<4x16x8xf32> -> vector<4x16x8xf32>
      "tpu.trace_stop"() : () -> ()
      %cst_69 = arith.constant 0.353553385 : f32
      %117 = vector.broadcast %cst_69 : f32 to vector<4x16x8xf32>
      %118 = arith.mulf %116, %117 : vector<4x16x8xf32>
      %cst_70 = arith.constant dense<0xFF800000> : vector<4x16xf32>
      %119 = vector.multi_reduction <maximumf>, %118, %cst_70 [2] : vector<4x16x8xf32> to vector<4x16xf32>
      %120 = vector.shape_cast %119 : vector<4x16xf32> to vector<4x16x1xf32>
      %121 = vector.broadcast %120 : vector<4x16x1xf32> to vector<4x16x8xf32>
      %122 = arith.subf %118, %121 : vector<4x16x8xf32>
      %123 = math.exp %122 : vector<4x16x8xf32>
      %cst_71 = arith.constant dense<0.000000e+00> : vector<4x16xf32>
      %124 = vector.multi_reduction <add>, %123, %cst_71 [2] : vector<4x16x8xf32> to vector<4x16xf32>
      %125 = vector.shape_cast %124 : vector<4x16xf32> to vector<4x16x1xf32>
      %126 = tpu.reciprocal %125 {approx = true} : vector<4x16x1xf32> -> vector<4x16x1xf32>
      %127 = vector.broadcast %126 : vector<4x16x1xf32> to vector<4x16x8xf32>
      %128 = arith.mulf %123, %127 : vector<4x16x8xf32>
      "tpu.trace_start"() <{level = 10 : i32, message = "hqk,hkd->hqd"}> : () -> ()
      %cst_72 = arith.constant dense<0.000000e+00> : vector<4x16x8xf32>
      %129 = tpu.matmul %128, %115, %cst_72 {dimension_numbers = #tpu.dot_dimension_numbers<[2], [1], [1], [2], [0, 0, 0, 1, 1, 2], [0], [0]>} : vector<4x16x8xf32>, vector<4x8x8xf32>, vector<4x16x8xf32> -> vector<4x16x8xf32>
      "tpu.trace_stop"() : () -> ()
      %130 = tpu.transpose %129, [1, 0, 2] : vector<4x16x8xf32> -> vector<16x4x8xf32>
      %131 = vector.shape_cast %130 : vector<16x4x8xf32> to vector<16x32xf32>
      %c0_73 = arith.constant 0 : index
      %c0_74 = arith.constant 0 : index
      %132 = vector.load %arg17[%c0_73, %c0_74] : memref<32x32xf32, #tpu.memory_space<vmem>>, vector<32x32xf32>
      %cst_75 = arith.constant dense<0.000000e+00> : vector<16x32xf32>
      %133 = tpu.matmul %131, %132, %cst_75 {dimension_numbers = #tpu.dot_dimension_numbers<[1], [0], [0], [1], [0, 0, 1, 1], [], []>} : vector<16x32xf32>, vector<32x32xf32>, vector<16x32xf32> -> vector<16x32xf32>
      %c0_76 = arith.constant 0 : index
      %c0_77 = arith.constant 0 : index
      %134 = vector.load %arg18[%c0_76, %c0_77] : memref<1x32xf32, #tpu.memory_space<vmem>>, vector<1x32xf32>
      %135 = vector.broadcast %134 : vector<1x32xf32> to vector<16x32xf32>
      %136 = arith.addf %133, %135 : vector<16x32xf32>
      %137 = vector.extract_strided_slice %136 {offsets = [0, 0], sizes = [8, 32], strides = [1, 1]} : vector<16x32xf32> to vector<8x32xf32>
      %138 = arith.addf %4, %137 : vector<8x32xf32>
      %c0_78 = arith.constant 0 : index
      %c0_79 = arith.constant 0 : index
      %139 = vector.load %arg19[%c0_78, %c0_79] : memref<1x32xf32, #tpu.memory_space<vmem>>, vector<1x32xf32>
      %c0_80 = arith.constant 0 : index
      %c0_81 = arith.constant 0 : index
      %140 = vector.load %arg20[%c0_80, %c0_81] : memref<1x32xf32, #tpu.memory_space<vmem>>, vector<1x32xf32>
      %cst_82 = arith.constant dense<0.000000e+00> : vector<8xf32>
      %141 = vector.multi_reduction <add>, %138, %cst_82 [1] : vector<8x32xf32> to vector<8xf32>
      %142 = vector.shape_cast %141 : vector<8xf32> to vector<8x1xf32>
      %cst_83 = arith.constant 3.125000e-02 : f32
      %143 = vector.broadcast %cst_83 : f32 to vector<8x1xf32>
      %144 = arith.mulf %142, %143 : vector<8x1xf32>
      %145 = vector.broadcast %144 : vector<8x1xf32> to vector<8x32xf32>
      %146 = arith.subf %138, %145 : vector<8x32xf32>
      %147 = arith.mulf %146, %146 : vector<8x32xf32>
      %cst_84 = arith.constant dense<0.000000e+00> : vector<8xf32>
      %148 = vector.multi_reduction <add>, %147, %cst_84 [1] : vector<8x32xf32> to vector<8xf32>
      %149 = vector.shape_cast %148 : vector<8xf32> to vector<8x1xf32>
      %cst_85 = arith.constant 3.125000e-02 : f32
      %150 = vector.broadcast %cst_85 : f32 to vector<8x1xf32>
      %151 = arith.mulf %149, %150 : vector<8x1xf32>
      %cst_86 = arith.constant 9.99999974E-6 : f32
      %152 = vector.broadcast %cst_86 : f32 to vector<8x1xf32>
      %153 = arith.addf %151, %152 : vector<8x1xf32>
      %154 = math.rsqrt %153 : vector<8x1xf32>
      %155 = vector.broadcast %154 : vector<8x1xf32> to vector<8x32xf32>
      %156 = arith.mulf %146, %155 : vector<8x32xf32>
      %157 = vector.broadcast %139 : vector<1x32xf32> to vector<8x32xf32>
      %158 = arith.mulf %156, %157 : vector<8x32xf32>
      %159 = vector.broadcast %140 : vector<1x32xf32> to vector<8x32xf32>
      %160 = arith.addf %158, %159 : vector<8x32xf32>
      %c0_87 = arith.constant 0 : index
      %c0_88 = arith.constant 0 : index
      %161 = vector.load %arg23[%c0_87, %c0_88] : memref<32x64xf32, #tpu.memory_space<vmem>>, vector<32x64xf32>
      %cst_89 = arith.constant dense<0.000000e+00> : vector<8x64xf32>
      %162 = tpu.matmul %160, %161, %cst_89 {dimension_numbers = #tpu.dot_dimension_numbers<[1], [0], [0], [1], [0, 0, 1, 1], [], []>} : vector<8x32xf32>, vector<32x64xf32>, vector<8x64xf32> -> vector<8x64xf32>
      %c0_90 = arith.constant 0 : index
      %c0_91 = arith.constant 0 : index
      %163 = vector.load %arg24[%c0_90, %c0_91] : memref<1x64xf32, #tpu.memory_space<vmem>>, vector<1x64xf32>
      %164 = vector.broadcast %163 : vector<1x64xf32> to vector<8x64xf32>
      %165 = arith.addf %162, %164 : vector<8x64xf32>
      %cst_92 = arith.constant 0.000000e+00 : f32
      %166 = vector.broadcast %cst_92 : f32 to vector<8x64xf32>
      %167 = arith.maximumf %165, %166 : vector<8x64xf32>
      %c0_93 = arith.constant 0 : index
      %c0_94 = arith.constant 0 : index
      %168 = vector.load %arg25[%c0_93, %c0_94] : memref<64x32xf32, #tpu.memory_space<vmem>>, vector<64x32xf32>
      %cst_95 = arith.constant dense<0.000000e+00> : vector<8x32xf32>
      %169 = tpu.matmul %167, %168, %cst_95 {dimension_numbers = #tpu.dot_dimension_numbers<[1], [0], [0], [1], [0, 0, 1, 1], [], []>} : vector<8x64xf32>, vector<64x32xf32>, vector<8x32xf32> -> vector<8x32xf32>
      %c0_96 = arith.constant 0 : index
      %c0_97 = arith.constant 0 : index
      %170 = vector.load %arg26[%c0_96, %c0_97] : memref<1x32xf32, #tpu.memory_space<vmem>>, vector<1x32xf32>
      %171 = vector.broadcast %170 : vector<1x32xf32> to vector<8x32xf32>
      %172 = arith.addf %169, %171 : vector<8x32xf32>
      %173 = arith.addf %160, %172 : vector<8x32xf32>
      %c0_98 = arith.constant 0 : index
      %c0_99 = arith.constant 0 : index
      %174 = vector.load %arg21[%c0_98, %c0_99] : memref<1x32xf32, #tpu.memory_space<vmem>>, vector<1x32xf32>
      %c0_100 = arith.constant 0 : index
      %c0_101 = arith.constant 0 : index
      %175 = vector.load %arg22[%c0_100, %c0_101] : memref<1x32xf32, #tpu.memory_space<vmem>>, vector<1x32xf32>
      %cst_102 = arith.constant dense<0.000000e+00> : vector<8xf32>
      %176 = vector.multi_reduction <add>, %173, %cst_102 [1] : vector<8x32xf32> to vector<8xf32>
      %177 = vector.shape_cast %176 : vector<8xf32> to vector<8x1xf32>
      %cst_103 = arith.constant 3.125000e-02 : f32
      %178 = vector.broadcast %cst_103 : f32 to vector<8x1xf32>
      %179 = arith.mulf %177, %178 : vector<8x1xf32>
      %180 = vector.broadcast %179 : vector<8x1xf32> to vector<8x32xf32>
      %181 = arith.subf %173, %180 : vector<8x32xf32>
      %182 = arith.mulf %181, %181 : vector<8x32xf32>
      %cst_104 = arith.constant dense<0.000000e+00> : vector<8xf32>
      %183 = vector.multi_reduction <add>, %182, %cst_104 [1] : vector<8x32xf32> to vector<8xf32>
      %184 = vector.shape_cast %183 : vector<8xf32> to vector<8x1xf32>
      %cst_105 = arith.constant 3.125000e-02 : f32
      %185 = vector.broadcast %cst_105 : f32 to vector<8x1xf32>
      %186 = arith.mulf %184, %185 : vector<8x1xf32>
      %cst_106 = arith.constant 9.99999974E-6 : f32
      %187 = vector.broadcast %cst_106 : f32 to vector<8x1xf32>
      %188 = arith.addf %186, %187 : vector<8x1xf32>
      %189 = math.rsqrt %188 : vector<8x1xf32>
      %190 = vector.broadcast %189 : vector<8x1xf32> to vector<8x32xf32>
      %191 = arith.mulf %181, %190 : vector<8x32xf32>
      %192 = vector.broadcast %174 : vector<1x32xf32> to vector<8x32xf32>
      %193 = arith.mulf %191, %192 : vector<8x32xf32>
      %194 = vector.broadcast %175 : vector<1x32xf32> to vector<8x32xf32>
      %195 = arith.addf %193, %194 : vector<8x32xf32>
      %c0_107 = arith.constant 0 : index
      %c0_108 = arith.constant 0 : index
      %196 = vector.load %arg27[%c0_107, %c0_108] : memref<1x32xf32, #tpu.memory_space<vmem>>, vector<1x32xf32>
      %c0_109 = arith.constant 0 : index
      %c0_110 = arith.constant 0 : index
      %197 = vector.load %arg28[%c0_109, %c0_110] : memref<1x32xf32, #tpu.memory_space<vmem>>, vector<1x32xf32>
      %cst_111 = arith.constant dense<0.000000e+00> : vector<8xf32>
      %198 = vector.multi_reduction <add>, %195, %cst_111 [1] : vector<8x32xf32> to vector<8xf32>
      %199 = vector.shape_cast %198 : vector<8xf32> to vector<8x1xf32>
      %cst_112 = arith.constant 3.125000e-02 : f32
      %200 = vector.broadcast %cst_112 : f32 to vector<8x1xf32>
      %201 = arith.mulf %199, %200 : vector<8x1xf32>
      %202 = vector.broadcast %201 : vector<8x1xf32> to vector<8x32xf32>
      %203 = arith.subf %195, %202 : vector<8x32xf32>
      %204 = arith.mulf %203, %203 : vector<8x32xf32>
      %cst_113 = arith.constant dense<0.000000e+00> : vector<8xf32>
      %205 = vector.multi_reduction <add>, %204, %cst_113 [1] : vector<8x32xf32> to vector<8xf32>
      %206 = vector.shape_cast %205 : vector<8xf32> to vector<8x1xf32>
      %cst_114 = arith.constant 3.125000e-02 : f32
      %207 = vector.broadcast %cst_114 : f32 to vector<8x1xf32>
      %208 = arith.mulf %206, %207 : vector<8x1xf32>
      %cst_115 = arith.constant 9.99999974E-6 : f32
      %209 = vector.broadcast %cst_115 : f32 to vector<8x1xf32>
      %210 = arith.addf %208, %209 : vector<8x1xf32>
      %211 = math.rsqrt %210 : vector<8x1xf32>
      %212 = vector.broadcast %211 : vector<8x1xf32> to vector<8x32xf32>
      %213 = arith.mulf %203, %212 : vector<8x32xf32>
      %214 = vector.broadcast %196 : vector<1x32xf32> to vector<8x32xf32>
      %215 = arith.mulf %213, %214 : vector<8x32xf32>
      %216 = vector.broadcast %197 : vector<1x32xf32> to vector<8x32xf32>
      %217 = arith.addf %215, %216 : vector<8x32xf32>
      %c0_116 = arith.constant 0 : index
      %c0_117 = arith.constant 0 : index
      %218 = vector.load %arg29[%c0_116, %c0_117] : memref<32x128xf32, #tpu.memory_space<vmem>>, vector<32x128xf32>
      %cst_118 = arith.constant dense<0.000000e+00> : vector<8x128xf32>
      %219 = tpu.matmul %217, %218, %cst_118 {dimension_numbers = #tpu.dot_dimension_numbers<[1], [0], [0], [1], [0, 0, 1, 1], [], []>} : vector<8x32xf32>, vector<32x128xf32>, vector<8x128xf32> -> vector<8x128xf32>
      %c0_119 = arith.constant 0 : index
      %c0_120 = arith.constant 0 : index
      %220 = vector.load %arg30[%c0_119, %c0_120] : memref<1x128xf32, #tpu.memory_space<vmem>>, vector<1x128xf32>
      %221 = vector.broadcast %220 : vector<1x128xf32> to vector<8x128xf32>
      %222 = arith.addf %219, %221 : vector<8x128xf32>
      %c0_121 = arith.constant 0 : index
      %c0_122 = arith.constant 0 : index
      %c0_123 = arith.constant 0 : index
      %223 = vector.load %arg31[%c0_121, %c0_122, %c0_123] : memref<1x8x128xf32, #tpu.memory_space<vmem>>, vector<1x8x128xf32>
      %224 = vector.shape_cast %223 : vector<1x8x128xf32> to vector<8x128xf32>
      %225 = vector.shape_cast %222 : vector<8x128xf32> to vector<1x8x128xf32>
      tpu.vector_store %arg31[%c0_121, %c0_122, %c0_123], %225 {strides = array<i32>} : memref<1x8x128xf32, #tpu.memory_space<vmem>>, vector<1x8x128xf32>,
    } else {
    }
    return
  }
  func.func @transform_0(%arg0: i32, %arg1: i32) -> (i32, i32, i32) {
    %c0_i32 = arith.constant 0 : i32
    %c0_i32_0 = arith.constant 0 : i32
    %c0_i32_1 = arith.constant 0 : i32
    return %arg0, %c0_i32, %c0_i32_0 : i32, i32, i32
  }
  func.func @transform_1(%arg0: i32, %arg1: i32) -> (i32, i32, i32) {
    %c0_i32 = arith.constant 0 : i32
    %c0_i32_0 = arith.constant 0 : i32
    %c0_i32_1 = arith.constant 0 : i32
    %c0_i32_2 = arith.constant 0 : i32
    return %c0_i32, %c0_i32_0, %c0_i32_1 : i32, i32, i32
  }
  func.func @transform_2(%arg0: i32, %arg1: i32) -> (i32, i32, i32) {
    %c0_i32 = arith.constant 0 : i32
    %c0_i32_0 = arith.constant 0 : i32
    %c0_i32_1 = arith.constant 0 : i32
    return %arg1, %c0_i32, %c0_i32_0 : i32, i32, i32
  }
  func.func @transform_3(%arg0: i32, %arg1: i32) -> (i32, i32, i32) {
    %c0_i32 = arith.constant 0 : i32
    %c0_i32_0 = arith.constant 0 : i32
    %c0_i32_1 = arith.constant 0 : i32
    return %arg1, %c0_i32, %c0_i32_0 : i32, i32, i32
  }
  func.func @transform_4(%arg0: i32, %arg1: i32) -> (i32, i32, i32) {
    %c0_i32 = arith.constant 0 : i32
    %c0_i32_0 = arith.constant 0 : i32
    %c0_i32_1 = arith.constant 0 : i32
    return %arg1, %c0_i32, %c0_i32_0 : i32, i32, i32
  }
  func.func @transform_5(%arg0: i32, %arg1: i32) -> (i32, i32, i32) {
    %c0_i32 = arith.constant 0 : i32
    %c0_i32_0 = arith.constant 0 : i32
    %c0_i32_1 = arith.constant 0 : i32
    return %arg1, %c0_i32, %c0_i32_0 : i32, i32, i32
  }
  func.func @transform_6(%arg0: i32, %arg1: i32) -> (i32, i32, i32) {
    %c0_i32 = arith.constant 0 : i32
    %c0_i32_0 = arith.constant 0 : i32
    %c0_i32_1 = arith.constant 0 : i32
    return %arg1, %c0_i32, %c0_i32_0 : i32, i32, i32
  }
  func.func @transform_7(%arg0: i32, %arg1: i32) -> (i32, i32, i32) {
    %c0_i32 = arith.constant 0 : i32
    %c0_i32_0 = arith.constant 0 : i32
    %c0_i32_1 = arith.constant 0 : i32
    return %arg1, %c0_i32, %c0_i32_0 : i32, i32, i32
  }
  func.func @transform_8(%arg0: i32, %arg1: i32) -> (i32, i32, i32) {
    %c0_i32 = arith.constant 0 : i32
    %c0_i32_0 = arith.constant 0 : i32
    %c0_i32_1 = arith.constant 0 : i32
    return %arg1, %c0_i32, %c0_i32_0 : i32, i32, i32
  }
  func.func @transform_9(%arg0: i32, %arg1: i32) -> (i32, i32, i32) {
    %c0_i32 = arith.constant 0 : i32
    %c0_i32_0 = arith.constant 0 : i32
    %c0_i32_1 = arith.constant 0 : i32
    return %arg1, %c0_i32, %c0_i32_0 : i32, i32, i32
  }
  func.func @transform_10(%arg0: i32, %arg1: i32) -> (i32, i32, i32) {
    %c0_i32 = arith.constant 0 : i32
    %c0_i32_0 = arith.constant 0 : i32
    %c0_i32_1 = arith.constant 0 : i32
    return %arg1, %c0_i32, %c0_i32_0 : i32, i32, i32
  }
  func.func @transform_11(%arg0: i32, %arg1: i32) -> (i32, i32, i32) {
    %c0_i32 = arith.constant 0 : i32
    %c0_i32_0 = arith.constant 0 : i32
    %c0_i32_1 = arith.constant 0 : i32
    return %arg1, %c0_i32, %c0_i32_0 : i32, i32, i32
  }
  func.func @transform_12(%arg0: i32, %arg1: i32) -> (i32, i32) {
    %c0_i32 = arith.constant 0 : i32
    %c0_i32_0 = arith.constant 0 : i32
    %c0_i32_1 = arith.constant 0 : i32
    return %c0_i32, %c0_i32_0 : i32, i32
  }
  func.func @transform_13(%arg0: i32, %arg1: i32) -> (i32, i32) {
    %c0_i32 = arith.constant 0 : i32
    %c0_i32_0 = arith.constant 0 : i32
    %c0_i32_1 = arith.constant 0 : i32
    return %c0_i32, %c0_i32_0 : i32, i32
  }
  func.func @transform_14(%arg0: i32, %arg1: i32) -> (i32, i32) {
    %c0_i32 = arith.constant 0 : i32
    %c0_i32_0 = arith.constant 0 : i32
    %c0_i32_1 = arith.constant 0 : i32
    return %c0_i32, %c0_i32_0 : i32, i32
  }
  func.func @transform_15(%arg0: i32, %arg1: i32) -> (i32, i32) {
    %c0_i32 = arith.constant 0 : i32
    %c0_i32_0 = arith.constant 0 : i32
    %c0_i32_1 = arith.constant 0 : i32
    return %c0_i32, %c0_i32_0 : i32, i32
  }
  func.func @transform_16(%arg0: i32, %arg1: i32) -> (i32, i32) {
    %c0_i32 = arith.constant 0 : i32
    %c0_i32_0 = arith.constant 0 : i32
    %c0_i32_1 = arith.constant 0 : i32
    return %c0_i32, %c0_i32_0 : i32, i32
  }
  func.func @transform_17(%arg0: i32, %arg1: i32) -> (i32, i32) {
    %c0_i32 = arith.constant 0 : i32
    %c0_i32_0 = arith.constant 0 : i32
    %c0_i32_1 = arith.constant 0 : i32
    return %c0_i32, %c0_i32_0 : i32, i32
  }
  func.func @transform_18(%arg0: i32, %arg1: i32) -> (i32, i32) {
    %c0_i32 = arith.constant 0 : i32
    %c0_i32_0 = arith.constant 0 : i32
    %c0_i32_1 = arith.constant 0 : i32
    return %c0_i32, %c0_i32_0 : i32, i32
  }
  func.func @transform_19(%arg0: i32, %arg1: i32) -> (i32, i32) {
    %c0_i32 = arith.constant 0 : i32
    %c0_i32_0 = arith.constant 0 : i32
    %c0_i32_1 = arith.constant 0 : i32
    return %c0_i32, %c0_i32_0 : i32, i32
  }
  func.func @transform_20(%arg0: i32, %arg1: i32) -> (i32, i32) {
    %c0_i32 = arith.constant 0 : i32
    %c0_i32_0 = arith.constant 0 : i32
    %c0_i32_1 = arith.constant 0 : i32
    return %c0_i32, %c0_i32_0 : i32, i32
  }
  func.func @transform_21(%arg0: i32, %arg1: i32) -> (i32, i32) {
    %c0_i32 = arith.constant 0 : i32
    %c0_i32_0 = arith.constant 0 : i32
    %c0_i32_1 = arith.constant 0 : i32
    return %c0_i32, %c0_i32_0 : i32, i32
  }
  func.func @transform_22(%arg0: i32, %arg1: i32) -> (i32, i32) {
    %c0_i32 = arith.constant 0 : i32
    %c0_i32_0 = arith.constant 0 : i32
    %c0_i32_1 = arith.constant 0 : i32
    return %c0_i32, %c0_i32_0 : i32, i32
  }
  func.func @transform_23(%arg0: i32, %arg1: i32) -> (i32, i32) {
    %c0_i32 = arith.constant 0 : i32
    %c0_i32_0 = arith.constant 0 : i32
    %c0_i32_1 = arith.constant 0 : i32
    return %c0_i32, %c0_i32_0 : i32, i32
  }
  func.func @transform_24(%arg0: i32, %arg1: i32) -> (i32, i32) {
    %c0_i32 = arith.constant 0 : i32
    %c0_i32_0 = arith.constant 0 : i32
    %c0_i32_1 = arith.constant 0 : i32
    return %c0_i32, %c0_i32_0 : i32, i32
  }
  func.func @transform_25(%arg0: i32, %arg1: i32) -> (i32, i32) {
    %c0_i32 = arith.constant 0 : i32
    %c0_i32_0 = arith.constant 0 : i32
    %c0_i32_1 = arith.constant 0 : i32
    return %c0_i32, %c0_i32_0 : i32, i32
  }
  func.func @transform_26(%arg0: i32, %arg1: i32) -> (i32, i32) {
    %c0_i32 = arith.constant 0 : i32
    %c0_i32_0 = arith.constant 0 : i32
    %c0_i32_1 = arith.constant 0 : i32
    return %c0_i32, %c0_i32_0 : i32, i32
  }
  func.func @transform_27(%arg0: i32, %arg1: i32) -> (i32, i32) {
    %c0_i32 = arith.constant 0 : i32
    %c0_i32_0 = arith.constant 0 : i32
    %c0_i32_1 = arith.constant 0 : i32
    return %c0_i32, %c0_i32_0 : i32, i32
  }
  func.func @transform_28(%arg0: i32, %arg1: i32) -> (i32, i32) {
    %c0_i32 = arith.constant 0 : i32
    %c0_i32_0 = arith.constant 0 : i32
    %c0_i32_1 = arith.constant 0 : i32
    return %c0_i32, %c0_i32_0 : i32, i32
  }
  func.func @transform_29(%arg0: i32, %arg1: i32) -> (i32, i32, i32) {
    %c0_i32 = arith.constant 0 : i32
    %c0_i32_0 = arith.constant 0 : i32
    %c0_i32_1 = arith.constant 0 : i32
    return %arg0, %c0_i32, %c0_i32_0 : i32, i32, i32
  }
}

</mosaic_0001>

<bundles_post_ra>
// kernel: residual_transformer_forward.1
= control target key start
LH: loop header
LB: loop body
LE: loop exit
PB: predicated region body
PF: predicated region fallthrough
CT: control target
= control target key end

     0   :  { %s9481_s6 = smov 1   ;;  %s9482_s10 = smov 2   ;;  %s10943_s0 = inlined_call_operand.smem [shape: u32[30], index: -1, kind: input, shape index: {}] }
   0x1   :  { %s9556_s5 = sld [smem:[%s10943_s0]]   ;;  %s9483_s14 = smov 3  }
   0x2   :  { %s9561_s9 = sld [smem:[%s10943_s0 + %s9481_s6]]   ;;  %s9484_s18 = smov 4  }
   0x3   :  { %s9566_s13 = sld [smem:[%s10943_s0 + %s9482_s10]]   ;;  %s9485_s22 = smov 5  }
   0x4   :  { %s9571_s17 = sld [smem:[%s10943_s0 + %s9483_s14]]   ;;  %s9486_s26 = smov 6  }
   0x5   :  { %s9576_s21 = sld [smem:[%s10943_s0 + %s9484_s18]]   ;;  %s9487_s30 = smov 7  }
   0x6   :  { %s9581_s25 = sld [smem:[%s10943_s0 + %s9485_s22]]   ;;  %s9488_s4 = smov 8  }
   0x7   :  { %10979 = sst [smem:[#allocation41_spill]] %s9556_s5  ;;  %s9489_s10 = smov 9  }
   0x8   :  { %10980 = sst [smem:[#allocation42_spill]] %s9561_s9  ;;  %s9490_s15 = smov 10  }
   0x9   :  { %10981 = sst [smem:[#allocation43_spill]] %s9566_s13  ;;  %s9491_s20 = smov 11  }
   0xa   :  { %10982 = sst [smem:[#allocation44_spill]] %s9571_s17  ;;  %s9493_s1 = smov 13  }
   0xb   :  { %10983 = sst [smem:[#allocation45_spill]] %s9576_s21  ;;  %s9494_s7 = smov 14  }
   0xc   :  { %10984 = sst [smem:[#allocation46_spill]] %s9581_s25  ;;  %s9496_s22 = smov 16  }
   0xd   :  { %s9586_s29 = sld [smem:[%s10943_s0 + %s9486_s26]]   ;;  %s9492_s26 = smov 12  }
   0xe   :  { %s9591_s3 = sld [smem:[%s10943_s0 + %s9487_s30]]   ;;  %s9497_s28 = smov 17  }
   0xf   :  { %s9596_s8 = sld [smem:[%s10943_s0 + %s9488_s4]]  }
  0x10   :  { %s9601_s14 = sld [smem:[%s10943_s0 + %s9489_s10]]  }
  0x11   :  { %s9606_s19 = sld [smem:[%s10943_s0 + %s9490_s15]]   ;;  %s9495_s15 = smov 15  }
  0x12   :  { %s9611_s24 = sld [smem:[%s10943_s0 + %s9491_s20]]  }
  0x13   :  { %10985 = sst [smem:[#allocation47_spill]] %s9586_s29 }
  0x14   :  { %10986 = sst [smem:[#allocation48_spill]] %s9591_s3 }
  0x15   :  { %10987 = sst [smem:[#allocation49_spill]] %s9596_s8 }
  0x16   :  { %10988 = sst [smem:[#allocation50_spill]] %s9601_s14 }
  0x17   :  { %10989 = sst [smem:[#allocation51_spill]] %s9606_s19 }
  0x18   :  { %10990 = sst [smem:[#allocation52_spill]] %s9611_s24 }
  0x19   :  { %s9616_s30 = sld [smem:[%s10943_s0 + %s9492_s26]]  }
  0x1a   :  { %s9621_s6 = sld [smem:[%s10943_s0 + %s9493_s1]]  }
  0x1b   :  { %s9626_s12 = sld [smem:[%s10943_s0 + %s9494_s7]]   ;;  %s9498_s7 = smov 18  }
  0x1c   :  { %s9631_s20 = sld [smem:[%s10943_s0 + %s9495_s15]]   ;;  %s9499_s15 = smov 19  }
  0x1d   :  { %s9636_s27 = sld [smem:[%s10943_s0 + %s9496_s22]]   ;;  %s9500_s22 = smov 20  }
  0x1e   :  { %s9641_s4 = sld [smem:[%s10943_s0 + %s9497_s28]]   ;;  %s9501_s28 = smov 21  }
  0x1f   :  { %10991 = sst [smem:[#allocation53_spill]] %s9616_s30 }
  0x20   :  { %10992 = sst [smem:[#allocation54_spill]] %s9621_s6 }
  0x21   :  { %10993 = sst [smem:[#allocation55_spill]] %s9626_s12 }
  0x22   :  { %10994 = sst [smem:[#allocation56_spill]] %s9631_s20 }
  0x23   :  { %10995 = sst [smem:[#allocation57_spill]] %s9636_s27 }
  0x24   :  { %10996 = sst [smem:[#allocation58_spill]] %s9641_s4 }
  0x25   :  { %s9646_s9 = sld [smem:[%s10943_s0 + %s9498_s7]]   ;;  %s9502_s7 = smov 22  }
  0x26   :  { %s9651_s8 = sld [smem:[%s10943_s0 + %s9499_s15]]   ;;  %s9503_s15 = smov 23  }
  0x27   :  { %s9656_s3 = sld [smem:[%s10943_s0 + %s9500_s22]]   ;;  %s9504_s22 = smov 24  }
  0x28   :  { %s9661_s29 = sld [smem:[%s10943_s0 + %s9501_s28]]   ;;  %s9505_s28 = smov 25  }
  0x29   :  { %s9666_s25 = sld [smem:[%s10943_s0 + %s9502_s7]]   ;;  %s9506_s7 = smov 26  }
  0x2a   :  { %s9671_s21 = sld [smem:[%s10943_s0 + %s9503_s15]]   ;;  %s9507_s15 = smov 27  }
  0x2b   :  { %10997 = sst [smem:[#allocation59_spill]] %s9646_s9 }
  0x2c   :  { %10998 = sst [smem:[#allocation60_spill]] %s9651_s8 }
  0x2d   :  { %10999 = sst [smem:[#allocation61_spill]] %s9656_s3 }
  0x2e   :  { %11000 = sst [smem:[#allocation62_spill]] %s9661_s29 }
  0x2f   :  { %11001 = sst [smem:[#allocation63_spill]] %s9666_s25 }
  0x30   :  { %11002 = sst [smem:[#allocation64_spill]] %s9671_s21 }
  0x31   :  { %s9676_s17 = sld [smem:[%s10943_s0 + %s9504_s22]]   ;;  %s9508_s22 = smov 28  }
  0x32   :  { %s9681_s13 = sld [smem:[%s10943_s0 + %s9505_s28]]   ;;  %s9509_s28 = smov 29  }
  0x33   :  { %s9686_s5 = sld [smem:[%s10943_s0 + %s9506_s7]]  }
  0x34   :  { %s9691_s21 = sld [smem:[%s10943_s0 + %s9507_s15]]  }
  0x35   :  { %s9696_s24 = sld [smem:[%s10943_s0 + %s9508_s22]]  }
  0x36   :  { %s9701_s14 = sld [smem:[%s10943_s0 + %s9509_s28]]  }
  0x37   :  { %11003 = sst [smem:[#allocation65_spill]] %s9676_s17 }
  0x38   :  { %11004 = sst [smem:[#allocation66_spill]] %s9681_s13 }
  0x39   :  { %11005 = sst [smem:[#allocation67_spill]] %s9686_s5 }
  0x3a   :  { %11006 = sst [smem:[#allocation68_spill]] %s9691_s21 }
  0x3b   :  { %11007 = sst [smem:[#allocation69_spill]] %s9696_s24 }
  0x3c   :  { %11008 = sst [smem:[#allocation70_spill]] %s9701_s14 }
  0x3d   :  { %64 = vsyncpa [#allocation4], 0 }
  0x3e   :  { %66 = vsyncpa [#allocation4 + $0x1], 0 }
  0x3f   :  { %67 = vsyncpa [#allocation7], 0 }
  0x40   :  { %69 = vsyncpa [#allocation7 + $0x1], 0 }
  0x41   :  { %70 = vsyncpa [#allocation10], 0 }
  0x42   :  { %71 = vsyncpa [#allocation13], 0 }
  0x43   :  { %72 = vsyncpa [#allocation16], 0 }
  0x44   :  { %73 = vsyncpa [#allocation19], 0 }
  0x45   :  { %74 = vsyncpa [#allocation22], 0 }
  0x46   :  { %75 = vsyncpa [#allocation25], 0 }
  0x47   :  { %76 = vsyncpa [#allocation28], 0 }
  0x48   :  { %77 = vsyncpa [#allocation5], 0 }
  0x49   :  { %79 = vsyncpa [#allocation5 + $0x1], 0  ;;  %s9703_s7 = smov 0   ;;  %s9705_s10 = smov 0  }
  0x4a   :  { %s9707_s11 = smov 0   ;;  %s9709_s0 = smov 0  }
  0x4b   :  { %s9711_s15 = smov 0   ;;  %s9713_s16 = smov 0  }
  0x4c   :  { %s9715_s18 = smov 0   ;;  %s9717_s22 = smov 0  }
  0x4d   :  { %s9719_s23 = smov 0   ;;  %s9721_s26 = smov 0  }
  0x4e   :  { %s9723_s28 = smov 0  }
  0x4f LB: > { %s11009_s19 = sld [smem:[#allocation51_spill]]  ;;  %s9759_s1 = sadd.s32 4294967295, %s9479_s28   ;;  %s9439_s7 = sphi %s9703_s7, %s11100_s7   ;;  %s9479_s28 = sphi %s9723_s28, %s85_s28   ;;  %s9475_s26 = sphi %s9721_s26, %s11099_s26   ;;  %s9471_s23 = sphi %s9719_s23, %s11098_s23   ;;  %s9467_s22 = sphi %s9717_s22, %s11097_s22   ;;  %s9463_s18 = sphi %s9715_s18, %s11096_s18   ;;  %s9459_s16 = sphi %s9713_s16, %s11095_s16   ;;  %s9455_s15 = sphi %s9711_s15, %s11094_s15   ;;  %s9451_s0 = sphi %s9709_s0, %s11103_s0   ;;  %s9447_s11 = sphi %s9707_s11, %s11102_s11   ;;  %s9443_s10 = sphi %s9705_s10, %s11101_s10  }
  0x50   : > { %11010 = sst [smem:[#allocation71_spill]] %s9455_s15  ;;  %p7847_p0 = scmp.ge.s32.totalorder %s9479_s28, 1 }
  0x51   : > { %11011 = sst [smem:[#allocation72_spill]] %s9459_s16  ;;  %p10957_p1 = scmp.eq.s32.totalorder %s9759_s1, 0 }
  0x52   : > { %11012 = sst [smem:[#allocation73_spill]] %s9463_s18  ;;  %p792_p2 = scmp.lt.s32.totalorder %s9479_s28, 5 }
  0x53   : > { %11013 = sst [smem:[#allocation74_spill]] %s9467_s22  ;;  %s9510_s14 = smov [#allocation9]  }
  0x54   : > { %11014 = sst [smem:[#allocation75_spill]] %s9471_s23  ;;  %p9764_p3 = pnand %p7847_p0, %p792_p2 }
  0x55   : > { %11015 = sst [smem:[#allocation76_spill]] %s9475_s26  ;;  %s807_s24 = sshll.u32 %s9510_s14, 4  ;;  %s808_s24 = int_to_ptr.vmem [resolvable:$true] %s807_s24 }
  0x56   : > { %s11016_s2 = scalar_select %p9764_p3, 1, 0 }
  0x57   : > { %p8549_p4 = pneg %p9764_p3  ;;  %s9511_s18 = smov [#allocation12]  }
  0x58   : > { %11017 = sst [smem:[#allocation77_spill]] %s11016_s2  ;;  %s833_s22 = sshll.u32 %s9511_s18, 4  ;;  %s834_s22 = int_to_ptr.vmem [resolvable:$true] %s833_s22 }
  0x59   : > { %p9772_p5 = pnand %p8549_p4, %p10957_p1  ;;  %s9512_s5 = smov [#allocation15]  }
  0x5a   : > { %s860_s17 = sshll.u32 %s9512_s5, 4  ;;  %s8890_s14 = scalar_lea.vmem %s808_s24, 512  ;;  %s861_s17 = int_to_ptr.vmem [resolvable:$true] %s860_s17 }
  0x5b   : > { %s11018_s21 = scalar_select %p9772_p5, 1, 0 }
  0x5c   : > { %p9778_p6 = pneg %p9772_p5  ;;  %p8891_p7 = scmp.ne.s32.totalorder %s808_s24, %s8890_s14 }
  0x5d   : > { %p8898_p10 = scmp.lt.s32.totalorder %s808_s24, %s808_s24  ;;  %p8899_p11 = scmp.lt.s32.totalorder %s8890_s14, %s8890_s14 }
  0x5e   : > { %s11019_s29 = scalar_select %p9778_p6, 1, 0 }
  0x5f   : > { %p8893_p8 = pnand %p8891_p7, %p9778_p6  ;;  %p8900_p12 = por %p8899_p11, %p8898_p10 }
  0x61   : > { %p8894_p9 = pneg %p8893_p8 }
  0x63   : > { %p8901_p13 = pnand %p8900_p12, %p8894_p9 }
  0x65   : > { %8904 = shalt.err (!%p8901_p13)
}
  0x66   : > { %s10953_s18 = smov 128   ;;  %s11020_s30 = sld [smem:[#allocation53_spill]] }
  0x67   : > { %s10955_s5 = smov 8   ;;  %s8916_s2 = scalar_lea.vmem %s834_s22, 512 }
  0x68   : > { %p8917_p0 = scmp.ne.s32.totalorder %s834_s22, %s8916_s2  ;;  %p8924_p7 = scmp.lt.s32.totalorder %s834_s22, %s834_s22 }
  0x69   : > { %p8925_p8 = scmp.lt.s32.totalorder %s8916_s2, %s8916_s2 }
  0x6a   : > { %p8919_p2 = pnand %p8917_p0, %p9778_p6 }
  0x6b   : > { %p8926_p10 = por %p8925_p8, %p8924_p7 }
  0x6c   : > { %8552 = dma.hbm_to_vmem [thread:$0]  (!%p9772_p5), %s11020_s30, 512, %s808_s24, [#allocation10], %s10953_s18, %s10953_s18, %s10955_s5  }
  0x6d   : > { %p8920_p4 = pneg %p8919_p2 }
  0x6f   : > { %p8927_p9 = pnand %p8926_p10, %p8920_p4 }
  0x71   : > { %8930 = shalt.err (!%p8927_p9)
}
  0x72   : > { %s11021_s12 = sld [smem:[#allocation55_spill]]  ;;  %s8942_s24 = scalar_lea.vmem %s861_s17, 16 }
  0x73   : > { %p8943_p11 = scmp.ne.s32.totalorder %s861_s17, %s8942_s24  ;;  %s8949_s14 = scalar_lea.vmem %s861_s17, 32 }
  0x74   : > { %p8950_p0 = scmp.lt.s32.totalorder %s861_s17, %s861_s17  ;;  %p8951_p2 = scmp.lt.s32.totalorder %s8949_s14, %s8942_s24 }
  0x75   : > { %p8945_p12 = pnand %p8943_p11, %p9778_p6 }
  0x76   : > { %p8952_p7 = por %p8951_p2, %p8950_p0 }
  0x77   : > { %p8946_p13 = pneg %p8945_p12 }
  0x78   : > { %8558 = dma.hbm_to_vmem [thread:$0]  (!%p9772_p5), %s11021_s12, 512, %s834_s22, [#allocation13], %s10953_s18, %s10953_s18, %s10955_s5  }
  0x79   : > { %p8953_p4 = pnand %p8952_p7, %p8946_p13 }
  0x7b   : > { %8956 = shalt.err (!%p8953_p4)
}
  0x7c   : > { %s11022_s27 = sld [smem:[#allocation57_spill]]  ;;  %s9515_s2 = smov [#allocation18]  }
  0x7d   : > { %s882_s30 = sshll.u32 %s9515_s2, 4  ;;  %s9516_s22 = smov [#allocation21]   ;;  %s883_s30 = int_to_ptr.vmem [resolvable:$true] %s882_s30 }
  0x7e   : > { %s904_s18 = sshll.u32 %s9516_s22, 4  ;;  %s8968_s5 = scalar_lea.vmem %s883_s30, 16  ;;  %s905_s18 = int_to_ptr.vmem [resolvable:$true] %s904_s18 }
  0x7f   : > { %p8969_p8 = scmp.ne.s32.totalorder %s883_s30, %s8968_s5  ;;  %s8975_s12 = scalar_lea.vmem %s883_s30, 32 }
  0x80   : > { %p8976_p11 = scmp.lt.s32.totalorder %s883_s30, %s883_s30  ;;  %p8977_p12 = scmp.lt.s32.totalorder %s8975_s12, %s8968_s5 }
  0x81   : > { %p8971_p10 = pnand %p8969_p8, %p9778_p6 }
  0x82   : > { %8564 = dma.hbm_to_vmem [thread:$0]  (!%p9772_p5), %s11022_s27, 16, %s861_s17, [#allocation16]  }
  0x83   : > { %p8972_p9 = pneg %p8971_p10  ;;  %p8978_p13 = por %p8977_p12, %p8976_p11 }
  0x85   : > { %p8979_p0 = pnand %p8978_p13, %p8972_p9 }
  0x87   : > { %8982 = shalt.err (!%p8979_p0)
}
  0x88   : > { %s11023_s9 = sld [smem:[#allocation59_spill]]  ;;  %s8994_s17 = scalar_lea.vmem %s905_s18, 16 }
  0x89   : > { %p8995_p2 = scmp.ne.s32.totalorder %s905_s18, %s8994_s17  ;;  %s9001_s24 = scalar_lea.vmem %s905_s18, 32 }
  0x8a   : > { %p9002_p8 = scmp.lt.s32.totalorder %s905_s18, %s905_s18  ;;  %p9003_p10 = scmp.lt.s32.totalorder %s9001_s24, %s8994_s17 }
  0x8b   : > { %p8997_p7 = pnand %p8995_p2, %p9778_p6 }
  0x8c   : > { %p9004_p1 = por %p9003_p10, %p9002_p8 }
  0x8d   : > { %p8998_p4 = pneg %p8997_p7 }
  0x8e   : > { %8570 = dma.hbm_to_vmem [thread:$0]  (!%p9772_p5), %s11023_s9, 16, %s883_s30, [#allocation19]  }
  0x8f   : > { %p9005_p3 = pnand %p9004_p1, %p8998_p4 }
  0x91   : > { %9008 = shalt.err (!%p9005_p3)
}
  0x92   : > { %s11024_s3 = sld [smem:[#allocation61_spill]]  ;;  %s9517_s12 = smov [#allocation24]  }
  0x93   : > { %s928_s5 = sshll.u32 %s9517_s12, 4  ;;  %s9518_s30 = smov [#allocation27]   ;;  %s929_s5 = int_to_ptr.vmem [resolvable:$true] %s928_s5 }
  0x94   : > { %s953_s14 = sshll.u32 %s9518_s30, 4  ;;  %s9020_s2 = scalar_lea.vmem %s929_s5, 16  ;;  %s954_s14 = int_to_ptr.vmem [resolvable:$true] %s953_s14 }
  0x95   : > { %p9021_p9 = scmp.ne.s32.totalorder %s929_s5, %s9020_s2  ;;  %s9027_s22 = scalar_lea.vmem %s929_s5, 32 }
  0x96   : > { %p9028_p13 = scmp.lt.s32.totalorder %s929_s5, %s929_s5  ;;  %p9029_p0 = scmp.lt.s32.totalorder %s9027_s22, %s9020_s2 }
  0x97   : > { %p9023_p11 = pnand %p9021_p9, %p9778_p6 }
  0x98   : > { %8576 = dma.hbm_to_vmem [thread:$0]  (!%p9772_p5), %s11024_s3, 16, %s905_s18, [#allocation22]  }
  0x99   : > { %p9024_p12 = pneg %p9023_p11  ;;  %p9030_p1 = por %p9029_p0, %p9028_p13 }
  0x9b   : > { %p9031_p3 = pnand %p9030_p1, %p9024_p12 }
  0x9d   : > { %9034 = shalt.err (!%p9031_p3)
}
  0x9e   : > { %s11025_s25 = sld [smem:[#allocation63_spill]]  ;;  %s9046_s18 = scalar_lea.vmem %s954_s14, 16 }
  0x9f   : > { %p9047_p2 = scmp.ne.s32.totalorder %s954_s14, %s9046_s18  ;;  %s9053_s17 = scalar_lea.vmem %s954_s14, 32 }
  0xa0   : > { %p9054_p8 = scmp.lt.s32.totalorder %s954_s14, %s954_s14  ;;  %p9055_p10 = scmp.lt.s32.totalorder %s9053_s17, %s9046_s18 }
  0xa1   : > { %p9049_p7 = pnand %p9047_p2, %p9778_p6 }
  0xa2   : > { %p9056_p9 = por %p9055_p10, %p9054_p8 }
  0xa3   : > { %p9050_p4 = pneg %p9049_p7 }
  0xa4   : > { %8582 = dma.hbm_to_vmem [thread:$0]  (!%p9772_p5), %s11025_s25, 16, %s929_s5, [#allocation25]  }
  0xa5   : > { %p9057_p11 = pnand %p9056_p9, %p9050_p4 }
  0xa7   : > { %9060 = shalt.err (!%p9057_p11)
}
  0xa8   : > { %s11026_s13 = sld [smem:[#allocation66_spill]]  ;;  %s7846_s24 = sadd.s32 4294967294, %s9479_s28  }
  0xa9   : > { %s94_s12 = sadd.s32 1, %s9471_s23  ;;  %s97_s5 = sadd.s32 1, %s9475_s26 }
  0xaa   : > { %p95_p12 = scmp.ge.s32.totalorder %s94_s12, 2  ;;  %s333_s30 = sadd.s32 1, %s9459_s16 }
  0xab   : > { %p340_p13 = scmp.ne.s32.totalorder %s9459_s16, %s9455_s15  ;;  %p341_p0 = scmp.eq.s32.totalorder %s9479_s28, 0 }
  0xac   : > { %s11105_s12 = smov (%p95_p12, %s94_s12), 0  ;;  %s11107_s5 = smov (!%p95_p12, %s97_s5), %s9475_s26 }
  0xad   : > { %11027 = sst [smem:[#allocation78_spill]] %s11105_s12  ;;  %p9835_p1 = por %p341_p0, %p340_p13 }
  0xae   : > { %8588 = dma.hbm_to_vmem [thread:$0]  (!%p9772_p5), %s11026_s13, 16, %s954_s14, [#allocation28]  }
  0xaf   : > { %s330_s14 = ssub.s32 %s9471_s23, %s11105_s12  ;;  %p99_p3 = scmp.ge.s32.totalorder %s11107_s5, 2 }
  0xb0   : > { %p331_p2 = scmp.eq.s32.totalorder %s330_s14, 0  ;;  %p346_p7 = scmp.ne.s32.totalorder %s9455_s15, %s9451_s0 }
  0xb1   : > { %s768_s22 = sadd.s32 1, %s9447_s11  ;;  %s11109_s5 = smov (%p99_p3, %s11107_s5), 0 }
  0xb2   : > { %11029 = sst [smem:[#allocation79_spill]] %s11109_s5  ;;  %p11031_p4 = scmp.eq.s32.totalorder %s9759_s1, 0 }
  0xb3   : > { %s9845_s18 = scalar_select %p331_p2, %s9459_s16, %s333_s30  }
  0xb4   : > { %p9849_p8 = por %p11031_p4, %p346_p7  ;;  %s765_s3 = ssub.s32 %s9475_s26, %s11109_s5 }
  0xb5   : > { %11030 = sst [smem:[#allocation80_spill]] %s9845_s18  ;;  %p766_p10 = scmp.eq.s32.totalorder %s765_s3, 0 }
  0xb6   : > { %s11032_s17 = scalar_select %p9849_p8, 1, 0 }
  0xb7   : > { %p778_p9 = scmp.ne.s32.totalorder %s9447_s11, %s9443_s10  ;;  %p779_p11 = scmp.eq.s32.totalorder %s9759_s1, 3 }
  0xb8   : > { %p784_p12 = scmp.ne.s32.totalorder %s9443_s10, %s9439_s7  ;;  %p785_p0 = scmp.eq.s32.totalorder %s7846_s24, 3 }
  0xb9   : > { %s9861_s0 = scalar_select %p766_p10, %s9447_s11, %s768_s22  }
  0xba   : > { %p9863_p13 = por %p779_p11, %p778_p9  ;;  %p8620_p3 = scmp.lt.s32.totalorder %s9479_s28, 4 }
  0xbb   : > { %s9869_s30 = sand.u32 1, %s9459_s16   ;;  %p9871_p2 = por %p785_p0, %p784_p12 }
  0xbc   : > { %s11033_s14 = scalar_select %p9863_p13, 1, 0 }
  0xbd   : > { %s11034_s9 = scalar_select %p9871_p2, 1, 0 }
  0xbe   : > { %s9876_s3 = sshll.u32 %s9471_s23, 4  ;;  %p9880_p7 = pnand %p8620_p3, %p9835_p1 }
  0xbf   : > { %s1061_s24 = sand.u32 1, %s9479_s28   ;;  %s9887_s13 = scalar_lea.hbm %s11009_s19, %s9876_s3 }
  0xc0   : > { %s11035_s22 = scalar_select %p9880_p7, 1, 0 }
  0xc1   : > { %s1064_s25 = scalar_lea.vmem [#allocation6], %s9869_s30  ;;  %s9519_s5 = smov [#allocation11]  }
  0xc2   : > { %s1071_s27 = sshll.u32 %s1064_s25, 4  ;;  %s820_s12 = sshll.u32 %s9519_s5, 4  ;;  %s9890_s27 = int_to_ptr.vmem [resolvable:$true] %s1071_s27  ;;  %s821_s12 = int_to_ptr.vmem [resolvable:$true] %s820_s12 }
  0xc3   : > { %s9892_s2 = scalar_lea.sflag [#allocation7], %s1061_s24  ;;  %s9061_s26 = scalar_lea.hbm %s9887_s13, 16 }
  0xc4   : > { %p9062_p1 = scmp.ne.s32.totalorder %s9887_s13, %s9061_s26  ;;  %p9898_p4 = pneg %p9880_p7 }
  0xc5   : > { %s9066_s18 = scalar_lea.hbm %s11009_s19, 32  ;;  %p9067_p11 = scmp.lt.s32.totalorder %s9887_s13, %s11009_s19 }
  0xc6   : > { %s11036_s23 = scalar_select %p9898_p4, 1, 0 }
  0xc7   : > { %p9064_p10 = pnand %p9898_p4, %p9062_p1  ;;  %p9068_p12 = scmp.lt.s32.totalorder %s9066_s18, %s9061_s26 }
  0xc9   : > { %p9065_p9 = pneg %p9064_p10  ;;  %p9069_p0 = por %p9068_p12, %p9067_p11 }
  0xcb   : > { %p9070_p3 = pnand %p9069_p0, %p9065_p9 }
  0xcd   : > { %9073 = shalt.err (!%p9070_p3)
}
  0xce   : > { %s9074_s25 = scalar_lea.vmem %s9890_s27, 16  ;;  %s9520_s5 = smov [#allocation6]  }
  0xcf   : > { %p9075_p2 = scmp.ne.s32.totalorder %s9890_s27, %s9074_s25  ;;  %s9079_s24 = sshll.u32 %s9520_s5, 4  ;;  %s9080_s24 = int_to_ptr.vmem [resolvable:$false] %s9079_s24 }
  0xd0   : > { %s9081_s16 = scalar_lea.vmem %s9080_s24, 32  ;;  %p9082_p1 = scmp.lt.s32.totalorder %s9890_s27, %s9080_s24 }
  0xd1   : > { %p9077_p13 = pnand %p9075_p2, %p9898_p4  ;;  %p9083_p10 = scmp.lt.s32.totalorder %s9081_s16, %s9074_s25 }
  0xd3   : > { %p9078_p8 = pneg %p9077_p13  ;;  %p9084_p5 = por %p9083_p10, %p9082_p1 }
  0xd5   : > { %p9085_p6 = pnand %p9084_p5, %p9078_p8 }
  0xd7   : > { %9088 = shalt.err (!%p9085_p6)
}
  0xd8   : > { %8598 = dma.hbm_to_vmem [thread:$0]  (!%p9880_p7), %s9887_s13, 16, %s9890_s27, %s9892_s2  }
  0xd9   : > { %s9100_s26 = scalar_lea.vmem %s821_s12, 512  ;;  %p11037_p13 = scmp.ne.s32.totalorder %s11019_s29, 0 }
  0xda   : > { %p9101_p2 = scmp.ne.s32.totalorder %s821_s12, %s9100_s26  ;;  %p9108_p12 = scmp.lt.s32.totalorder %s821_s12, %s821_s12 }
  0xdb   : > { %p9109_p0 = scmp.lt.s32.totalorder %s9100_s26, %s9100_s26 }
  0xdc   : > { %p9103_p9 = pnand %p9101_p2, %p11037_p13 }
  0xdd   : > { %p9110_p3 = por %p9109_p0, %p9108_p12 }
  0xde   : > { %p9104_p11 = pneg %p9103_p9 }
  0xe0   : > { %p9111_p4 = pnand %p9110_p3, %p9104_p11 }
  0xe2   : > { %9114 = shalt.err (!%p9111_p4)
}
  0xe3   : > { %p11038_p5 = scmp.ne.s32.totalorder %s11018_s21, 0  ;;  %s11039_s16 = smov 8  }
  0xe4   : > { %s11040_s18 = smov 128   ;;  %s11041_s6 = sld [smem:[#allocation54_spill]] }
  0xe5   : > { %s9521_s13 = smov [#allocation14]   ;;  %s9522_s25 = smov [#allocation17]  }
  0xe6   : > { %s846_s27 = sshll.u32 %s9521_s13, 4  ;;  %s871_s5 = sshll.u32 %s9522_s25, 4  ;;  %s847_s27 = int_to_ptr.vmem [resolvable:$true] %s846_s27  ;;  %s872_s5 = int_to_ptr.vmem [resolvable:$true] %s871_s5 }
  0xe7   : > { %s9126_s24 = scalar_lea.vmem %s847_s27, 512  ;;  %p9134_p10 = scmp.lt.s32.totalorder %s847_s27, %s847_s27 }
  0xe8   : > { %p9127_p6 = scmp.ne.s32.totalorder %s847_s27, %s9126_s24  ;;  %p9135_p4 = scmp.lt.s32.totalorder %s9126_s24, %s9126_s24 }
  0xea   : > { %8555 = dma.hbm_to_vmem [thread:$0]  (!%p11038_p5), %s11041_s6, 512, %s821_s12, [#allocation10], %s11040_s18, %s11040_s18, %s11039_s16  }
  0xeb   : > { %p9129_p8 = pnand %p9127_p6, %p11037_p13  ;;  %p9136_p2 = por %p9135_p4, %p9134_p10 }
  0xed   : > { %p9130_p1 = pneg %p9129_p8 }
  0xef   : > { %p9137_p9 = pnand %p9136_p2, %p9130_p1 }
  0xf1   : > { %9140 = shalt.err (!%p9137_p9)
}
  0xf2   : > { %s11042_s20 = sld [smem:[#allocation56_spill]]  ;;  %s9152_s12 = scalar_lea.vmem %s872_s5, 16 }
  0xf3   : > { %p9153_p11 = scmp.ne.s32.totalorder %s872_s5, %s9152_s12  ;;  %s9159_s26 = scalar_lea.vmem %s872_s5, 32 }
  0xf4   : > { %p9160_p3 = scmp.lt.s32.totalorder %s872_s5, %s872_s5  ;;  %p9161_p6 = scmp.lt.s32.totalorder %s9159_s26, %s9152_s12 }
  0xf5   : > { %p9155_p12 = pnand %p9153_p11, %p11037_p13 }
  0xf6   : > { %p9162_p8 = por %p9161_p6, %p9160_p3 }
  0xf7   : > { %p9156_p0 = pneg %p9155_p12 }
  0xf8   : > { %8561 = dma.hbm_to_vmem [thread:$0]  (!%p11038_p5), %s11042_s20, 512, %s847_s27, [#allocation13], %s11040_s18, %s11040_s18, %s11039_s16  }
  0xf9   : > { %p9163_p1 = pnand %p9162_p8, %p9156_p0 }
  0xfb   : > { %9166 = shalt.err (!%p9163_p1)
}
  0xfc   : > { %s11043_s4 = sld [smem:[#allocation58_spill]]  ;;  %s9523_s13 = smov [#allocation20]  }
  0xfd   : > { %s893_s25 = sshll.u32 %s9523_s13, 4  ;;  %s9524_s27 = smov [#allocation23]   ;;  %s894_s25 = int_to_ptr.vmem [resolvable:$true] %s893_s25 }
  0xfe   : > { %s914_s24 = sshll.u32 %s9524_s27, 4  ;;  %s9178_s6 = scalar_lea.vmem %s894_s25, 16  ;;  %s915_s24 = int_to_ptr.vmem [resolvable:$true] %s914_s24 }
  0xff   : > { %p9179_p10 = scmp.ne.s32.totalorder %s894_s25, %s9178_s6  ;;  %s9185_s19 = scalar_lea.vmem %s894_s25, 32 }
 0x100   : > { %p9186_p9 = scmp.lt.s32.totalorder %s894_s25, %s894_s25  ;;  %p9187_p11 = scmp.lt.s32.totalorder %s9185_s19, %s9178_s6 }
 0x101   : > { %p9181_p4 = pnand %p9179_p10, %p11037_p13 }
 0x102   : > { %8567 = dma.hbm_to_vmem [thread:$0]  (!%p11038_p5), %s11043_s4, 16, %s872_s5, [#allocation16]  }
 0x103   : > { %p9182_p2 = pneg %p9181_p4  ;;  %p9188_p12 = por %p9187_p11, %p9186_p9 }
 0x105   : > { %p9189_p0 = pnand %p9188_p12, %p9182_p2 }
 0x107   : > { %9192 = shalt.err (!%p9189_p0)
}
 0x108   : > { %s11044_s8 = sld [smem:[#allocation60_spill]]  ;;  %s9204_s5 = scalar_lea.vmem %s915_s24, 512 }
 0x109   : > { %p9205_p3 = scmp.ne.s32.totalorder %s915_s24, %s9204_s5  ;;  %p9212_p1 = scmp.lt.s32.totalorder %s915_s24, %s915_s24 }
 0x10a   : > { %p9213_p10 = scmp.lt.s32.totalorder %s9204_s5, %s9204_s5 }
 0x10b   : > { %p9207_p6 = pnand %p9205_p3, %p11037_p13 }
 0x10c   : > { %p9214_p4 = por %p9213_p10, %p9212_p1 }
 0x10d   : > { %p9208_p8 = pneg %p9207_p6 }
 0x10e   : > { %8573 = dma.hbm_to_vmem [thread:$0]  (!%p11038_p5), %s11044_s8, 16, %s894_s25, [#allocation19]  }
 0x10f   : > { %p9215_p7 = pnand %p9214_p4, %p9208_p8 }
 0x111   : > { %9218 = shalt.err (!%p9215_p7)
}
 0x112   : > { %s11045_s19 = sld [smem:[#allocation62_spill]]  ;;  %s9525_s6 = smov [#allocation26]  }
 0x113   : > { %s942_s12 = sshll.u32 %s9525_s6, 4  ;;  %s9526_s26 = smov [#allocation29]   ;;  %s943_s12 = int_to_ptr.vmem [resolvable:$true] %s942_s12 }
 0x114   : > { %s964_s13 = sshll.u32 %s9526_s26, 4  ;;  %s9230_s25 = scalar_lea.vmem %s943_s12, 16  ;;  %s965_s13 = int_to_ptr.vmem [resolvable:$true] %s964_s13 }
 0x115   : > { %p9231_p2 = scmp.ne.s32.totalorder %s943_s12, %s9230_s25  ;;  %s9237_s27 = scalar_lea.vmem %s943_s12, 32 }
 0x116   : > { %p9238_p7 = scmp.lt.s32.totalorder %s943_s12, %s943_s12  ;;  %p9239_p12 = scmp.lt.s32.totalorder %s9237_s27, %s9230_s25 }
 0x117   : > { %p9233_p9 = pnand %p9231_p2, %p11037_p13 }
 0x118   : > { %8579 = dma.hbm_to_vmem [thread:$0]  (!%p11038_p5), %s11045_s19, 512, %s915_s24, [#allocation22], %s11040_s18, %s11040_s18, %s11039_s16  }
 0x119   : > { %p9234_p11 = pneg %p9233_p9  ;;  %p9240_p0 = por %p9239_p12, %p9238_p7 }
 0x11b   : > { %p9241_p3 = pnand %p9240_p0, %p9234_p11 }
 0x11d   : > { %9244 = shalt.err (!%p9241_p3)
}
 0x11e   : > { %s11046_s5 = sld [smem:[#allocation65_spill]]  ;;  %s9256_s16 = scalar_lea.vmem %s965_s13, 16 }
 0x11f   : > { %p9257_p6 = scmp.ne.s32.totalorder %s965_s13, %s9256_s16  ;;  %s9263_s18 = scalar_lea.vmem %s965_s13, 32 }
 0x120   : > { %p9264_p10 = scmp.lt.s32.totalorder %s965_s13, %s965_s13  ;;  %p9265_p4 = scmp.lt.s32.totalorder %s9263_s18, %s9256_s16 }
 0x121   : > { %p9259_p8 = pnand %p9257_p6, %p11037_p13 }
 0x122   : > { %p9266_p2 = por %p9265_p4, %p9264_p10 }
 0x123   : > { %p9260_p1 = pneg %p9259_p8 }
 0x124   : > { %8585 = dma.hbm_to_vmem [thread:$0]  (!%p11038_p5), %s11046_s5, 16, %s943_s12, [#allocation25]  }
 0x125   : > { %p9267_p9 = pnand %p9266_p2, %p9260_p1 }
 0x127   : > { %9270 = shalt.err (!%p9267_p9)
}
 0x128   : > { %s11047_s24 = sld [smem:[#allocation67_spill]]  ;;  %s1047_s12 = scalar_lea.vmem [#allocation3], %s9869_s30 }
 0x129   : > { %s11048_s19 = sld [smem:[#allocation50_spill]]  ;;  %s1054_s26 = sshll.u32 %s1047_s12, 4  ;;  %s1055_s26 = int_to_ptr.vmem [resolvable:$true] %s1054_s26 }
 0x12a   : > { %s11049_s6 = sld [smem:[#allocation52_spill]]  ;;  %s1045_s25 = scalar_lea.sflag [#allocation4], %s9869_s30 }
 0x12b   : > { %p11050_p11 = scmp.ne.s32.totalorder %s11036_s23, 0 }
 0x12e   : > { %8591 = dma.hbm_to_vmem [thread:$0]  (!%p11038_p5), %s11047_s24, 16, %s965_s13, [#allocation28]  }
 0x12f   : > { %s9963_s29 = scalar_lea.hbm %s11048_s19, %s9876_s3  ;;  %s9276_s5 = scalar_lea.hbm %s11048_s19, 32 }
 0x130   : > { %s9968_s21 = scalar_lea.hbm %s11049_s6, %s9876_s3  ;;  %s9271_s27 = scalar_lea.hbm %s9963_s29, 16 }
 0x131   : > { %p9272_p13 = scmp.ne.s32.totalorder %s9963_s29, %s9271_s27  ;;  %p9277_p0 = scmp.lt.s32.totalorder %s9963_s29, %s11048_s19 }
 0x132   : > { %p9278_p3 = scmp.lt.s32.totalorder %s9276_s5, %s9271_s27 }
 0x133   : > { %p9274_p7 = pnand %p9272_p13, %p11050_p11 }
 0x134   : > { %p9279_p5 = por %p9278_p3, %p9277_p0 }
 0x135   : > { %p9275_p12 = pneg %p9274_p7 }
 0x137   : > { %p9280_p6 = pnand %p9279_p5, %p9275_p12 }
 0x139   : > { %9283 = shalt.err (!%p9280_p6)
}
 0x13a   : > { %s9284_s13 = scalar_lea.vmem %s1055_s26, 16  ;;  %s9527_s3 = smov [#allocation3]  }
 0x13b   : > { %p9285_p8 = scmp.ne.s32.totalorder %s1055_s26, %s9284_s13  ;;  %s9289_s16 = sshll.u32 %s9527_s3, 4  ;;  %s9290_s16 = int_to_ptr.vmem [resolvable:$false] %s9289_s16 }
 0x13c   : > { %s9291_s18 = scalar_lea.vmem %s9290_s16, 32  ;;  %p9292_p4 = scmp.lt.s32.totalorder %s1055_s26, %s9290_s16 }
 0x13d   : > { %p9287_p1 = pnand %p9285_p8, %p11050_p11  ;;  %p9293_p2 = scmp.lt.s32.totalorder %s9291_s18, %s9284_s13 }
 0x13f   : > { %p9288_p10 = pneg %p9287_p1  ;;  %p9294_p9 = por %p9293_p2, %p9292_p4 }
 0x141   : > { %p9295_p13 = pnand %p9294_p9, %p9288_p10 }
 0x143   : > { %9298 = shalt.err (!%p9295_p13)
}
 0x144   : > { %p11051_p7 = scmp.ne.s32.totalorder %s11035_s22, 0  ;;  %s1081_s24 = scalar_lea.vmem [#allocation8], %s9869_s30 }
 0x145   : > { %s1088_s12 = sshll.u32 %s1081_s24, 4  ;;  %s9299_s27 = scalar_lea.hbm %s9968_s21, 16  ;;  %s1089_s12 = int_to_ptr.vmem [resolvable:$true] %s1088_s12 }
 0x146   : > { %8595 = dma.hbm_to_vmem [thread:$0]  (!%p11051_p7), %s9963_s29, 16, %s1055_s26, %s1045_s25  }
 0x147   : > { %p9300_p12 = scmp.ne.s32.totalorder %s9968_s21, %s9299_s27  ;;  %s9304_s5 = scalar_lea.hbm %s11049_s6, 32 }
 0x148   : > { %p9305_p5 = scmp.lt.s32.totalorder %s9968_s21, %s11049_s6  ;;  %p9306_p6 = scmp.lt.s32.totalorder %s9304_s5, %s9299_s27 }
 0x149   : > { %p9302_p0 = pnand %p9300_p12, %p11050_p11 }
 0x14a   : > { %p9307_p8 = por %p9306_p6, %p9305_p5 }
 0x14b   : > { %p9303_p3 = pneg %p9302_p0 }
 0x14d   : > { %p9308_p1 = pnand %p9307_p8, %p9303_p3 }
 0x14f   : > { %9311 = shalt.err (!%p9308_p1)
}
 0x150   : > { %s9312_s13 = scalar_lea.vmem %s1089_s12, 16  ;;  %s9528_s30 = smov [#allocation8]  }
 0x151   : > { %p9313_p10 = scmp.ne.s32.totalorder %s1089_s12, %s9312_s13  ;;  %s9317_s29 = sshll.u32 %s9528_s30, 4  ;;  %s9318_s29 = int_to_ptr.vmem [resolvable:$false] %s9317_s29 }
 0x152   : > { %s9319_s26 = scalar_lea.vmem %s9318_s29, 32  ;;  %p9320_p9 = scmp.lt.s32.totalorder %s1089_s12, %s9318_s29 }
 0x153   : > { %p9315_p4 = pnand %p9313_p10, %p11050_p11  ;;  %p9321_p13 = scmp.lt.s32.totalorder %s9319_s26, %s9312_s13 }
 0x155   : > { %p9316_p2 = pneg %p9315_p4  ;;  %p9322_p12 = por %p9321_p13, %p9320_p9 }
 0x157   : > { %p9323_p0 = pnand %p9322_p12, %p9316_p2 }
 0x159   : > { %9326 = shalt.err (!%p9323_p0)
}
 0x15a   : > { %8601 = dma.hbm_to_vmem [thread:$0]  (!%p11051_p7), %s9968_s21, 16, %s1089_s12, %s9892_s2  }
 0x15b   : > { %s11052_s25 = sld [smem:[#allocation77_spill]] }
 0x161   : > { %p11053_p3 = scmp.ne.s32.totalorder %s11052_s25, 0 }
 0x162   : > { %s10000_s23 = sand.u32 (!%p11053_p3), 1, %s9455_s15   ;;  %p11054_p11 = scmp.ne.s32.totalorder (!%p11053_p3), %s11032_s17, 0 }
 0x163   : > { %1097 = sbr.rel (%p11053_p3) target bundleno = 6409 (0x1909), region = 136  ;;  %s1100_s3 = scalar_lea.sflag (!%p11053_p3), [#allocation4], %s10000_s23 }
 0x168   : > { %9398 = dma.done.wait (%p11054_p11), %s1100_s3, 16  }
 0x169   : > { %9400 = vsyncadd (%p11054_p11), %s1100_s3, 4294967280  ;;  %s1107_s22 = sand.u32 1, %s9759_s1  }
 0x16a   : > { %s1108_s2 = scalar_lea.sflag [#allocation7], %s1107_s22 }
 0x16b   : > { %9402 = dma.done.wait (%p11054_p11), %s1108_s2, 32  }
 0x16c   : > { %9404 = vsyncadd (%p11054_p11), %s1108_s2, 4294967264  ;;  %p11055_p7 = scmp.eq.s32.totalorder %s9759_s1, 0 }
 0x16e   : > { %9406 = dma.done.wait (%p11055_p7), [#allocation10], 1024   ;;  %p11056_p5 = pmov %p11055_p7 }
 0x170   : > { %9408 = vsyncadd (%p11056_p5), [#allocation10], 4294966272  ;;  %p11057_p6 = pmov %p11056_p5 }
 0x171   : > { %p11058_p8 = pmov %p11056_p5 }
 0x172   : > { %9410 = dma.done.wait (%p11057_p6), [#allocation13], 1024  }
 0x173   : > { %9412 = vsyncadd (%p11058_p8), [#allocation13], 4294966272  ;;  %p11059_p1 = pmov %p11056_p5 }
 0x175   : > { %9414 = dma.done.wait (%p11059_p1), [#allocation16], 32   ;;  %p11060_p10 = pmov %p11059_p1 }
 0x176   : > { %p11061_p4 = pmov %p11059_p1 }
 0x177   : > { %9416 = vsyncadd (%p11060_p10), [#allocation16], 4294967264 }
 0x178   : > { %9418 = dma.done.wait (%p11061_p4), [#allocation19], 32   ;;  %p11062_p2 = pmov %p11059_p1 }
 0x179   : > { %p11063_p9 = pmov %p11059_p1 }
 0x17a   : > { %9420 = vsyncadd (%p11062_p2), [#allocation19], 4294967264 }
 0x17b   : > { %9422 = dma.done.wait (%p11063_p9), [#allocation22], 528   ;;  %p11064_p13 = pmov %p11059_p1 }
 0x17c   : > { %p11065_p12 = pmov %p11059_p1 }
 0x17d   : > { %9424 = vsyncadd (%p11064_p13), [#allocation22], 4294966768 }
 0x17e   : > { %9426 = dma.done.wait (%p11065_p12), [#allocation25], 32   ;;  %p11066_p0 = pmov %p11059_p1 }
 0x180   : > { %9428 = vsyncadd (%p11066_p0), [#allocation25], 4294967264  ;;  %p11067_p3 = pmov %p11066_p0 }
 0x181   : > { %p11068_p11 = pmov %p11066_p0 }
 0x182   : > { %9430 = dma.done.wait (%p11067_p3), [#allocation28], 32  }
 0x183   : > { %9432 = vsyncadd (%p11068_p11), [#allocation28], 4294967264  ;;  %s11069_s17 = sld [smem:[#allocation74_spill]]  ;;  %s10977_s3 = sand.u32 1, %s9443_s10  }
 0x184   : > { %s11070_s24 = sld [smem:[#allocation73_spill]]  ;;  %s10047_s22 = sshll.u32 %s10977_s3, 3 }
 0x185   : > { %s11071_s12 = sld [smem:[#allocation41_spill]]  ;;  %s1294_s15 = scalar_lea.vmem [#allocation30], %s10047_s22 }
 0x186   : > { %s11072_s27 = sld [smem:[#allocation43_spill]] }
 0x187   : > { %s11073_s5 = sld [smem:[#allocation44_spill]] }
 0x188   : > { %s11074_s13 = sld [smem:[#allocation45_spill]] }
 0x189   : > { %s11075_s30 = sld [smem:[#allocation46_spill]]  ;;  %p1295_p7 = scmp.lt.s32.totalorder %s11069_s17, 1 }
 0x18a   : > { %s11076_s29 = sld [smem:[#allocation47_spill]]  ;;  %p1299_p5 = scmp.lt.s32.totalorder %s11070_s24, 1 }
 0x18b   : > { %s11077_s26 = sld [smem:[#allocation48_spill]]  ;;  %s11111_s17 = smov (!%p1295_p7, %s11069_s17), 1 }
 0x18c   : > { %s11078_s25 = sld [smem:[#allocation49_spill]]  ;;  %s7882_s2 = sshll.u32 %s11111_s17, 3 }
 0x18d   : > { %s1300_s1 = scalar_select %p1299_p5, %s11070_s24, 1 }
 0x18e   : > { %s10053_s18 = scalar_lea.vmem %s11071_s12, %s7882_s2  ;;  %p7897_p6 = scmp.ne.s32.totalorder %s11070_s24, 0 }
 0x18f   : > { %s8028_s21 = sshll.u32 %s1300_s1, 5  ;;  %s11079_s17 = sld [smem:[#allocation42_spill]] (!%p7897_p6) }
 0x190   : > { %s10056_s16 = scalar_lea.vmem %s11072_s27, %s8028_s21  ;;  %s1308_s4 = scalar_lea.vmem %s11073_s5, %s8028_s21 }
 0x191   : > { %s10060_s6 = scalar_lea.vmem %s11074_s13, %s8028_s21  ;;  %s10063_s8 = scalar_lea.vmem %s11075_s30, %s8028_s21 }
 0x192   : > { %s10066_s19 = scalar_lea.vmem %s11076_s29, %s8028_s21  ;;  %s10069_s20 = scalar_lea.vmem %s11077_s26, %s8028_s21 }
 0x193   : > { %s10072_s3 = scalar_lea.vmem %s11078_s25, %s8028_s21  ;;  %1337 = sbr.rel (%p7897_p6) target bundleno = 410 (0x19a), region = 208 }
 0x198   : > { %v1338_v0 = vld [vmem:[%s11079_s17] sm:$0xff]  ;;  %vm1340_vm0 = vcmask 261120   ;;  %v1339_v1 = vld [vmem:[%s11079_s17 + $0x8] sm:$0xff] }
 0x199   : > { %1341 = vst.msk [vmem:[#allocation2] sm:$0xff] %vm1340_vm0, %v1338_v0  ;;  %1342 = vst.msk [vmem:[#allocation2 + $0x8] sm:$0xff] %vm1340_vm0, %v1339_v1 }
 0x19a PF: > { %v1353_v2 = vld [vmem:[%s1308_s4 + $0x18] sm:$0xff]  ;;  %v1352_v3 = vld [vmem:[%s1308_s4 + $0x10] sm:$0xff]  ;;  %vm1358_vm1 = vcmask 261120   ;;  %v9529_v4 = vmov 0.0   ;;  %v1351_v7 = vld [vmem:[%s1308_s4 + $0x8] sm:$0xff]  ;;  %vm9530_vm2 = vmmov 0   ;;  %v1603_v24 = vlaneseq }
 0x19b   : > { %8198 = vmatprep.subr.mxu1 %v1353_v2  ;;  %8187 = vmatprep.subr.mxu0 %v9529_v4  ;;  %v1349_v5 = vld [vmem:[%s10056_s16 + $0x18] sm:$0xff]  ;;  %v1348_v8 = vld [vmem:[%s10056_s16 + $0x10] sm:$0xff]  ;;  %v1350_v9 = vld [vmem:[%s1308_s4] sm:$0xff]  ;;  %s9531_s4 = smov 104   ;;  %s9533_s21 = smov 112   ;;  %vm2318_vm3 = vcmask 64512  }
 0x19c   : > { %8199 = vmatpush3.msra.mxu1 %v1353_v2  ;;  %8188 = vmatpush3.msra.mxu0 %v1349_v5  ;;  %v1347_v10 = vld [vmem:[%s10056_s16 + $0x8] sm:$0xff]  ;;  %v1346_v12 = vld [vmem:[%s10056_s16] sm:$0xff]  ;;  %s9532_s16 = smov 120   ;;  %v1357_v15 = vld [vmem:[%s10060_s6 + $0x18] sm:$0xff]  ;;  %v9534_v22 = vmov 1983009808  }
 0x19d   : > { %8200 = vmatprep.subr.mxu1 %v1352_v3  ;;  %8189 = vmatprep.subr.mxu0 %v9529_v4  ;;  %v10093_v13 = vld [vmem:[%s10053_s18] sm:$0xff]  ;;  %v1356_v17 = vld [vmem:[%s10060_s6 + $0x10] sm:$0xff]  ;;  %v1355_v20 = vld [vmem:[%s10060_s6 + $0x8] sm:$0xff]  ;;  %v1601_v23 = vunpack.c.l.s4 %v9534_v22  ;;  %v9535_v25 = vmov 1934713408   ;;  %v1604_v28 = vshrl.u32 %v1603_v24, 7 }
 0x19e   : > { %8201 = vmatpush3.msra.mxu1 %v1352_v3  ;;  %8190 = vmatpush3.msra.mxu0 %v1348_v8  ;;  %v1354_v21 = vld [vmem:[%s10060_s6] sm:$0xff]  ;;  %v1633_v26 = vunpack.c.l.s4 %v9535_v25  ;;  %vm2639_vm4 = vcmask 130048   ;;  %vm3126_vm5 = vcmask 195584   ;;  %s11080_s6 = scalar_lea.vmem [#allocation3], %s10000_s23  ;;  %s11081_s18 = scalar_lea.vmem [#allocation6], %s10000_s23 }
 0x19f   : > { %8202 = vmatprep.subr.mxu1 %v1351_v7  ;;  %8191 = vmatprep.subr.mxu0 %v9529_v4  ;;  %v1602_v27 = vunpack.c.0.s8 %v1601_v23  ;;  %s11082_s24 = scalar_lea.vmem [#allocation8], %s10000_s23  ;;  %s11083_s12 = sld [smem:[#allocation73_spill]] }
 0x1a0   : > { %v10080_v6 = vld [vmem:[#allocation2] sm:$0xff]  ;;  %8203 = vmatpush3.msra.mxu1 %v1351_v7  ;;  %v10087_v11 = vld [vmem:[#allocation2 + $0x8] sm:$0xff]  ;;  %8192 = vmatpush3.msra.mxu0 %v1347_v10  ;;  %v1634_v31 = vunpack.c.0.s8 %v1633_v26 }
 0x1a1   : > { %8206 = vmatprep.mubr.msk.f32.mxu1 %vm1358_vm1, %v10080_v6  ;;  %8204 = vmatprep.subr.mxu1 %v1350_v9  ;;  %v10134_v32 = vsub.s32 %v1602_v27, %v1604_v28 }
 0x1a2   : > { %8205 = vmatpush3.msra.mxu1 %v1350_v9  ;;  %8193 = vmatprep.subr.mxu0 %v9529_v4  ;;  %v10136_v39 = vsub.s32 %v1634_v31, %v1604_v28 }
 0x1a3   : > { %8207 = vmatmul.mubr.msk.f32.vlgmr.msra.gmra.mxu1 %vm1358_vm1, %v10087_v11  ;;  %8194 = vmatpush3.msra.mxu0 %v1346_v12 }
 0x1a4   : > { %8195 = vmatprep.mubr.msk.f32.mxu0 %vm9530_vm2, %v9529_v4  ;;  %8220 = vmatprep.subr.mxu1 %v9529_v4 }
 0x1a5   : > { %8196 = vmatmul.mubr.msk.f32.vlgmr.msra.gmra.mxu0 %vm1358_vm1, %v10093_v13  ;;  %8224 = vmatprep.mubr.msk.f32.mxu1 %vm9530_vm2, %v9529_v4  ;;  %p7972_p8 = scmp.ne.s32.totalorder %s11083_s12, 1 }
 0x1a6   : > { %8217 = vmatprep.mubr.msk.f32.mxu0 %vm1358_vm1, %v10080_v6  ;;  %8209 = vmatprep.subr.mxu0 %v1357_v15  ;;  %s9541_s23 = smov (!%p7972_p8), 104   ;;  %s9542_s27 = smov (!%p7972_p8), 120  }
 0x1a7   : > { %8210 = vmatpush3.msra.mxu0 %v1357_v15  ;;  %s9543_s5 = smov (!%p7972_p8), 112   ;;  %s9544_s13 = smov (!%p7972_p8), 8  }
 0x1a8   : > { %8211 = vmatprep.subr.mxu0 %v1356_v17  ;;  %s9545_s30 = smov (!%p7972_p8), 16   ;;  %s9546_s29 = smov (!%p7972_p8), 24  }
 0x1a9   : > { %8212 = vmatpush3.msra.mxu0 %v1356_v17  ;;  %s11084_s26 = sld [smem:[#allocation64_spill]] (!%p7972_p8) }
 0x1aa   : > { %8213 = vmatprep.subr.mxu0 %v1355_v20  ;;  %s11087_s1 = sld [smem:[#allocation69_spill]] (!%p7972_p8) }
 0x1ab   : > { %8214 = vmatpush3.msra.mxu0 %v1355_v20 }
 0x1ac   : > { %8215 = vmatprep.subr.mxu0 %v1354_v21 }
 0x1ad   : > { %8216 = vmatpush3.msra.mxu0 %v1354_v21 }
 0x1ae   : > { %8227 = vmatprep.subr.mxu0 %v9529_v4  ;;  %8218 = vmatmul.mubr.msk.f32.vlgmr.msra.gmra.mxu0 %vm1358_vm1, %v10087_v11 }
 0x1af   : > { %8231 = vmatprep.mubr.msk.f32.mxu0 %vm9530_vm2, %v9529_v4  ;;  %s11085_s25 = smov (!%p7972_p8), %s11084_s26 }
 0x263   : > { %v8208_v14 = vpop.f32.mrf.mxu1 }
 0x264   : > { %1750 = vrot.lane.b32.xlu1 %v8208_v14, %s9531_s4  ;;  %1738 = vrot.lane.b32.xlu0 %v8208_v14, %s9532_s16 }
 0x265   : > { %v10109_v16 = vpop.f32.mrf.mxu0  ;;  %v10112_v18 = vpop.f32.mrf.mxu1 }
 0x267   : > { %v8197_v19 = vpop.f32.mrf.mxu0 }
 0x268   : > { %1744 = vrot.lane.b32.xlu0 %v8208_v14, %s9533_s21  ;;  %1736 = vrot.lane.b32.xlu1 %v10112_v18, %s9532_s16 }
 0x26c   : > { %1748 = vrot.lane.b32.xlu1 %v10112_v18, %s9531_s4  ;;  %1589 = vrot.lane.b32.xlu0 %v10109_v16, %s9532_s16 }
 0x270   : > { %1592 = vrot.lane.b32.xlu1 %v10109_v16, %s9533_s21  ;;  %1742 = vrot.lane.b32.xlu0 %v10112_v18, %s9533_s21 }
 0x274   : > { %1595 = vrot.lane.b32.xlu0 %v10109_v16, %s9531_s4 }
 0x2d6   : > { %v1751_v29 = vpop.permute.xlu1 %1750  ;;  %v1739_v30 = vpop.permute.xlu0 %1738 }
 0x2d7   : > { %v1838_v33 = vcombine.low %v1739_v30, %v1751_v29  ;;  %v1839_v34 = vcombine.high %v1739_v30, %v1751_v29 }
 0x2d9   : > { %v1846_v40 = vrot.slane %v1838_v33, %v10134_v32  ;;  %v1853_v41 = vrot.slane %v1839_v34, %v10134_v32 }
 0x2da   : > { %v1745_v35 = vpop.permute.xlu0 %1744  ;;  %v1737_v36 = vpop.permute.xlu1 %1736 }
 0x2db   : > { %v1822_v37 = vcombine.low %v8208_v14, %v1745_v35  ;;  %v1823_v38 = vcombine.high %v8208_v14, %v1745_v35 }
 0x2dd   : > { %v1830_v42 = vrot.slane %v1822_v37, %v10134_v32  ;;  %v1837_v43 = vrot.slane %v1823_v38, %v10134_v32 }
 0x2de   : > { %v1749_v44 = vpop.permute.xlu1 %1748  ;;  %v1590_v45 = vpop.permute.xlu0 %1589 }
 0x2df   : > { %v1854_v46 = vcombine.low %v1830_v42, %v1846_v40  ;;  %v1855_v47 = vcombine.high %v1830_v42, %v1846_v40  ;;  %v1870_v48 = vcombine.low %v1837_v43, %v1853_v41  ;;  %v1871_v49 = vcombine.high %v1837_v43, %v1853_v41 }
 0x2e0   : > { %v1770_v54 = vcombine.low %v1737_v36, %v1749_v44  ;;  %v1771_v55 = vcombine.high %v1737_v36, %v1749_v44 }
 0x2e1   : > { %v1862_v50 = vrot.slane %v1854_v46, %v10136_v39  ;;  %v1869_v51 = vrot.slane %v1855_v47, %v10136_v39  ;;  %v1878_v52 = vrot.slane %v1870_v48, %v10136_v39  ;;  %v1885_v53 = vrot.slane %v1871_v49, %v10136_v39 }
 0x2e2   : > { %v1593_v56 = vpop.permute.xlu1 %1592  ;;  %v1743_v57 = vpop.permute.xlu0 %1742  ;;  %v1778_v8 = vrot.slane %v1770_v54, %v10134_v32  ;;  %v1785_v9 = vrot.slane %v1771_v55, %v10134_v32 }
 0x2e3   : > { %v1958_v58 = vcombine.low %v1862_v50, %v1869_v51  ;;  %v7907_v59 = vcombine.high %v1862_v50, %v1869_v51  ;;  %v1974_v60 = vcombine.low %v1878_v52, %v1885_v53  ;;  %v7908_v61 = vcombine.high %v1878_v52, %v1885_v53 }
 0x2e4   : > { %v1598_v62 = vcombine.low %v10109_v16, %v1593_v56  ;;  %v1599_v63 = vcombine.high %v10109_v16, %v1593_v56  ;;  %v1754_v0 = vcombine.low %v10112_v18, %v1743_v57  ;;  %v1755_v1 = vcombine.high %v10112_v18, %v1743_v57 }
 0x2e5   : > { %v10151_v2 = vrot.slane %v1958_v58, %v10134_v32  ;;  %v10154_v3 = vrot.slane %v7907_v59, %v10134_v32  ;;  %v10157_v5 = vrot.slane %v1974_v60, %v10134_v32  ;;  %v10160_v7 = vrot.slane %v7908_v61, %v10134_v32 }
 0x2e6   : > { %v1762_v10 = vrot.slane %v1754_v0, %v10134_v32  ;;  %v1769_v12 = vrot.slane %v1755_v1, %v10134_v32  ;;  %v1596_v14 = vpop.permute.xlu0 %1595  ;;  %v1606_v17 = vrot.slane %v1598_v62, %v10134_v32  ;;  %v1613_v18 = vrot.slane %v1599_v63, %v10134_v32 }
 0x2e7   : > { %v1990_v15 = vcombine.low %v10151_v2, %v10154_v3  ;;  %v2006_v16 = vcombine.low %v10157_v5, %v10160_v7  ;;  %v1614_v23 = vcombine.low %v1590_v45, %v1596_v14  ;;  %v1615_v24 = vcombine.high %v1590_v45, %v1596_v14 }
 0x2e8   : > { %v1786_v19 = vcombine.low %v1762_v10, %v1778_v8  ;;  %v1787_v20 = vcombine.high %v1762_v10, %v1778_v8  ;;  %v1802_v21 = vcombine.low %v1769_v12, %v1785_v9  ;;  %v1803_v22 = vcombine.high %v1769_v12, %v1785_v9 }
 0x2e9   : > { %v1998_v25 = vrot.slane %v1990_v15, %v10136_v39  ;;  %v2014_v26 = vrot.slane %v2006_v16, %v10136_v39  ;;  %v1622_v31 = vrot.slane %v1614_v23, %v10134_v32  ;;  %v1629_v33 = vrot.slane %v1615_v24, %v10134_v32 }
 0x2ea   : > { %v1794_v27 = vrot.slane %v1786_v19, %v10136_v39  ;;  %v1801_v28 = vrot.slane %v1787_v20, %v10136_v39  ;;  %v1810_v29 = vrot.slane %v1802_v21, %v10136_v39  ;;  %v1817_v30 = vrot.slane %v1803_v22, %v10136_v39 }
 0x2eb   : > { %v2022_v34 = vcombine.low %v1998_v25, %v2014_v26  ;;  %v2023_v35 = vcombine.high %v1998_v25, %v2014_v26  ;;  %v1630_v41 = vcombine.low %v1606_v17, %v1622_v31  ;;  %v1631_v42 = vcombine.high %v1606_v17, %v1622_v31  ;;  %v10233_v31 = vpop.f32.mrf.mxu0 }
 0x2ec   : > { %v1890_v36 = vcombine.low %v1794_v27, %v1801_v28  ;;  %v7905_v37 = vcombine.high %v1794_v27, %v1801_v28  ;;  %v1906_v38 = vcombine.low %v1810_v29, %v1817_v30  ;;  %v7906_v40 = vcombine.high %v1810_v29, %v1817_v30 }
 0x2ed   : > { %v1646_v43 = vcombine.low %v1613_v18, %v1629_v33  ;;  %v1647_v44 = vcombine.high %v1613_v18, %v1629_v33  ;;  %8221 = vmatpush3.xpose.msk.msra.mxu1 %vm2318_vm3, %v2022_v34  ;;  %8228 = vmatpush3.xpose.msk.msra.mxu0 %vm2318_vm3, %v2023_v35  ;;  %v1638_v49 = vrot.slane %v1630_v41, %v10136_v39  ;;  %v10235_v33 = vpop.f32.mrf.mxu0 }
 0x2ee   : > { %v1897_v45 = vrot.slane %v1890_v36, %v10134_v32  ;;  %v1905_v46 = vrot.slane %v7905_v37, %v10134_v32  ;;  %v1913_v47 = vrot.slane %v1906_v38, %v10134_v32  ;;  %v1921_v48 = vrot.slane %v7906_v40, %v10134_v32  ;;  %8222 = vmatprep.subr.mxu1 %v9529_v4 }
 0x2ef   : > { %v1645_v50 = vrot.slane %v1631_v42, %v10136_v39  ;;  %v1654_v51 = vrot.slane %v1646_v43, %v10136_v39  ;;  %v1661_v52 = vrot.slane %v1647_v44, %v10136_v39  ;;  %8229 = vmatprep.subr.mxu0 %v9529_v4  ;;  %v1991_v59 = vcombine.high %v10151_v2, %v10154_v3 }
 0x2f0   : > { %v1922_v53 = vcombine.low %v1897_v45, %v1905_v46  ;;  %v1938_v54 = vcombine.low %v1913_v47, %v1921_v48  ;;  %v2007_v60 = vcombine.high %v10157_v5, %v10160_v7  ;;  %v1923_v12 = vcombine.high %v1897_v45, %v1905_v46 }
 0x2f1   : > { %v1666_v55 = vcombine.low %v1638_v49, %v1645_v50  ;;  %v7903_v56 = vcombine.high %v1638_v49, %v1645_v50  ;;  %v1682_v57 = vcombine.low %v1654_v51, %v1661_v52  ;;  %v7904_v58 = vcombine.high %v1654_v51, %v1661_v52 }
 0x2f2   : > { %v1930_v61 = vrot.slane %v1922_v53, %v10136_v39  ;;  %v1946_v62 = vrot.slane %v1938_v54, %v10136_v39  ;;  %v1939_v3 = vcombine.high %v1913_v47, %v1921_v48  ;;  %v2005_v5 = vrot.slane %v1991_v59, %v10136_v39 }
 0x2f3   : > { %v1673_v63 = vrot.slane %v1666_v55, %v10134_v32  ;;  %v1681_v0 = vrot.slane %v7903_v56, %v10134_v32  ;;  %v1689_v1 = vrot.slane %v1682_v57, %v10134_v32  ;;  %v1697_v8 = vrot.slane %v7904_v58, %v10134_v32 }
 0x2f4   : > { %v1954_v9 = vcombine.low %v1930_v61, %v1946_v62  ;;  %v1955_v10 = vcombine.high %v1930_v61, %v1946_v62  ;;  %v2021_v7 = vrot.slane %v2007_v60, %v10136_v39  ;;  %v1937_v23 = vrot.slane %v1923_v12, %v10136_v39 }
 0x2f5   : > { %v1698_v14 = vcombine.low %v1673_v63, %v1681_v0  ;;  %v1714_v2 = vcombine.low %v1689_v1, %v1697_v8  ;;  %v1699_v17 = vcombine.high %v1673_v63, %v1681_v0  ;;  %v1715_v18 = vcombine.high %v1689_v1, %v1697_v8 }
 0x2f6   : > { %8223 = vmatpush3.xpose.msk.msra.mxu1 %vm2318_vm3, %v1954_v9  ;;  %8230 = vmatpush3.xpose.msk.msra.mxu0 %vm2318_vm3, %v1955_v10  ;;  %v2024_v21 = vcombine.low %v2005_v5, %v2021_v7  ;;  %v2025_v22 = vcombine.high %v2005_v5, %v2021_v7  ;;  %v1953_v24 = vrot.slane %v1939_v3, %v10136_v39 }
 0x2f7   : > { %8234 = vmatprep.subr.mxu1 %v9529_v4  ;;  %8241 = vmatprep.subr.mxu0 %v9529_v4  ;;  %v1706_v15 = vrot.slane %v1698_v14, %v10136_v39  ;;  %v1722_v16 = vrot.slane %v1714_v2, %v10136_v39  ;;  %v1713_v25 = vrot.slane %v1699_v17, %v10136_v39 }
 0x2f8   : > { %v1729_v26 = vrot.slane %v1715_v18, %v10136_v39  ;;  %v1956_v27 = vcombine.low %v1937_v23, %v1953_v24  ;;  %v1957_v28 = vcombine.high %v1937_v23, %v1953_v24 }
 0x2f9   : > { %v1730_v19 = vcombine.low %v1706_v15, %v1722_v16  ;;  %v1731_v20 = vcombine.high %v1706_v15, %v1722_v16 }
 0x2fa   : > { %v1732_v29 = vcombine.low %v1713_v25, %v1729_v26  ;;  %v1733_v30 = vcombine.high %v1713_v25, %v1729_v26 }
 0x2fb   : > { %8225 = vmatmul.mubr.msk.f32.vlgmr.msra.gmra.mxu1 %vm2318_vm3, %v1730_v19  ;;  %8232 = vmatmul.mubr.msk.f32.vlgmr.msra.gmra.mxu0 %vm2318_vm3, %v1731_v20 }
 0x2fc   : > { %8235 = vmatpush3.xpose.msk.msra.mxu1 %vm2318_vm3, %v2024_v21  ;;  %8242 = vmatpush3.xpose.msk.msra.mxu0 %vm2318_vm3, %v2025_v22 }
 0x2fd   : > { %8236 = vmatprep.subr.mxu1 %v9529_v4  ;;  %8243 = vmatprep.subr.mxu0 %v9529_v4 }
 0x2fe   : > { %8238 = vmatprep.mubr.msk.f32.mxu1 %vm9530_vm2, %v9529_v4  ;;  %8245 = vmatprep.mubr.msk.f32.mxu0 %vm9530_vm2, %v9529_v4 }
 0x300   : > { %8237 = vmatpush3.xpose.msk.msra.mxu1 %vm2318_vm3, %v1956_v27  ;;  %8244 = vmatpush3.xpose.msk.msra.mxu0 %vm2318_vm3, %v1957_v28 }
 0x301   : > { %8248 = vmatprep.subr.mxu1 %v9529_v4 }
 0x303   : > { %8239 = vmatmul.mubr.msk.f32.vlgmr.msra.gmra.mxu1 %vm2318_vm3, %v1732_v29  ;;  %8246 = vmatmul.mubr.msk.f32.vlgmr.msra.gmra.mxu0 %vm2318_vm3, %v1733_v30 }
 0x304   : > { %8252 = vmatprep.mubr.msk.f32.mxu1 %vm9530_vm2, %v9529_v4  ;;  %8284 = vmatprep.mubr.msk.f32.mxu0 %vm1358_vm1, %v10080_v6 }
 0x3bb   : > { %v2394_v34 = vpop.f32.mrf.mxu1  ;;  %v2473_v35 = vpop.f32.mrf.mxu0 }
 0x3bc   : > { %v2635_v36 = vmul.f32 0.35355338, %v2394_v34  ;;  %v2636_v37 = vmul.f32 0.35355338, %v2473_v35 }
 0x3bd   : > { %v8226_v38 = vpop.f32.mrf.mxu1  ;;  %v8233_v40 = vpop.f32.mrf.mxu0 }
 0x3be   : > { %v2640_v41 = vsel %vm2639_vm4, %v2635_v36, -inf  ;;  %v2643_v42 = vsel %vm2639_vm4, %v2636_v37, -inf }
 0x3bf   : > { %2641 = vmax.xlane.f32.xlu1 %v2640_v41  ;;  %2644 = vmax.xlane.f32.xlu0 %v2643_v42 }
 0x3c3   : > { %v2552_v43 = vpop.f32.mrf.mxu1  ;;  %v2631_v44 = vpop.f32.mrf.mxu0 }
 0x3c4   : > { %v2637_v6 = vmul.f32 0.35355338, %v2552_v43  ;;  %v2638_v45 = vmul.f32 0.35355338, %v2631_v44 }
 0x3c5   : > { %v8240_v46 = vpop.f32.mrf.mxu1  ;;  %v8247_v47 = vpop.f32.mrf.mxu0 }
 0x3c6   : > { %v2646_v48 = vsel %vm2639_vm4, %v2637_v6, -inf  ;;  %v2649_v49 = vsel %vm2639_vm4, %v2638_v45, -inf }
 0x3c7   : > { %2647 = vmax.xlane.f32.xlu0 %v2646_v48  ;;  %2650 = vmax.xlane.f32.xlu1 %v2649_v49 }
 0x3d8   : > { %2036 = vrot.lane.b32.xlu1 %v10233_v31, %s9533_s21 }
 0x3dc   : > { %2042 = vrot.lane.b32.xlu1 %v10233_v31, %s9531_s4 }
 0x448   : > { %v2642_v50 = vpop.xlane.xlu1 %2641  ;;  %v2645_v51 = vpop.xlane.xlu0 %2644 }
 0x449   : > { %v2652_v52 = vsub.f32 %v2635_v36, %v2642_v50  ;;  %v2653_v53 = vsub.f32 %v2636_v37, %v2645_v51 }
 0x44b   : > { %v2656_v54 = vmul.f32 1.442695, %v2652_v52  ;;  %v2658_v55 = vmul.f32 1.442695, %v2653_v53 }
 0x44d   : > { %8787 = vpow2.f32 %v2656_v54 }
 0x44e   : > { %8789 = vpow2.f32 %v2658_v55 }
 0x450   : > { %v2648_v60 = vpop.xlane.xlu0 %2647  ;;  %v2651_v63 = vpop.xlane.xlu1 %2650 }
 0x451   : > { %v2654_v61 = vsub.f32 %v2637_v6, %v2648_v60  ;;  %v2655_v0 = vsub.f32 %v2638_v45, %v2651_v63 }
 0x453   : > { %v2660_v62 = vmul.f32 1.442695, %v2654_v61  ;;  %v2662_v1 = vmul.f32 1.442695, %v2655_v0 }
 0x454   : > { %v2037_v14 = vpop.permute.xlu1 %2036 }
 0x455   : > { %8791 = vpow2.f32 %v2660_v62  ;;  %v2114_v7 = vcombine.low %v10233_v31, %v2037_v14  ;;  %v2115_v15 = vcombine.high %v10233_v31, %v2037_v14 }
 0x456   : > { %8793 = vpow2.f32 %v2662_v1 }
 0x457   : > { %v2122_v20 = vrot.slane %v2114_v7, %v10134_v32  ;;  %v2129_v21 = vrot.slane %v2115_v15, %v10134_v32 }
 0x458   : > { %v2043_v2 = vpop.permute.xlu1 %2042 }
 0x45a   : > { %v10245_v56 = vpop.eup %8787 }
 0x45b   : > { %v10247_v57 = vpop.eup %8789  ;;  %v2664_v58 = vsel %vm2639_vm4, %v10245_v56, 0.0 }
 0x45c   : > { %2665 = vadd.xlane.f32.xlu0 %v2664_v58  ;;  %v2667_v59 = vsel %vm2639_vm4, %v10247_v57, 0.0 }
 0x45d   : > { %2668 = vadd.xlane.f32.xlu1 %v2667_v59 }
 0x462   : > { %v10261_v8 = vpop.eup %8791 }
 0x463   : > { %v2670_v9 = vsel %vm2639_vm4, %v10261_v8, 0.0  ;;  %v10265_v10 = vpop.eup %8793 }
 0x464   : > { %v2673_v12 = vsel %vm2639_vm4, %v10265_v10, 0.0 }
 0x46e   : > { %2028 = vrot.lane.b32.xlu1 %v10235_v33, %s9532_s16 }
 0x472   : > { %2034 = vrot.lane.b32.xlu1 %v10235_v33, %s9533_s21  ;;  %2030 = vrot.lane.b32.xlu0 %v10233_v31, %s9532_s16 }
 0x476   : > { %2040 = vrot.lane.b32.xlu1 %v10235_v33, %s9531_s4 }
 0x491   : > { %2671 = vadd.xlane.f32.xlu0 %v2670_v9 }
 0x49a   : > { %2674 = vadd.xlane.f32.xlu1 %v2673_v12 }
 0x4e5   : > { %v2666_v3 = vpop.xlane.xlu0 %2665 }
 0x4e6   : > { %v2669_v5 = vpop.xlane.xlu1 %2668  ;;  %8795 = vrcp.f32 %v2666_v3 }
 0x4e7   : > { %8797 = vrcp.f32 %v2669_v5 }
 0x4e9   : > { %v2031_v16 = vpop.permute.xlu0 %2030 }
 0x4ea   : > { %v2130_v17 = vcombine.low %v2031_v16, %v2043_v2  ;;  %v2131_v18 = vcombine.high %v2031_v16, %v2043_v2  ;;  %v2029_v19 = vpop.permute.xlu1 %2028 }
 0x4ec   : > { %v2138_v22 = vrot.slane %v2130_v17, %v10134_v32  ;;  %v2145_v23 = vrot.slane %v2131_v18, %v10134_v32 }
 0x4ee   : > { %v2146_v24 = vcombine.low %v2122_v20, %v2138_v22  ;;  %v2147_v25 = vcombine.high %v2122_v20, %v2138_v22  ;;  %v2162_v26 = vcombine.low %v2129_v21, %v2145_v23  ;;  %v2163_v27 = vcombine.high %v2129_v21, %v2145_v23  ;;  %v2035_v28 = vpop.permute.xlu1 %2034 }
 0x4ef   : > { %v2046_v35 = vcombine.low %v10235_v33, %v2035_v28  ;;  %v2047_v36 = vcombine.high %v10235_v33, %v2035_v28 }
 0x4f0   : > { %v2154_v29 = vrot.slane %v2146_v24, %v10136_v39  ;;  %v2161_v30 = vrot.slane %v2147_v25, %v10136_v39  ;;  %v2170_v31 = vrot.slane %v2162_v26, %v10136_v39  ;;  %v2177_v34 = vrot.slane %v2163_v27, %v10136_v39 }
 0x4f1   : > { %v2054_v48 = vrot.slane %v2046_v35, %v10134_v32  ;;  %v2061_v33 = vrot.slane %v2047_v36, %v10134_v32 }
 0x4f2   : > { %v2250_v37 = vcombine.low %v2154_v29, %v2161_v30  ;;  %v7911_v38 = vcombine.high %v2154_v29, %v2161_v30  ;;  %v2266_v40 = vcombine.low %v2170_v31, %v2177_v34  ;;  %v7912_v41 = vcombine.high %v2170_v31, %v2177_v34  ;;  %v2041_v42 = vpop.permute.xlu1 %2040 }
 0x4f3   : > { %v2062_v43 = vcombine.low %v2029_v19, %v2041_v42  ;;  %v2063_v44 = vcombine.high %v2029_v19, %v2041_v42  ;;  %v8796_v18 = vpop.eup %8795 }
 0x4f4   : > { %v2257_v6 = vrot.slane %v2250_v37, %v10134_v32  ;;  %v2265_v45 = vrot.slane %v7911_v38, %v10134_v32  ;;  %v2273_v46 = vrot.slane %v2266_v40, %v10134_v32  ;;  %v2281_v47 = vrot.slane %v7912_v41, %v10134_v32  ;;  %v8798_v27 = vpop.eup %8797 }
 0x4f5   : > { %v2070_v49 = vrot.slane %v2062_v43, %v10134_v32  ;;  %v2077_v50 = vrot.slane %v2063_v44, %v10134_v32  ;;  %v2680_v26 = vmul.f32 %v8796_v18, %v10245_v56  ;;  %v2681_v35 = vmul.f32 %v8798_v27, %v10247_v57  ;;  %v3137_v18 = vld [vmem:[%s10069_s20 + $0x8] sm:$0xff] }
 0x4f6   : > { %v2282_v51 = vcombine.low %v2257_v6, %v2265_v45  ;;  %v2298_v52 = vcombine.low %v2273_v46, %v2281_v47  ;;  %v2283_v21 = vcombine.high %v2257_v6, %v2265_v45  ;;  %v2299_v22 = vcombine.high %v2273_v46, %v2281_v47  ;;  %v3130_v45 = vld [vmem:[%s10063_s8 + $0x10] sm:$0xff]  ;;  %v3129_v46 = vld [vmem:[%s10063_s8 + $0x8] sm:$0xff]  ;;  %v3128_v47 = vld [vmem:[%s10063_s8] sm:$0xff] }
 0x4f7   : > { %v2078_v53 = vcombine.low %v2054_v48, %v2070_v49  ;;  %v2079_v54 = vcombine.high %v2054_v48, %v2070_v49  ;;  %v2094_v55 = vcombine.low %v2061_v33, %v2077_v50  ;;  %v2095_v58 = vcombine.high %v2061_v33, %v2077_v50  ;;  %v3139_v48 = vld [vmem:[%s10069_s20 + $0x18] sm:$0xff] }
 0x4f8   : > { %v2290_v59 = vrot.slane %v2282_v51, %v10136_v39  ;;  %v2306_v60 = vrot.slane %v2298_v52, %v10136_v39  ;;  %v2297_v29 = vrot.slane %v2283_v21, %v10136_v39  ;;  %v2313_v30 = vrot.slane %v2299_v22, %v10136_v39 }
 0x4f9   : > { %v2086_v61 = vrot.slane %v2078_v53, %v10136_v39  ;;  %v2093_v62 = vrot.slane %v2079_v54, %v10136_v39  ;;  %v2102_v63 = vrot.slane %v2094_v55, %v10136_v39  ;;  %v2109_v0 = vrot.slane %v2095_v58, %v10136_v39 }
 0x4fa   : > { %v2314_v1 = vcombine.low %v2290_v59, %v2306_v60  ;;  %v2315_v28 = vcombine.high %v2290_v59, %v2306_v60  ;;  %v2316_v36 = vcombine.low %v2297_v29, %v2313_v30  ;;  %v2317_v42 = vcombine.high %v2297_v29, %v2313_v30 }
 0x4fb   : > { %v2182_v9 = vcombine.low %v2086_v61, %v2093_v62  ;;  %v7909_v12 = vcombine.high %v2086_v61, %v2093_v62  ;;  %v2198_v14 = vcombine.low %v2102_v63, %v2109_v0  ;;  %v7910_v2 = vcombine.high %v2102_v63, %v2109_v0 }
 0x4fc   : > { %8249 = vmatpush3.msra.mxu1 %v2314_v1 }
 0x4fd   : > { %v2189_v3 = vrot.slane %v2182_v9, %v10134_v32  ;;  %v2197_v5 = vrot.slane %v7909_v12, %v10134_v32  ;;  %v2205_v7 = vrot.slane %v2198_v14, %v10134_v32  ;;  %v2213_v15 = vrot.slane %v7910_v2, %v10134_v32  ;;  %8250 = vmatprep.subr.mxu1 %v9529_v4  ;;  %v3134_v2 = vld [vmem:[%s10066_s19 + $0x10] sm:$0xff] }
 0x4ff   : > { %v2214_v16 = vcombine.low %v2189_v3, %v2197_v5  ;;  %v2230_v17 = vcombine.low %v2205_v7, %v2213_v15  ;;  %v2215_v24 = vcombine.high %v2189_v3, %v2197_v5  ;;  %v2231_v25 = vcombine.high %v2205_v7, %v2213_v15  ;;  %v3138_v3 = vld [vmem:[%s10069_s20 + $0x10] sm:$0xff] }
 0x501   : > { %v2222_v19 = vrot.slane %v2214_v16, %v10136_v39  ;;  %v2238_v20 = vrot.slane %v2230_v17, %v10136_v39  ;;  %v2229_v34 = vrot.slane %v2215_v24, %v10136_v39  ;;  %v2245_v56 = vrot.slane %v2231_v25, %v10136_v39  ;;  %v3133_v17 = vld [vmem:[%s10066_s19 + $0x8] sm:$0xff]  ;;  %v3136_v24 = vld [vmem:[%s10069_s20] sm:$0xff]  ;;  %s9537_s20 = smov 8  }
 0x503   : > { %v2246_v23 = vcombine.low %v2222_v19, %v2238_v20  ;;  %v2247_v31 = vcombine.high %v2222_v19, %v2238_v20  ;;  %v2248_v37 = vcombine.low %v2229_v34, %v2245_v56  ;;  %v2249_v43 = vcombine.high %v2229_v34, %v2245_v56 }
 0x505   : > { %8251 = vmatpush3.msra.mxu1 %v2246_v23  ;;  %v3132_v23 = vld [vmem:[%s10066_s19] sm:$0xff] }
 0x506   : > { %8253 = vmatmul.mubr.msk.f32.vlgmr.msra.gmra.mxu1 %vm2639_vm4, %v2680_v26  ;;  %8255 = vmatprep.subr.mxu1 %v9529_v4 }
 0x507   : > { %8256 = vmatpush3.msra.mxu1 %v2315_v28  ;;  %8259 = vmatprep.mubr.msk.f32.mxu1 %vm9530_vm2, %v9529_v4 }
 0x508   : > { %8257 = vmatprep.subr.mxu1 %v9529_v4 }
 0x509   : > { %8258 = vmatpush3.msra.mxu1 %v2247_v31 }
 0x50a   : > { %8260 = vmatmul.mubr.msk.f32.vlgmr.msra.gmra.mxu1 %vm2639_vm4, %v2681_v35  ;;  %8262 = vmatprep.subr.mxu1 %v9529_v4 }
 0x50b   : > { %8263 = vmatpush3.msra.mxu1 %v2316_v36  ;;  %8266 = vmatprep.mubr.msk.f32.mxu1 %vm9530_vm2, %v9529_v4 }
 0x50c   : > { %8264 = vmatprep.subr.mxu1 %v9529_v4 }
 0x50d   : > { %8265 = vmatpush3.msra.mxu1 %v2248_v37 }
 0x50e   : > { %8269 = vmatprep.subr.mxu1 %v9529_v4 }
 0x51a   : > { %v2672_v38 = vpop.xlane.xlu0 %2671 }
 0x51b   : > { %8799 = vrcp.f32 %v2672_v38 }
 0x523   : > { %v2675_v40 = vpop.xlane.xlu1 %2674 }
 0x524   : > { %8801 = vrcp.f32 %v2675_v40 }
 0x528   : > { %v8800_v57 = vpop.eup %8799 }
 0x529   : > { %v2682_v41 = vmul.f32 %v8800_v57, %v10261_v8  ;;  %v3131_v8 = vld [vmem:[%s10063_s8 + $0x18] sm:$0xff]  ;;  %s9536_s8 = smov 16  }
 0x52a   : > { %8276 = vmatprep.subr.mxu0 %v3131_v8 }
 0x52b   : > { %8267 = vmatmul.mubr.msk.f32.vlgmr.msra.gmra.mxu1 %vm2639_vm4, %v2682_v41  ;;  %8277 = vmatpush3.msra.mxu0 %v3131_v8 }
 0x52c   : > { %8270 = vmatpush3.msra.mxu1 %v2317_v42  ;;  %8273 = vmatprep.mubr.msk.f32.mxu1 %vm9530_vm2, %v9529_v4 }
 0x52d   : > { %8271 = vmatprep.subr.mxu1 %v9529_v4  ;;  %8278 = vmatprep.subr.mxu0 %v3130_v45 }
 0x52e   : > { %8272 = vmatpush3.msra.mxu1 %v2249_v43  ;;  %8279 = vmatpush3.msra.mxu0 %v3130_v45 }
 0x52f   : > { %8287 = vmatprep.subr.mxu1 %v9529_v4  ;;  %8280 = vmatprep.subr.mxu0 %v3129_v46 }
 0x530   : > { %8281 = vmatpush3.msra.mxu0 %v3129_v46 }
 0x531   : > { %v8802_v44 = vpop.eup %8801  ;;  %8282 = vmatprep.subr.mxu0 %v3128_v47 }
 0x532   : > { %v2683_v6 = vmul.f32 %v8802_v44, %v10265_v10  ;;  %8283 = vmatpush3.msra.mxu0 %v3128_v47  ;;  %v3135_v10 = vld [vmem:[%s10066_s19 + $0x18] sm:$0xff]  ;;  %s9538_s19 = smov 24  }
 0x533   : > { %8285 = vmatmul.mubr.msk.f32.vlgmr.msra.gmra.mxu0 %vm1358_vm1, %v10087_v11  ;;  %8298 = vmatprep.subr.mxu0 %v9529_v4 }
 0x534   : > { %8274 = vmatmul.mubr.msk.f32.vlgmr.msra.gmra.mxu1 %vm2639_vm4, %v2683_v6  ;;  %8306 = vmatprep.mubr.msk.f32.mxu0 %vm9530_vm2, %v9529_v4 }
 0x535   : > { %8295 = vmatprep.mubr.msk.f32.mxu1 %vm9530_vm2, %v9529_v4  ;;  %8288 = vmatpush3.msra.mxu1 %v3135_v10 }
 0x536   : > { %8299 = vmatpush3.msra.mxu0 %v3139_v48  ;;  %8289 = vmatprep.subr.mxu1 %v9529_v4 }
 0x537   : > { %8300 = vmatprep.subr.mxu0 %v9529_v4  ;;  %8290 = vmatpush3.msra.mxu1 %v3134_v2 }
 0x538   : > { %8301 = vmatpush3.msra.mxu0 %v3138_v3  ;;  %8291 = vmatprep.subr.mxu1 %v9529_v4 }
 0x539   : > { %8302 = vmatprep.subr.mxu0 %v9529_v4  ;;  %8292 = vmatpush3.msra.mxu1 %v3133_v17 }
 0x53a   : > { %8303 = vmatpush3.msra.mxu0 %v3137_v18  ;;  %8293 = vmatprep.subr.mxu1 %v9529_v4 }
 0x53b   : > { %8304 = vmatprep.subr.mxu0 %v9529_v4  ;;  %8294 = vmatpush3.msra.mxu1 %v3132_v23 }
 0x53c   : > { %8305 = vmatpush3.msra.mxu0 %v3136_v24 }
 0x5c6   : > { %v2753_v33 = vpop.f32.mrf.mxu1 }
 0x5c8   : > { %v8254_v49 = vpop.f32.mrf.mxu1 }
 0x5ca   : > { %v2826_v50 = vpop.f32.mrf.mxu1 }
 0x5cc   : > { %v8261_v51 = vpop.f32.mrf.mxu1 }
 0x5eb   : > { %v2899_v52 = vpop.f32.mrf.mxu1 }
 0x5ec   : > { %v2976_v53 = vcombine.low %v2753_v33, %v2899_v52  ;;  %v2977_v54 = vcombine.high %v2753_v33, %v2899_v52 }
 0x5ed   : > { %v8268_v11 = vpop.f32.mrf.mxu1 }
 0x5ee   : > { %v2984_v61 = vrot.slane %v2976_v53, %v10134_v32  ;;  %v2991_v62 = vrot.slane %v2977_v54, %v10134_v32 }
 0x5f3   : > { %v10371_v41 = vpop.f32.mrf.mxu0 }
 0x5f4   : > { %v2972_v55 = vpop.f32.mrf.mxu1 }
 0x5f5   : > { %v2992_v58 = vcombine.low %v2826_v50, %v2972_v55  ;;  %v2993_v59 = vcombine.high %v2826_v50, %v2972_v55  ;;  %v3206_v42 = vpop.f32.mrf.mxu0 }
 0x5f6   : > { %v8275_v60 = vpop.f32.mrf.mxu1 }
 0x5f7   : > { %v3000_v63 = vrot.slane %v2992_v58, %v10134_v32  ;;  %v3007_v0 = vrot.slane %v2993_v59, %v10134_v32 }
 0x5f9   : > { %v3008_v1 = vcombine.low %v2984_v61, %v3000_v63  ;;  %v3009_v9 = vcombine.high %v2984_v61, %v3000_v63  ;;  %v3024_v12 = vcombine.low %v2991_v62, %v3007_v0  ;;  %v3025_v14 = vcombine.high %v2991_v62, %v3007_v0 }
 0x5fb   : > { %v3016_v5 = vrot.slane %v3008_v1, %v10136_v39  ;;  %v3023_v7 = vrot.slane %v3009_v9, %v10136_v39  ;;  %v3032_v15 = vrot.slane %v3024_v12, %v10136_v39  ;;  %v3039_v16 = vrot.slane %v3025_v14, %v10136_v39 }
 0x5fd   : > { %v3044_v19 = vcombine.low %v3016_v5, %v3023_v7  ;;  %v7929_v20 = vcombine.high %v3016_v5, %v3023_v7  ;;  %v3060_v21 = vcombine.low %v3032_v15, %v3039_v16  ;;  %v7930_v22 = vcombine.high %v3032_v15, %v3039_v16 }
 0x5ff   : > { %v3051_v25 = vrot.slane %v3044_v19, %v10134_v32  ;;  %v3059_v26 = vrot.slane %v7929_v20, %v10134_v32  ;;  %v3067_v27 = vrot.slane %v3060_v21, %v10134_v32  ;;  %v3075_v28 = vrot.slane %v7930_v22, %v10134_v32 }
 0x601   : > { %v3077_v29 = vcombine.high %v3051_v25, %v3059_v26  ;;  %v3093_v30 = vcombine.high %v3067_v27, %v3075_v28  ;;  %v3076_v31 = vcombine.low %v3051_v25, %v3059_v26  ;;  %v3092_v34 = vcombine.low %v3067_v27, %v3075_v28 }
 0x603   : > { %v3091_v56 = vrot.slane %v3077_v29, %v10136_v39  ;;  %v3107_v35 = vrot.slane %v3093_v30, %v10136_v39  ;;  %v3084_v36 = vrot.slane %v3076_v31, %v10136_v39  ;;  %v3100_v37 = vrot.slane %v3092_v34, %v10136_v39 }
 0x605   : > { %v3110_v38 = vcombine.low %v3091_v56, %v3107_v35  ;;  %v3109_v40 = vcombine.high %v3084_v36, %v3100_v37  ;;  %v3108_v57 = vcombine.low %v3084_v36, %v3100_v37  ;;  %v3111_v4 = vcombine.high %v3091_v56, %v3107_v35 }
 0x607   : > { %3117 = vrot.lane.b32.xlu1 %v3110_v38, %s9536_s8  ;;  %3113 = vrot.lane.b32.xlu0 %v3109_v40, %s9537_s20 }
 0x60b   : > { %3121 = vrot.lane.b32.xlu0 %v3111_v4, %s9538_s19  ;;  %3360 = vrot.lane.b32.xlu1 %v3206_v42, %s9532_s16 }
 0x60f   : > { %3366 = vrot.lane.b32.xlu0 %v3206_v42, %s9533_s21  ;;  %3372 = vrot.lane.b32.xlu1 %v3206_v42, %s9531_s4 }
 0x613   : > { %3362 = vrot.lane.b32.xlu0 %v10371_v41, %s9532_s16  ;;  %3368 = vrot.lane.b32.xlu1 %v10371_v41, %s9533_s21 }
 0x679   : > { %v3114_v43 = vpop.permute.xlu0 %3113  ;;  %v3118_v44 = vpop.permute.xlu1 %3117 }
 0x67a   : > { %v3124_v6 = vsel %vm2318_vm3, %v3108_v57, %v3114_v43 }
 0x67b   : > { %v3125_v45 = vsel %vm2639_vm4, %v3124_v6, %v3118_v44 }
 0x67d   : > { %v3122_v8 = vpop.permute.xlu0 %3121  ;;  %v3361_v47 = vpop.permute.xlu1 %3360 }
 0x67e   : > { %v3127_v46 = vsel %vm3126_vm5, %v3125_v45, %v3122_v8 }
 0x67f   : > { %8296 = vmatmul.mubr.msk.f32.vlgmr.msra.gmra.mxu1 %vm1358_vm1, %v3127_v46  ;;  %8307 = vmatmul.mubr.msk.f32.vlgmr.msra.gmra.mxu0 %vm1358_vm1, %v3127_v46 }
 0x681   : > { %v3367_v10 = vpop.permute.xlu0 %3366  ;;  %v3373_v49 = vpop.permute.xlu1 %3372 }
 0x682   : > { %v3378_v48 = vcombine.low %v3206_v42, %v3367_v10  ;;  %v3379_v33 = vcombine.high %v3206_v42, %v3367_v10  ;;  %v3394_v50 = vcombine.low %v3361_v47, %v3373_v49  ;;  %v3395_v51 = vcombine.high %v3361_v47, %v3373_v49 }
 0x684   : > { %v3386_v52 = vrot.slane %v3378_v48, %v10134_v32  ;;  %v3393_v11 = vrot.slane %v3379_v33, %v10134_v32  ;;  %v3402_v53 = vrot.slane %v3394_v50, %v10134_v32  ;;  %v3409_v54 = vrot.slane %v3395_v51, %v10134_v32 }
 0x685   : > { %v3363_v31 = vpop.permute.xlu0 %3362  ;;  %v3369_v38 = vpop.permute.xlu1 %3368 }
 0x686   : > { %v3410_v55 = vcombine.low %v3386_v52, %v3402_v53  ;;  %v3411_v58 = vcombine.high %v3386_v52, %v3402_v53  ;;  %v3426_v59 = vcombine.low %v3393_v11, %v3409_v54  ;;  %v3427_v60 = vcombine.high %v3393_v11, %v3409_v54 }
 0x687   : > { %v3446_v6 = vcombine.low %v10371_v41, %v3369_v38  ;;  %v3447_v8 = vcombine.high %v10371_v41, %v3369_v38 }
 0x688   : > { %v3418_v61 = vrot.slane %v3410_v55, %v10136_v39  ;;  %v3425_v62 = vrot.slane %v3411_v58, %v10136_v39  ;;  %v3434_v63 = vrot.slane %v3426_v59, %v10136_v39  ;;  %v3441_v0 = vrot.slane %v3427_v60, %v10136_v39 }
 0x689   : > { %v3454_v53 = vrot.slane %v3446_v6, %v10134_v32  ;;  %v3461_v54 = vrot.slane %v3447_v8, %v10134_v32 }
 0x68a   : > { %v3514_v1 = vcombine.low %v3418_v61, %v3425_v62  ;;  %v7935_v9 = vcombine.high %v3418_v61, %v3425_v62  ;;  %v3530_v12 = vcombine.low %v3434_v63, %v3441_v0  ;;  %v7936_v14 = vcombine.high %v3434_v63, %v3441_v0 }
 0x68c   : > { %v3521_v2 = vrot.slane %v3514_v1, %v10134_v32  ;;  %v3529_v3 = vrot.slane %v7935_v9, %v10134_v32  ;;  %v3537_v5 = vrot.slane %v3530_v12, %v10134_v32  ;;  %v3545_v7 = vrot.slane %v7936_v14, %v10134_v32 }
 0x68e   : > { %v3546_v15 = vcombine.low %v3521_v2, %v3529_v3  ;;  %v3562_v16 = vcombine.low %v3537_v5, %v3545_v7  ;;  %v3547_v17 = vcombine.high %v3521_v2, %v3529_v3  ;;  %v3563_v18 = vcombine.high %v3537_v5, %v3545_v7 }
 0x690   : > { %v10398_v19 = vrot.slane %v3546_v15, %v10136_v39  ;;  %v10401_v20 = vrot.slane %v3562_v16, %v10136_v39  ;;  %v10404_v21 = vrot.slane %v3547_v17, %v10136_v39  ;;  %v10407_v22 = vrot.slane %v3563_v18, %v10136_v39 }
 0x692   : > { %v3578_v23 = vcombine.low %v10398_v19, %v10401_v20  ;;  %v3580_v24 = vcombine.low %v10404_v21, %v10407_v22  ;;  %v3579_v25 = vcombine.high %v10398_v19, %v10401_v20  ;;  %v3581_v26 = vcombine.high %v10404_v21, %v10407_v22 }
 0x694   : > { %8311 = vmatprep.mubr.msk.f32.mxu1 %vm2318_vm3, %v3578_v23  ;;  %8321 = vmatprep.mubr.msk.f32.mxu0 %vm2318_vm3, %v3580_v24 }
 0x73f   : > { %v3284_v27 = vpop.f32.mrf.mxu1  ;;  %v10419_v28 = vpop.f32.mrf.mxu0 }
 0x740   : > { %3651 = vrot.lane.b32.xlu0 %v3284_v27, %s9532_s16 }
 0x741   : > { %v8297_v29 = vpop.f32.mrf.mxu1  ;;  %v8308_v30 = vpop.f32.mrf.mxu0 }
 0x744   : > { %3654 = vrot.lane.b32.xlu0 %v3284_v27, %s9533_s21 }
 0x748   : > { %3657 = vrot.lane.b32.xlu0 %v3284_v27, %s9531_s4 }
 0x74c   : > { %3374 = vrot.lane.b32.xlu0 %v10371_v41, %s9531_s4 }
 0x7b2   : > { %v3652_v34 = vpop.permute.xlu0 %3651 }
 0x7b6   : > { %v3655_v56 = vpop.permute.xlu0 %3654 }
 0x7b7   : > { %v3660_v35 = vcombine.low %v3284_v27, %v3655_v56  ;;  %v3661_v36 = vcombine.high %v3284_v27, %v3655_v56 }
 0x7b9   : > { %v3668_v4 = vrot.slane %v3660_v35, %v10134_v32  ;;  %v3675_v42 = vrot.slane %v3661_v36, %v10134_v32 }
 0x7ba   : > { %v3658_v37 = vpop.permute.xlu0 %3657 }
 0x7bb   : > { %v3676_v40 = vcombine.low %v3652_v34, %v3658_v37  ;;  %v3677_v57 = vcombine.high %v3652_v34, %v3658_v37 }
 0x7bd   : > { %v3684_v43 = vrot.slane %v3676_v40, %v10134_v32  ;;  %v3691_v44 = vrot.slane %v3677_v57, %v10134_v32 }
 0x7be   : > { %v3375_v45 = vpop.permute.xlu0 %3374 }
 0x7bf   : > { %v3692_v46 = vcombine.low %v3668_v4, %v3684_v43  ;;  %v3693_v47 = vcombine.high %v3668_v4, %v3684_v43  ;;  %v3708_v10 = vcombine.low %v3675_v42, %v3691_v44  ;;  %v3709_v48 = vcombine.high %v3675_v42, %v3691_v44 }
 0x7c0   : > { %v3462_v33 = vcombine.low %v3363_v31, %v3375_v45  ;;  %v3463_v49 = vcombine.high %v3363_v31, %v3375_v45 }
 0x7c1   : > { %v3700_v50 = vrot.slane %v3692_v46, %v10136_v39  ;;  %v3707_v51 = vrot.slane %v3693_v47, %v10136_v39  ;;  %v3716_v52 = vrot.slane %v3708_v10, %v10136_v39  ;;  %v3723_v11 = vrot.slane %v3709_v48, %v10136_v39 }
 0x7c2   : > { %v3470_v41 = vrot.slane %v3462_v33, %v10134_v32  ;;  %v3477_v55 = vrot.slane %v3463_v49, %v10134_v32 }
 0x7c3   : > { %v3728_v58 = vcombine.low %v3700_v50, %v3707_v51  ;;  %v7939_v59 = vcombine.high %v3700_v50, %v3707_v51  ;;  %v3744_v60 = vcombine.low %v3716_v52, %v3723_v11  ;;  %v7940_v61 = vcombine.high %v3716_v52, %v3723_v11 }
 0x7c4   : > { %v3478_v62 = vcombine.low %v3454_v53, %v3470_v41  ;;  %v3479_v63 = vcombine.high %v3454_v53, %v3470_v41  ;;  %v3494_v0 = vcombine.low %v3461_v54, %v3477_v55  ;;  %v3495_v1 = vcombine.high %v3461_v54, %v3477_v55 }
 0x7c5   : > { %v3735_v9 = vrot.slane %v3728_v58, %v10134_v32  ;;  %v3743_v12 = vrot.slane %v7939_v59, %v10134_v32  ;;  %v3751_v14 = vrot.slane %v3744_v60, %v10134_v32  ;;  %v3759_v2 = vrot.slane %v7940_v61, %v10134_v32 }
 0x7c6   : > { %v3486_v3 = vrot.slane %v3478_v62, %v10136_v39  ;;  %v3493_v5 = vrot.slane %v3479_v63, %v10136_v39  ;;  %v3502_v7 = vrot.slane %v3494_v0, %v10136_v39  ;;  %v3509_v15 = vrot.slane %v3495_v1, %v10136_v39 }
 0x7c7   : > { %v3760_v16 = vcombine.low %v3735_v9, %v3743_v12  ;;  %v3776_v17 = vcombine.low %v3751_v14, %v3759_v2  ;;  %v3761_v18 = vcombine.high %v3735_v9, %v3743_v12  ;;  %v3777_v23 = vcombine.high %v3751_v14, %v3759_v2 }
 0x7c8   : > { %v3582_v24 = vcombine.low %v3486_v3, %v3493_v5  ;;  %v7937_v27 = vcombine.high %v3486_v3, %v3493_v5  ;;  %v3598_v29 = vcombine.low %v3502_v7, %v3509_v15  ;;  %v7938_v30 = vcombine.high %v3502_v7, %v3509_v15 }
 0x7c9   : > { %v3768_v31 = vrot.slane %v3760_v16, %v10136_v39  ;;  %v3784_v34 = vrot.slane %v3776_v17, %v10136_v39  ;;  %v3775_v56 = vrot.slane %v3761_v18, %v10136_v39  ;;  %v3791_v35 = vrot.slane %v3777_v23, %v10136_v39 }
 0x7ca   : > { %v3589_v36 = vrot.slane %v3582_v24, %v10134_v32  ;;  %v3597_v37 = vrot.slane %v7937_v27, %v10134_v32  ;;  %v3605_v38 = vrot.slane %v3598_v29, %v10134_v32  ;;  %v3613_v40 = vrot.slane %v7938_v30, %v10134_v32 }
 0x7cb   : > { %v3792_v57 = vcombine.low %v3768_v31, %v3784_v34  ;;  %v3794_v4 = vcombine.low %v3775_v56, %v3791_v35  ;;  %v3793_v8 = vcombine.high %v3768_v31, %v3784_v34  ;;  %v3795_v49 = vcombine.high %v3775_v56, %v3791_v35 }
 0x7cc   : > { %v3614_v42 = vcombine.low %v3589_v36, %v3597_v37  ;;  %v3615_v43 = vcombine.high %v3589_v36, %v3597_v37  ;;  %v3630_v44 = vcombine.low %v3605_v38, %v3613_v40  ;;  %v3631_v6 = vcombine.high %v3605_v38, %v3613_v40 }
 0x7cd   : > { %8309 = vmatprep.subr.msk.mxu1 %vm2318_vm3, %v3792_v57  ;;  %8319 = vmatprep.subr.msk.mxu0 %vm2318_vm3, %v3794_v4 }
 0x7ce   : > { %8310 = vmatpush3.xpose.msk.msra.mxu1 %vm2318_vm3, %v3792_v57  ;;  %8320 = vmatpush3.xpose.msk.msra.mxu0 %vm2318_vm3, %v3794_v4  ;;  %v3622_v45 = vrot.slane %v3614_v42, %v10136_v39  ;;  %v3638_v46 = vrot.slane %v3630_v44, %v10136_v39  ;;  %v3629_v47 = vrot.slane %v3615_v43, %v10136_v39 }
 0x7cf   : > { %8314 = vmatprep.subr.msk.mxu1 %vm2318_vm3, %v3793_v8  ;;  %v3645_v10 = vrot.slane %v3631_v6, %v10136_v39 }
 0x7d0   : > { %v3646_v48 = vcombine.low %v3622_v45, %v3638_v46  ;;  %v3647_v50 = vcombine.high %v3622_v45, %v3638_v46 }
 0x7d1   : > { %v3648_v33 = vcombine.low %v3629_v47, %v3645_v10  ;;  %v3649_v51 = vcombine.high %v3629_v47, %v3645_v10 }
 0x7d2   : > { %8312 = vmatmul.mubr.msk.f32.vlgmr.msra.gmra.mxu1 %vm2318_vm3, %v3646_v48 }
 0x7d3   : > { %8322 = vmatmul.mubr.msk.f32.vlgmr.msra.gmra.mxu0 %vm2318_vm3, %v3648_v33  ;;  %8315 = vmatpush3.xpose.msk.msra.mxu1 %vm2318_vm3, %v3793_v8 }
 0x7d4   : > { %8316 = vmatprep.mubr.msk.f32.mxu1 %vm2318_vm3, %v3579_v25  ;;  %8324 = vmatprep.subr.msk.mxu1 %vm2318_vm3, %v3795_v49 }
 0x7d6   : > { %8317 = vmatmul.mubr.msk.f32.vlgmr.msra.gmra.mxu1 %vm2318_vm3, %v3647_v50 }
 0x7d7   : > { %8325 = vmatpush3.xpose.msk.msra.mxu1 %vm2318_vm3, %v3795_v49  ;;  %8326 = vmatprep.mubr.msk.f32.mxu1 %vm2318_vm3, %v3581_v26 }
 0x7da   : > { %8327 = vmatmul.mubr.msk.f32.vlgmr.msra.gmra.mxu1 %vm2318_vm3, %v3649_v51 }
 0x892   : > { %v8313_v52 = vpop.f32.mrf.mxu1 }
 0x893   : > { %v4279_v11 = vmul.f32 0.35355338, %v8313_v52  ;;  %v8323_v19 = vpop.f32.mrf.mxu0 }
 0x894   : > { %v4017_v20 = vpop.f32.mrf.mxu1  ;;  %v4283_v0 = vmul.f32 0.35355338, %v8323_v19 }
 0x895   : > { %v4278_v25 = vmul.f32 0.35355338, %v4017_v20  ;;  %v4289_v53 = vsel %vm2318_vm3, %v4279_v11, -inf  ;;  %v4185_v58 = vpop.f32.mrf.mxu0 }
 0x896   : > { %4290 = vmax.xlane.f32.xlu0 %v4289_v53  ;;  %v8318_v54 = vpop.f32.mrf.mxu1  ;;  %v4282_v59 = vmul.f32 0.35355338, %v4185_v58  ;;  %v4301_v2 = vsel %vm2318_vm3, %v4283_v0, -inf }
 0x897   : > { %v4281_v41 = vmul.f32 0.35355338, %v8318_v54  ;;  %v4286_v55 = vsel %vm2318_vm3, %v4278_v25, -inf }
 0x898   : > { %4287 = vmax.xlane.f32.xlu1 %v4286_v55  ;;  %v4101_v21 = vpop.f32.mrf.mxu1  ;;  %v4298_v12 = vsel %vm2318_vm3, %v4282_v59, -inf }
 0x899   : > { %v4280_v22 = vmul.f32 0.35355338, %v4101_v21  ;;  %v4295_v61 = vsel %vm2318_vm3, %v4281_v41, -inf }
 0x89a   : > { %v8328_v26 = vpop.f32.mrf.mxu1 }
 0x89b   : > { %v4285_v60 = vmul.f32 0.35355338, %v8328_v26  ;;  %v4292_v62 = vsel %vm2318_vm3, %v4280_v22, -inf }
 0x89c   : > { %4296 = vmax.xlane.f32.xlu1 %v4295_v61  ;;  %4293 = vmax.xlane.f32.xlu0 %v4292_v62  ;;  %v4269_v63 = vpop.f32.mrf.mxu1 }
 0x89d   : > { %v4284_v1 = vmul.f32 0.35355338, %v4269_v63  ;;  %v4307_v9 = vsel %vm2318_vm3, %v4285_v60, -inf }
 0x89f   : > { %v4304_v14 = vsel %vm2318_vm3, %v4284_v1, -inf }
 0x8a0   : > { %4308 = vmax.xlane.f32.xlu1 %v4307_v9  ;;  %4299 = vmax.xlane.f32.xlu0 %v4298_v12 }
 0x8a4   : > { %4305 = vmax.xlane.f32.xlu1 %v4304_v14  ;;  %4302 = vmax.xlane.f32.xlu0 %v4301_v2 }
 0x8b5   : > { %3800 = vrot.lane.b32.xlu1 %v10419_v28, %s9533_s21 }
 0x91f   : > { %v4291_v3 = vpop.xlane.xlu0 %4290 }
 0x920   : > { %v4311_v5 = vsub.f32 %v4279_v11, %v4291_v3 }
 0x921   : > { %v4288_v7 = vpop.xlane.xlu1 %4287 }
 0x922   : > { %v4320_v15 = vmul.f32 1.442695, %v4311_v5  ;;  %v4310_v56 = vsub.f32 %v4278_v25, %v4288_v7 }
 0x924   : > { %8803 = vpow2.f32 %v4320_v15  ;;  %v4318_v42 = vmul.f32 1.442695, %v4310_v56 }
 0x925   : > { %v4297_v16 = vpop.xlane.xlu1 %4296  ;;  %v4294_v17 = vpop.xlane.xlu0 %4293 }
 0x926   : > { %v4313_v18 = vsub.f32 %v4281_v41, %v4297_v16  ;;  %v4312_v23 = vsub.f32 %v4280_v22, %v4294_v17 }
 0x928   : > { %v4324_v24 = vmul.f32 1.442695, %v4313_v18  ;;  %v4322_v27 = vmul.f32 1.442695, %v4312_v23 }
 0x929   : > { %v4309_v29 = vpop.xlane.xlu1 %4308  ;;  %v4300_v30 = vpop.xlane.xlu0 %4299 }
 0x92a   : > { %8805 = vpow2.f32 %v4324_v24  ;;  %v4317_v31 = vsub.f32 %v4285_v60, %v4309_v29  ;;  %v4314_v43 = vsub.f32 %v4282_v59, %v4300_v30 }
 0x92b   : > { %8807 = vpow2.f32 %v4322_v27 }
 0x92c   : > { %v4332_v34 = vmul.f32 1.442695, %v4317_v31  ;;  %v4326_v6 = vmul.f32 1.442695, %v4314_v43 }
 0x92d   : > { %v4306_v35 = vpop.xlane.xlu1 %4305  ;;  %v4303_v36 = vpop.xlane.xlu0 %4302 }
 0x92e   : > { %v4316_v37 = vsub.f32 %v4284_v1, %v4306_v35  ;;  %v4315_v38 = vsub.f32 %v4283_v0, %v4303_v36  ;;  %8809 = vpow2.f32 %v4332_v34 }
 0x930   : > { %v4330_v40 = vmul.f32 1.442695, %v4316_v37  ;;  %v4328_v57 = vmul.f32 1.442695, %v4315_v38 }
 0x931   : > { %v10490_v4 = vpop.eup %8803  ;;  %v3801_v25 = vpop.permute.xlu1 %3800 }
 0x932   : > { %v4337_v44 = vsel %vm2318_vm3, %v10490_v4, 0.0  ;;  %8811 = vpow2.f32 %v4328_v57  ;;  %v3806_v60 = vcombine.low %v10419_v28, %v3801_v25  ;;  %v3807_v62 = vcombine.high %v10419_v28, %v3801_v25 }
 0x933   : > { %4338 = vadd.xlane.f32.xlu0 %v4337_v44  ;;  %8813 = vpow2.f32 %v4330_v40 }
 0x934   : > { %8815 = vpow2.f32 %v4318_v42  ;;  %v3814_v12 = vrot.slane %v3806_v60, %v10134_v32  ;;  %v3821_v14 = vrot.slane %v3807_v62, %v10134_v32 }
 0x935   : > { %8817 = vpow2.f32 %v4326_v6 }
 0x937   : > { %v10494_v8 = vpop.eup %8805 }
 0x938   : > { %v4343_v45 = vsel %vm2318_vm3, %v10494_v8, 0.0  ;;  %v8808_v46 = vpop.eup %8807 }
 0x939   : > { %4344 = vadd.xlane.f32.xlu1 %v4343_v45  ;;  %v4340_v47 = vsel %vm2318_vm3, %v8808_v46, 0.0 }
 0x93b   : > { %v10499_v10 = vpop.eup %8809 }
 0x93c   : > { %v4355_v33 = vsel %vm2318_vm3, %v10499_v10, 0.0 }
 0x93d   : > { %4341 = vadd.xlane.f32.xlu1 %v4340_v47 }
 0x93f   : > { %v10501_v48 = vpop.eup %8811 }
 0x940   : > { %v10505_v49 = vpop.eup %8813  ;;  %v4349_v50 = vsel %vm2318_vm3, %v10501_v48, 0.0 }
 0x941   : > { %4356 = vadd.xlane.f32.xlu1 %v4355_v33  ;;  %v8816_v51 = vpop.eup %8815  ;;  %4350 = vadd.xlane.f32.xlu0 %v4349_v50  ;;  %v4352_v52 = vsel %vm2318_vm3, %v10505_v49, 0.0 }
 0x942   : > { %v4334_v11 = vsel %vm2318_vm3, %v8816_v51, 0.0  ;;  %v10512_v19 = vpop.eup %8817 }
 0x943   : > { %v4346_v20 = vsel %vm2318_vm3, %v10512_v19, 0.0 }
 0x945   : > { %4353 = vadd.xlane.f32.xlu1 %v4352_v52  ;;  %4335 = vadd.xlane.f32.xlu0 %v4334_v11 }
 0x949   : > { %4347 = vadd.xlane.f32.xlu0 %v4346_v20 }
 0x956   : > { %3803 = vrot.lane.b32.xlu1 %v10419_v28, %s9531_s4 }
 0x95f   : > { %3797 = vrot.lane.b32.xlu0 %v10419_v28, %s9532_s16 }
 0x9bc   : > { %v4339_v41 = vpop.xlane.xlu0 %4338 }
 0x9c2   : > { %v4345_v53 = vpop.xlane.xlu1 %4344 }
 0x9c6   : > { %v4342_v54 = vpop.xlane.xlu1 %4341 }
 0x9c7   : > { %8819 = vrcp.f32 %v4342_v54 }
 0x9ca   : > { %v4357_v55 = vpop.xlane.xlu1 %4356  ;;  %v4351_v58 = vpop.xlane.xlu0 %4350 }
 0x9ce   : > { %v4336_v21 = vpop.xlane.xlu0 %4335  ;;  %v4354_v22 = vpop.xlane.xlu1 %4353 }
 0x9cf   : > { %8821 = vrcp.f32 %v4336_v21 }
 0x9d0   : > { %8823 = vrcp.f32 %v4339_v41 }
 0x9d1   : > { %8825 = vrcp.f32 %v4345_v53 }
 0x9d2   : > { %v4348_v26 = vpop.xlane.xlu0 %4347  ;;  %v3804_v63 = vpop.permute.xlu1 %3803  ;;  %8827 = vrcp.f32 %v4357_v55 }
 0x9d3   : > { %8829 = vrcp.f32 %v4351_v58 }
 0x9d4   : > { %v8820_v59 = vpop.eup %8819  ;;  %8831 = vrcp.f32 %v4348_v26 }
 0x9d5   : > { %v4368_v61 = vmul.f32 %v8820_v59, %v8808_v46  ;;  %8833 = vrcp.f32 %v4354_v22 }
 0x9d6   : > { %v3798_v0 = vpop.permute.xlu0 %3797 }
 0x9d7   : > { %8336 = vmatprep.mubr.msk.f32.mxu1 %vm2318_vm3, %v4368_v61  ;;  %v3822_v1 = vcombine.low %v3798_v0, %v3804_v63  ;;  %v3823_v9 = vcombine.high %v3798_v0, %v3804_v63 }
 0x9d9   : > { %v3830_v2 = vrot.slane %v3822_v1, %v10134_v32  ;;  %v3837_v3 = vrot.slane %v3823_v9, %v10134_v32 }
 0x9db   : > { %v3838_v28 = vcombine.low %v3814_v12, %v3830_v2  ;;  %v3839_v5 = vcombine.high %v3814_v12, %v3830_v2  ;;  %v3854_v7 = vcombine.low %v3821_v14, %v3837_v3  ;;  %v3855_v15 = vcombine.high %v3821_v14, %v3837_v3 }
 0x9dc   : > { %v8822_v16 = vpop.eup %8821 }
 0x9dd   : > { %v3846_v17 = vrot.slane %v3838_v28, %v10136_v39  ;;  %v3853_v18 = vrot.slane %v3839_v5, %v10136_v39  ;;  %v3862_v23 = vrot.slane %v3854_v7, %v10136_v39  ;;  %v3869_v24 = vrot.slane %v3855_v15, %v10136_v39  ;;  %v8824_v38 = vpop.eup %8823 }
 0x9de   : > { %v4366_v27 = vmul.f32 %v8822_v16, %v8816_v51  ;;  %v8826_v44 = vpop.eup %8825  ;;  %v4367_v25 = vmul.f32 %v8824_v38, %v10490_v4 }
 0x9df   : > { %v3874_v29 = vcombine.low %v3846_v17, %v3853_v18  ;;  %v7941_v30 = vcombine.high %v3846_v17, %v3853_v18  ;;  %v3890_v31 = vcombine.low %v3862_v23, %v3869_v24  ;;  %v7942_v34 = vcombine.high %v3862_v23, %v3869_v24  ;;  %v8828_v6 = vpop.eup %8827 }
 0x9e0   : > { %8331 = vmatprep.mubr.msk.f32.mxu0 %vm2318_vm3, %v4366_v27  ;;  %v8830_v47 = vpop.eup %8829  ;;  %v4369_v53 = vmul.f32 %v8826_v44, %v10494_v8  ;;  %v4373_v8 = vmul.f32 %v8828_v6, %v10499_v10 }
 0x9e1   : > { %v3881_v56 = vrot.slane %v3874_v29, %v10134_v32  ;;  %v3889_v35 = vrot.slane %v7941_v30, %v10134_v32  ;;  %v3897_v36 = vrot.slane %v3890_v31, %v10134_v32  ;;  %v3905_v37 = vrot.slane %v7942_v34, %v10134_v32  ;;  %v8832_v51 = vpop.eup %8831 }
 0x9e2   : > { %v8834_v20 = vpop.eup %8833  ;;  %v4370_v55 = vmul.f32 %v8832_v51, %v10512_v19  ;;  %v4371_v4 = vmul.f32 %v8830_v47, %v10501_v48 }
 0x9e3   : > { %v3906_v40 = vcombine.low %v3881_v56, %v3889_v35  ;;  %v3922_v57 = vcombine.low %v3897_v36, %v3905_v37  ;;  %v3907_v42 = vcombine.high %v3881_v56, %v3889_v35  ;;  %v3923_v43 = vcombine.high %v3897_v36, %v3905_v37 }
 0x9e4   : > { %v4372_v58 = vmul.f32 %v8834_v20, %v10505_v49 }
 0x9e5   : > { %v3914_v45 = vrot.slane %v3906_v40, %v10136_v39  ;;  %v3930_v46 = vrot.slane %v3922_v57, %v10136_v39  ;;  %v3921_v33 = vrot.slane %v3907_v42, %v10136_v39  ;;  %v3937_v50 = vrot.slane %v3923_v43, %v10136_v39 }
 0x9e7   : > { %v3938_v52 = vcombine.low %v3914_v45, %v3930_v46  ;;  %v3939_v11 = vcombine.high %v3914_v45, %v3930_v46  ;;  %v3940_v54 = vcombine.low %v3921_v33, %v3937_v50  ;;  %v3941_v41 = vcombine.high %v3921_v33, %v3937_v50  ;;  %v5003_v45 = vld [vmem:[%s10072_s3 + $0x18] sm:$0xff] }
 0x9e9   : > { %8329 = vmatprep.subr.mxu0 %v3938_v52  ;;  %8334 = vmatprep.subr.mxu1 %v3939_v11 }
 0x9ea   : > { %8330 = vmatpush3.msra.mxu0 %v3938_v52  ;;  %8335 = vmatpush3.msra.mxu1 %v3939_v11 }
 0x9eb   : > { %8332 = vmatmul.mubr.msk.f32.vlgmr.msra.gmra.mxu0 %vm2318_vm3, %v4367_v25  ;;  %8337 = vmatmul.mubr.msk.f32.vlgmr.msra.gmra.mxu1 %vm2318_vm3, %v4369_v53 }
 0x9ec   : > { %8339 = vmatprep.subr.mxu0 %v3940_v54  ;;  %8344 = vmatprep.subr.mxu1 %v3941_v41 }
 0x9ed   : > { %8340 = vmatpush3.msra.mxu0 %v3940_v54  ;;  %8341 = vmatprep.mubr.msk.f32.mxu0 %vm2318_vm3, %v4370_v55  ;;  %v5002_v55 = vld [vmem:[%s10072_s3 + $0x10] sm:$0xff] }
 0x9ee   : > { %8345 = vmatpush3.msra.mxu1 %v3941_v41  ;;  %8346 = vmatprep.mubr.msk.f32.mxu1 %vm2318_vm3, %v4372_v58 }
 0x9ef   : > { %8342 = vmatmul.mubr.msk.f32.vlgmr.msra.gmra.mxu0 %vm2318_vm3, %v4371_v4  ;;  %8347 = vmatmul.mubr.msk.f32.vlgmr.msra.gmra.mxu1 %vm2318_vm3, %v4373_v8 }
 0x9f0   : > { %8349 = vmatprep.subr.mxu0 %v5003_v45 }
 0x9f1   : > { %8350 = vmatpush3.msra.mxu0 %v5003_v45 }
 0x9f2   : > { %8351 = vmatprep.subr.mxu0 %v5002_v55 }
 0x9f3   : > { %8352 = vmatpush3.msra.mxu0 %v5002_v55 }
 0xaab   : > { %v8333_v21 = vpop.f32.mrf.mxu0  ;;  %v8338_v19 = vpop.f32.mrf.mxu1 }
 0xaad   : > { %v4446_v22 = vpop.f32.mrf.mxu0  ;;  %v4527_v26 = vpop.f32.mrf.mxu1 }
 0xaaf   : > { %v8343_v59 = vpop.f32.mrf.mxu0  ;;  %v8348_v49 = vpop.f32.mrf.mxu1 }
 0xab0   : > { %v4766_v60 = vcombine.low %v8333_v21, %v8343_v59  ;;  %v4767_v61 = vcombine.high %v8333_v21, %v8343_v59  ;;  %v4782_v62 = vcombine.low %v8338_v19, %v8348_v49  ;;  %v4783_v63 = vcombine.high %v8338_v19, %v8348_v49  ;;  %v5001_v19 = vld [vmem:[%s10072_s3 + $0x8] sm:$0xff] }
 0xab1   : > { %v4608_v48 = vpop.f32.mrf.mxu0  ;;  %v4689_v0 = vpop.f32.mrf.mxu1  ;;  %8353 = vmatprep.subr.mxu0 %v5001_v19 }
 0xab2   : > { %v4774_v10 = vrot.slane %v4766_v60, %v10134_v32  ;;  %v4781_v1 = vrot.slane %v4767_v61, %v10134_v32  ;;  %v4790_v9 = vrot.slane %v4782_v62, %v10134_v32  ;;  %v4797_v12 = vrot.slane %v4783_v63, %v10134_v32  ;;  %8354 = vmatpush3.msra.mxu0 %v5001_v19 }
 0xab3   : > { %v4698_v14 = vcombine.low %v4446_v22, %v4608_v48  ;;  %v4699_v2 = vcombine.high %v4446_v22, %v4608_v48  ;;  %v4714_v3 = vcombine.low %v4527_v26, %v4689_v0  ;;  %v4715_v28 = vcombine.high %v4527_v26, %v4689_v0 }
 0xab4   : > { %v4798_v5 = vcombine.low %v4774_v10, %v4790_v9  ;;  %v4799_v7 = vcombine.high %v4774_v10, %v4790_v9  ;;  %v4814_v15 = vcombine.low %v4781_v1, %v4797_v12  ;;  %v4815_v16 = vcombine.high %v4781_v1, %v4797_v12  ;;  %v5000_v10 = vld [vmem:[%s10072_s3] sm:$0xff]  ;;  %s11086_s3 = sld [smem:[#allocation68_spill]] (!%p7972_p8) }
 0xab5   : > { %v4706_v17 = vrot.slane %v4698_v14, %v10134_v32  ;;  %v4713_v18 = vrot.slane %v4699_v2, %v10134_v32  ;;  %v4722_v23 = vrot.slane %v4714_v3, %v10134_v32  ;;  %v4729_v24 = vrot.slane %v4715_v28, %v10134_v32  ;;  %8355 = vmatprep.subr.mxu0 %v5000_v10 }
 0xab6   : > { %v4806_v27 = vrot.slane %v4798_v5, %v10136_v39  ;;  %v4813_v29 = vrot.slane %v4799_v7, %v10136_v39  ;;  %v4822_v30 = vrot.slane %v4814_v15, %v10136_v39  ;;  %v4829_v31 = vrot.slane %v4815_v16, %v10136_v39  ;;  %8356 = vmatpush3.msra.mxu0 %v5000_v10 }
 0xab7   : > { %v4730_v34 = vcombine.low %v4706_v17, %v4722_v23  ;;  %v4731_v56 = vcombine.high %v4706_v17, %v4722_v23  ;;  %v4746_v35 = vcombine.low %v4713_v18, %v4729_v24  ;;  %v4747_v36 = vcombine.high %v4713_v18, %v4729_v24 }
 0xab8   : > { %v4902_v37 = vcombine.low %v4806_v27, %v4813_v29  ;;  %v7965_v38 = vcombine.high %v4806_v27, %v4813_v29  ;;  %v4918_v40 = vcombine.low %v4822_v30, %v4829_v31  ;;  %v7966_v57 = vcombine.high %v4822_v30, %v4829_v31 }
 0xab9   : > { %v4738_v42 = vrot.slane %v4730_v34, %v10136_v39  ;;  %v4745_v43 = vrot.slane %v4731_v56, %v10136_v39  ;;  %v4754_v44 = vrot.slane %v4746_v35, %v10136_v39  ;;  %v4761_v6 = vrot.slane %v4747_v36, %v10136_v39  ;;  %v7967_v36 = vld [vmem:[%s11080_s6] ss:$0 sm:$0xff] }
 0xaba   : > { %v4909_v46 = vrot.slane %v4902_v37, %v10134_v32  ;;  %v4917_v47 = vrot.slane %v7965_v38, %v10134_v32  ;;  %v4925_v33 = vrot.slane %v4918_v40, %v10134_v32  ;;  %v4933_v50 = vrot.slane %v7966_v57, %v10134_v32 }
 0xabb   : > { %v4834_v51 = vcombine.low %v4738_v42, %v4745_v43  ;;  %v7963_v52 = vcombine.high %v4738_v42, %v4745_v43  ;;  %v4850_v11 = vcombine.low %v4754_v44, %v4761_v6  ;;  %v7964_v20 = vcombine.high %v4754_v44, %v4761_v6  ;;  %v8839_v42 = vld [vmem:[#allocation2 + $0x8] sm:$0xff]  ;;  %v8840_v6 = vld [vmem:[#allocation2] sm:$0xff] }
 0xabc   : > { %v4934_v25 = vcombine.low %v4909_v46, %v4917_v47  ;;  %v4950_v53 = vcombine.low %v4925_v33, %v4933_v50  ;;  %v4935_v54 = vcombine.high %v4909_v46, %v4917_v47  ;;  %v4951_v41 = vcombine.high %v4925_v33, %v4933_v50 }
 0xabd   : > { %v4841_v58 = vrot.slane %v4834_v51, %v10134_v32  ;;  %v4849_v4 = vrot.slane %v7963_v52, %v10134_v32  ;;  %v4857_v8 = vrot.slane %v4850_v11, %v10134_v32  ;;  %v4865_v21 = vrot.slane %v7964_v20, %v10134_v32 }
 0xabe   : > { %v4942_v22 = vrot.slane %v4934_v25, %v10136_v39  ;;  %v4958_v26 = vrot.slane %v4950_v53, %v10136_v39  ;;  %v4949_v63 = vrot.slane %v4935_v54, %v10136_v39  ;;  %v4965_v48 = vrot.slane %v4951_v41, %v10136_v39 }
 0xabf   : > { %v4866_v59 = vcombine.low %v4841_v58, %v4849_v4  ;;  %v4882_v49 = vcombine.low %v4857_v8, %v4865_v21  ;;  %v4867_v60 = vcombine.high %v4841_v58, %v4849_v4  ;;  %v4883_v61 = vcombine.high %v4857_v8, %v4865_v21 }
 0xac0   : > { %v4967_v62 = vcombine.high %v4942_v22, %v4958_v26  ;;  %v4966_v0 = vcombine.low %v4942_v22, %v4958_v26  ;;  %v4968_v28 = vcombine.low %v4949_v63, %v4965_v48  ;;  %v4969_v7 = vcombine.high %v4949_v63, %v4965_v48  ;;  %v7970_v22 = vld [vmem:[%s11081_s18] ss:$0 sm:$0xff] }
 0xac1   : > { %v4874_v1 = vrot.slane %v4866_v59, %v10136_v39  ;;  %v4890_v9 = vrot.slane %v4882_v49, %v10136_v39  ;;  %v4881_v14 = vrot.slane %v4867_v60, %v10136_v39  ;;  %v4897_v2 = vrot.slane %v4883_v61, %v10136_v39  ;;  %v7971_v59 = vld [vmem:[%s11082_s24] ss:$0 sm:$0xff] }
 0xac2   : > { %4974 = vrot.lane.b32.xlu1 %v4967_v62, %s9537_s20 }
 0xac3   : > { %v4899_v12 = vcombine.high %v4874_v1, %v4890_v9  ;;  %v4898_v3 = vcombine.low %v4874_v1, %v4890_v9  ;;  %v4900_v5 = vcombine.low %v4881_v14, %v4897_v2  ;;  %v4901_v15 = vcombine.high %v4881_v14, %v4897_v2 }
 0xac5   : > { %4972 = vrot.lane.b32.xlu0 %v4899_v12, %s9537_s20 }
 0xac6   : > { %4982 = vrot.lane.b32.xlu1 %v4968_v28, %s9536_s8 }
 0xac9   : > { %4980 = vrot.lane.b32.xlu0 %v4900_v5, %s9536_s8 }
 0xaca   : > { %4990 = vrot.lane.b32.xlu1 %v4969_v7, %s9538_s19 }
 0xacd   : > { %4988 = vrot.lane.b32.xlu0 %v4901_v15, %s9538_s19 }
 0xb34   : > { %v4975_v16 = vpop.permute.xlu1 %4974 }
 0xb35   : > { %v4995_v29 = vsel %vm2318_vm3, %v4966_v0, %v4975_v16 }
 0xb37   : > { %v4973_v17 = vpop.permute.xlu0 %4972 }
 0xb38   : > { %v4983_v18 = vpop.permute.xlu1 %4982  ;;  %v4994_v24 = vsel %vm2318_vm3, %v4898_v3, %v4973_v17 }
 0xb39   : > { %v4997_v34 = vsel %vm2639_vm4, %v4995_v29, %v4983_v18 }
 0xb3b   : > { %v4981_v23 = vpop.permute.xlu0 %4980 }
 0xb3c   : > { %v4991_v27 = vpop.permute.xlu1 %4990  ;;  %v4996_v30 = vsel %vm2639_vm4, %v4994_v24, %v4981_v23 }
 0xb3d   : > { %v4999_v35 = vsel %vm3126_vm5, %v4997_v34, %v4991_v27 }
 0xb3f   : > { %v4989_v31 = vpop.permute.xlu0 %4988 }
 0xb40   : > { %v4998_v56 = vsel %vm3126_vm5, %v4996_v30, %v4989_v31 }
 0xb41   : > { %8357 = vmatprep.mubr.msk.f32.mxu0 %vm1358_vm1, %v4998_v56 }
 0xb42   : > { %8358 = vmatmul.mubr.msk.f32.vlgmr.msra.gmra.mxu0 %vm1358_vm1, %v4999_v35 }
 0xc02   : > { %v8359_v37 = vpop.f32.mrf.mxu0 }
 0xc03   : > { %v5089_v38 = vadd.f32 %v8359_v37, %v7967_v36 }
 0xc04   : > { %v5083_v40 = vpop.f32.mrf.mxu0 }
 0xc05   : > { %v5084_v57 = vadd.f32 %v7967_v36, %v5083_v40  ;;  %v5093_v43 = vadd.f32 %v8839_v42, %v5089_v38 }
 0xc07   : > { %v5099_v44 = vsel %vm1358_vm1, %v5093_v43, 0.0  ;;  %v5092_v45 = vadd.f32 %v8840_v6, %v5084_v57 }
 0xc08   : > { %5100 = vadd.xlane.f32.xlu1 %v5099_v44 }
 0xc09   : > { %v5096_v46 = vsel %vm1358_vm1, %v5092_v45, 0.0 }
 0xc0a   : > { %5097 = vadd.xlane.f32.xlu0 %v5096_v46 }
 0xc91   : > { %v5101_v47 = vpop.xlane.xlu1 %5100 }
 0xc92   : > { %v5103_v33 = vmul.f32 0.03125, %v5101_v47 }
 0xc93   : > { %v5098_v50 = vpop.xlane.xlu0 %5097 }
 0xc94   : > { %v5102_v51 = vmul.f32 0.03125, %v5098_v50  ;;  %v5105_v52 = vsub.f32 %v5093_v43, %v5103_v33 }
 0xc96   : > { %v5104_v11 = vsub.f32 %v5092_v45, %v5102_v51  ;;  %v5107_v53 = vmul.f32 %v5105_v52, %v5105_v52 }
 0xc98   : > { %v5106_v20 = vmul.f32 %v5104_v11, %v5104_v11  ;;  %v5111_v54 = vsel %vm1358_vm1, %v5107_v53, 0.0 }
 0xc9a   : > { %v5108_v25 = vsel %vm1358_vm1, %v5106_v20, 0.0 }
 0xc9b   : > { %5109 = vadd.xlane.f32.xlu0 %v5108_v25 }
 0xc9f   : > { %5112 = vadd.xlane.f32.xlu0 %v5111_v54 }
 0xd24   : > { %v5110_v41 = vpop.xlane.xlu0 %5109 }
 0xd25   : > { %v5114_v55 = vmul.f32 0.03125, %v5110_v41 }
 0xd27   : > { %v5116_v58 = vadd.f32 1e-05, %v5114_v55 }
 0xd28   : > { %v5113_v4 = vpop.xlane.xlu0 %5112 }
 0xd29   : > { %8835 = vrsqrt.f32 %v5116_v58  ;;  %v5115_v8 = vmul.f32 0.03125, %v5113_v4 }
 0xd2b   : > { %v5117_v21 = vadd.f32 1e-05, %v5115_v8 }
 0xd2d   : > { %8837 = vrsqrt.f32 %v5117_v21 }
 0xd36   : > { %v8836_v19 = vpop.eup %8835 }
 0xd37   : > { %v5120_v26 = vmul.f32 %v8836_v19, %v5104_v11 }
 0xd39   : > { %v5128_v49 = vmul.f32 %v7970_v22, %v5120_v26 }
 0xd3a   : > { %v8838_v60 = vpop.eup %8837 }
 0xd3b   : > { %v5136_v61 = vadd.f32 %v7971_v59, %v5128_v49  ;;  %v5121_v62 = vmul.f32 %v8838_v60, %v5105_v52 }
 0xd3d   : > { %5138 = vst.msk [vmem:[#allocation2] sm:$0xff] %vm1358_vm1, %v5136_v61  ;;  %v5129_v63 = vmul.f32 %v7970_v22, %v5121_v62  ;;  %5143 = sbr.rel (%p7972_p8) target bundleno = 6383 (0x18ef), region = 212 }
 0xd3f   : > { %v5137_v48 = vadd.f32 %v7971_v59, %v5129_v63 }
 0xd41   : > { %5139 = vst.msk [vmem:[#allocation2 + $0x8] sm:$0xff] %vm1358_vm1, %v5137_v48 }
 0xd42   : > { %v5151_v0 = vld [vmem:[#allocation11 + $0x18] sm:$0xff]  ;;  %8368 = vmatprep.mubr.msk.f32.mxu0 %vm1358_vm1, %v5136_v61  ;;  %v9539_v1 = vmov 0.0   ;;  %v5150_v9 = vld [vmem:[#allocation11 + $0x10] sm:$0xff]  ;;  %v5145_v14 = vld [vmem:[#allocation9 + $0x8] sm:$0xff]  ;;  %vm9540_vm6 = vmmov 0   ;;  %vm7240_vm7 = vcmask 523264  }
 0xd43   : > { %v5147_v10 = vld [vmem:[#allocation9 + $0x18] sm:$0xff]  ;;  %8371 = vmatprep.subr.mxu1 %v9539_v1  ;;  %v5146_v12 = vld [vmem:[#allocation9 + $0x10] sm:$0xff]  ;;  %v5149_v2 = vld [vmem:[#allocation11 + $0x8] sm:$0xff]  ;;  %8379 = vmatprep.mubr.msk.f32.mxu1 %vm9540_vm6, %v9539_v1 }
 0xd44   : > { %8360 = vmatprep.subr.mxu0 %v5147_v10  ;;  %8372 = vmatpush3.msra.mxu1 %v5151_v0  ;;  %v5148_v3 = vld [vmem:[#allocation11] sm:$0xff]  ;;  %v5155_v17 = vld [vmem:[#allocation12 + $0x18] sm:$0xff]  ;;  %v5154_v18 = vld [vmem:[#allocation12 + $0x10] sm:$0xff] }
 0xd45   : > { %8361 = vmatpush3.msra.mxu0 %v5147_v10  ;;  %8373 = vmatprep.subr.mxu1 %v9539_v1  ;;  %v5144_v28 = vld [vmem:[#allocation9] sm:$0xff]  ;;  %v5153_v23 = vld [vmem:[#allocation12 + $0x8] sm:$0xff] }
 0xd46   : > { %8362 = vmatprep.subr.mxu0 %v5146_v12  ;;  %8374 = vmatpush3.msra.mxu1 %v5150_v9  ;;  %v5152_v24 = vld [vmem:[#allocation12] sm:$0xff] }
 0xd47   : > { %8363 = vmatpush3.msra.mxu0 %v5146_v12  ;;  %8375 = vmatprep.subr.mxu1 %v9539_v1 }
 0xd48   : > { %8364 = vmatprep.subr.mxu0 %v5145_v14  ;;  %8376 = vmatpush3.msra.mxu1 %v5149_v2 }
 0xd49   : > { %8365 = vmatpush3.msra.mxu0 %v5145_v14  ;;  %8377 = vmatprep.subr.mxu1 %v9539_v1 }
 0xd4a   : > { %8378 = vmatpush3.msra.mxu1 %v5148_v3  ;;  %8366 = vmatprep.subr.mxu0 %v5144_v28 }
 0xd4b   : > { %8380 = vmatmul.mubr.msk.f32.vlgmr.msra.gmra.mxu1 %vm1358_vm1, %v10093_v13  ;;  %8367 = vmatpush3.msra.mxu0 %v5144_v28 }
 0xd4c   : > { %8369 = vmatmul.mubr.msk.f32.vlgmr.msra.gmra.mxu0 %vm1358_vm1, %v5137_v48  ;;  %8382 = vmatprep.subr.mxu0 %v9539_v1 }
 0xd4d   : > { %8390 = vmatprep.mubr.msk.f32.mxu0 %vm9540_vm6, %v9539_v1  ;;  %8383 = vmatpush3.msra.mxu0 %v5155_v17 }
 0xd4e   : > { %8384 = vmatprep.subr.mxu0 %v9539_v1 }
 0xd4f   : > { %8385 = vmatpush3.msra.mxu0 %v5154_v18 }
 0xd50   : > { %8386 = vmatprep.subr.mxu0 %v9539_v1 }
 0xd51   : > { %8387 = vmatpush3.msra.mxu0 %v5153_v23 }
 0xd52   : > { %8388 = vmatprep.subr.mxu0 %v9539_v1 }
 0xd53   : > { %8389 = vmatpush3.msra.mxu0 %v5152_v24 }
 0xd54   : > { %8391 = vmatmul.mubr.msk.f32.vlgmr.msra.gmra.mxu0 %vm1358_vm1, %v10093_v13 }
 0xe0b   : > { %v5303_v5 = vpop.f32.mrf.mxu1 }
 0xe0c   : > { %5676 = vrot.lane.b32.xlu1 %v5303_v5, %s9541_s23  ;;  %5670 = vrot.lane.b32.xlu0 %v5303_v5, %s9542_s27  ;;  %v10630_v7 = vpop.f32.mrf.mxu0 }
 0xe0d   : > { %v8381_v15 = vpop.f32.mrf.mxu1 }
 0xe0e   : > { %v10632_v16 = vpop.f32.mrf.mxu0 }
 0xe10   : > { %5673 = vrot.lane.b32.xlu0 %v5303_v5, %s9543_s5  ;;  %5379 = vrot.lane.b32.xlu1 %v10632_v16, %s9542_s27 }
 0xe14   : > { %5381 = vrot.lane.b32.xlu0 %v10630_v7, %s9542_s27  ;;  %5391 = vrot.lane.b32.xlu1 %v10632_v16, %s9541_s23 }
 0xe18   : > { %5385 = vrot.lane.b32.xlu0 %v10632_v16, %s9543_s5  ;;  %5387 = vrot.lane.b32.xlu1 %v10630_v7, %s9543_s5 }
 0xe1c   : > { %5393 = vrot.lane.b32.xlu0 %v10630_v7, %s9541_s23 }
 0xe7e   : > { %v5677_v27 = vpop.permute.xlu1 %5676  ;;  %v5671_v29 = vpop.permute.xlu0 %5670 }
 0xe7f   : > { %v5695_v30 = vcombine.low %v5671_v29, %v5677_v27  ;;  %v5696_v31 = vcombine.high %v5671_v29, %v5677_v27 }
 0xe81   : > { %v5703_v37 = vrot.slane %v5695_v30, %v10134_v32  ;;  %v5710_v38 = vrot.slane %v5696_v31, %v10134_v32 }
 0xe82   : > { %v5674_v34 = vpop.permute.xlu0 %5673  ;;  %v5380_v56 = vpop.permute.xlu1 %5379 }
 0xe83   : > { %v5679_v35 = vcombine.low %v5303_v5, %v5674_v34  ;;  %v5680_v36 = vcombine.high %v5303_v5, %v5674_v34 }
 0xe85   : > { %v5687_v40 = vrot.slane %v5679_v35, %v10134_v32  ;;  %v5694_v57 = vrot.slane %v5680_v36, %v10134_v32 }
 0xe86   : > { %v5382_v42 = vpop.permute.xlu0 %5381  ;;  %v5392_v43 = vpop.permute.xlu1 %5391 }
 0xe87   : > { %v5711_v44 = vcombine.low %v5687_v40, %v5703_v37  ;;  %v5712_v6 = vcombine.high %v5687_v40, %v5703_v37  ;;  %v5727_v45 = vcombine.low %v5694_v57, %v5710_v38  ;;  %v5728_v46 = vcombine.high %v5694_v57, %v5710_v38 }
 0xe88   : > { %v5413_v47 = vcombine.low %v5380_v56, %v5392_v43  ;;  %v5414_v33 = vcombine.high %v5380_v56, %v5392_v43 }
 0xe89   : > { %v5719_v50 = vrot.slane %v5711_v44, %v10136_v39  ;;  %v5726_v51 = vrot.slane %v5712_v6, %v10136_v39  ;;  %v5735_v52 = vrot.slane %v5727_v45, %v10136_v39  ;;  %v5742_v11 = vrot.slane %v5728_v46, %v10136_v39 }
 0xe8a   : > { %v5421_v20 = vrot.slane %v5413_v47, %v10134_v32  ;;  %v5428_v25 = vrot.slane %v5414_v33, %v10134_v32  ;;  %v5386_v53 = vpop.permute.xlu0 %5385  ;;  %v5388_v54 = vpop.permute.xlu1 %5387 }
 0xe8b   : > { %v5747_v41 = vcombine.low %v5719_v50, %v5726_v51  ;;  %v7981_v55 = vcombine.high %v5719_v50, %v5726_v51  ;;  %v5763_v58 = vcombine.low %v5735_v52, %v5742_v11  ;;  %v7982_v4 = vcombine.high %v5735_v52, %v5742_v11 }
 0xe8c   : > { %v5397_v8 = vcombine.low %v10632_v16, %v5386_v53  ;;  %v5398_v21 = vcombine.high %v10632_v16, %v5386_v53  ;;  %v5465_v19 = vcombine.low %v10630_v7, %v5388_v54  ;;  %v5466_v22 = vcombine.high %v10630_v7, %v5388_v54 }
 0xe8d   : > { %v10667_v26 = vrot.slane %v5747_v41, %v10134_v32  ;;  %v10670_v59 = vrot.slane %v7981_v55, %v10134_v32  ;;  %v10673_v49 = vrot.slane %v5763_v58, %v10134_v32  ;;  %v5778_v60 = vrot.slane %v7982_v4, %v10134_v32 }
 0xe8e   : > { %v5405_v61 = vrot.slane %v5397_v8, %v10134_v32  ;;  %v5412_v62 = vrot.slane %v5398_v21, %v10134_v32  ;;  %v5473_v63 = vrot.slane %v5465_v19, %v10134_v32  ;;  %v5480_v48 = vrot.slane %v5466_v22, %v10134_v32  ;;  %v5394_v0 = vpop.permute.xlu0 %5393 }
 0xe8f   : > { %v5481_v10 = vcombine.low %v5382_v42, %v5394_v0  ;;  %v5482_v9 = vcombine.high %v5382_v42, %v5394_v0  ;;  %v5779_v12 = vcombine.low %v10667_v26, %v10670_v59  ;;  %v5795_v14 = vcombine.low %v10673_v49, %v5778_v60 }
 0xe90   : > { %v5429_v2 = vcombine.low %v5405_v61, %v5421_v20  ;;  %v5430_v3 = vcombine.high %v5405_v61, %v5421_v20  ;;  %v5445_v28 = vcombine.low %v5412_v62, %v5428_v25  ;;  %v5446_v5 = vcombine.high %v5412_v62, %v5428_v25 }
 0xe91   : > { %v5489_v7 = vrot.slane %v5481_v10, %v10134_v32  ;;  %v5496_v15 = vrot.slane %v5482_v9, %v10134_v32  ;;  %v5787_v16 = vrot.slane %v5779_v12, %v10136_v39  ;;  %v5803_v17 = vrot.slane %v5795_v14, %v10136_v39 }
 0xe92   : > { %v5437_v18 = vrot.slane %v5429_v2, %v10136_v39  ;;  %v5444_v23 = vrot.slane %v5430_v3, %v10136_v39  ;;  %v5453_v24 = vrot.slane %v5445_v28, %v10136_v39  ;;  %v5460_v27 = vrot.slane %v5446_v5, %v10136_v39 }
 0xe93   : > { %v5497_v29 = vcombine.low %v5473_v63, %v5489_v7  ;;  %v5498_v30 = vcombine.high %v5473_v63, %v5489_v7  ;;  %v5513_v31 = vcombine.low %v5480_v48, %v5496_v15  ;;  %v5514_v34 = vcombine.high %v5480_v48, %v5496_v15 }
 0xe94   : > { %v5533_v56 = vcombine.low %v5437_v18, %v5444_v23  ;;  %v7977_v35 = vcombine.high %v5437_v18, %v5444_v23  ;;  %v5549_v36 = vcombine.low %v5453_v24, %v5460_v27  ;;  %v7978_v37 = vcombine.high %v5453_v24, %v5460_v27 }
 0xe95   : > { %v5505_v38 = vrot.slane %v5497_v29, %v10136_v39  ;;  %v5512_v40 = vrot.slane %v5498_v30, %v10136_v39  ;;  %v5521_v57 = vrot.slane %v5513_v31, %v10136_v39  ;;  %v5528_v42 = vrot.slane %v5514_v34, %v10136_v39 }
 0xe96   : > { %v5540_v43 = vrot.slane %v5533_v56, %v10134_v32  ;;  %v5548_v44 = vrot.slane %v7977_v35, %v10134_v32  ;;  %v5556_v6 = vrot.slane %v5549_v36, %v10134_v32  ;;  %v5564_v45 = vrot.slane %v7978_v37, %v10134_v32 }
 0xe97   : > { %v5601_v46 = vcombine.low %v5505_v38, %v5512_v40  ;;  %v7979_v47 = vcombine.high %v5505_v38, %v5512_v40  ;;  %v5617_v33 = vcombine.low %v5521_v57, %v5528_v42  ;;  %v7980_v50 = vcombine.high %v5521_v57, %v5528_v42 }
 0xe98   : > { %v5811_v51 = vcombine.low %v5787_v16, %v5803_v17  ;;  %v5812_v52 = vcombine.high %v5787_v16, %v5803_v17  ;;  %v5565_v11 = vcombine.low %v5540_v43, %v5548_v44  ;;  %v5581_v20 = vcombine.low %v5556_v6, %v5564_v45 }
 0xe99   : > { %v5608_v25 = vrot.slane %v5601_v46, %v10134_v32  ;;  %v5616_v53 = vrot.slane %v7979_v47, %v10134_v32  ;;  %v5624_v54 = vrot.slane %v5617_v33, %v10134_v32  ;;  %v5632_v41 = vrot.slane %v7980_v50, %v10134_v32 }
 0xe9a   : > { %8393 = vmatprep.subr.msk.mxu1 %vm2318_vm3, %v5811_v51  ;;  %v5573_v55 = vrot.slane %v5565_v11, %v10136_v39  ;;  %v5589_v58 = vrot.slane %v5581_v20, %v10136_v39  ;;  %v5780_v4 = vcombine.high %v10667_v26, %v10670_v59  ;;  %v5796_v8 = vcombine.high %v10673_v49, %v5778_v60 }
 0xe9b   : > { %v5633_v21 = vcombine.low %v5608_v25, %v5616_v53  ;;  %v5649_v19 = vcombine.low %v5624_v54, %v5632_v41  ;;  %8394 = vmatpush3.xpose.msk.msra.mxu1 %vm2318_vm3, %v5811_v51  ;;  %v5566_v0 = vcombine.high %v5540_v43, %v5548_v44  ;;  %v5582_v10 = vcombine.high %v5556_v6, %v5564_v45  ;;  %v10740_v51 = vpop.f32.mrf.mxu0 }
 0xe9c   : > { %8398 = vmatprep.subr.msk.mxu1 %vm2318_vm3, %v5812_v52  ;;  %v5597_v22 = vcombine.low %v5573_v55, %v5589_v58  ;;  %v5794_v61 = vrot.slane %v5780_v4, %v10136_v39  ;;  %v5810_v62 = vrot.slane %v5796_v8, %v10136_v39  ;;  %v5634_v26 = vcombine.high %v5608_v25, %v5616_v53 }
 0xe9d   : > { %v5641_v63 = vrot.slane %v5633_v21, %v10136_v39  ;;  %v5657_v48 = vrot.slane %v5649_v19, %v10136_v39  ;;  %v5650_v59 = vcombine.high %v5624_v54, %v5632_v41  ;;  %v5598_v60 = vcombine.high %v5573_v55, %v5589_v58 }
 0xe9e   : > { %8395 = vmatprep.mubr.msk.f32.mxu1 %vm2318_vm3, %v5597_v22  ;;  %v5580_v9 = vrot.slane %v5566_v0, %v10136_v39  ;;  %v5596_v12 = vrot.slane %v5582_v10, %v10136_v39  ;;  %v5813_v14 = vcombine.low %v5794_v61, %v5810_v62  ;;  %v5648_v3 = vrot.slane %v5634_v26, %v10136_v39 }
 0xe9f   : > { %v5665_v49 = vcombine.low %v5641_v63, %v5657_v48  ;;  %v5666_v2 = vcombine.high %v5641_v63, %v5657_v48  ;;  %v5664_v28 = vrot.slane %v5650_v59, %v10136_v39  ;;  %v5814_v7 = vcombine.high %v5794_v61, %v5810_v62 }
 0xea0   : > { %v5599_v5 = vcombine.low %v5580_v9, %v5596_v12  ;;  %v5600_v16 = vcombine.high %v5580_v9, %v5596_v12 }
 0xea1   : > { %8396 = vmatmul.mubr.msk.f32.vlgmr.msra.gmra.mxu1 %vm2318_vm3, %v5665_v49  ;;  %v5667_v15 = vcombine.low %v5648_v3, %v5664_v28  ;;  %v5668_v17 = vcombine.high %v5648_v3, %v5664_v28 }
 0xea2   : > { %8399 = vmatpush3.xpose.msk.msra.mxu1 %vm2318_vm3, %v5812_v52  ;;  %8400 = vmatprep.mubr.msk.f32.mxu1 %vm2318_vm3, %v5598_v60  ;;  %v8392_v52 = vpop.f32.mrf.mxu0 }
 0xea3   : > { %8403 = vmatprep.subr.msk.mxu1 %vm2318_vm3, %v5813_v14 }
 0xea5   : > { %8401 = vmatmul.mubr.msk.f32.vlgmr.msra.gmra.mxu1 %vm2318_vm3, %v5666_v2 }
 0xea6   : > { %8404 = vmatpush3.xpose.msk.msra.mxu1 %vm2318_vm3, %v5813_v14  ;;  %8405 = vmatprep.mubr.msk.f32.mxu1 %vm2318_vm3, %v5599_v5 }
 0xea7   : > { %8408 = vmatprep.subr.msk.mxu1 %vm2318_vm3, %v5814_v7 }
 0xea9   : > { %8406 = vmatmul.mubr.msk.f32.vlgmr.msra.gmra.mxu1 %vm2318_vm3, %v5667_v15 }
 0xeaa   : > { %8409 = vmatpush3.xpose.msk.msra.mxu1 %vm2318_vm3, %v5814_v7  ;;  %8410 = vmatprep.mubr.msk.f32.mxu1 %vm2318_vm3, %v5600_v16 }
 0xead   : > { %8411 = vmatmul.mubr.msk.f32.vlgmr.msra.gmra.mxu1 %vm2318_vm3, %v5668_v17 }
 0xf61   : > { %v8397_v18 = vpop.f32.mrf.mxu1 }
 0xf62   : > { %v6298_v23 = vmul.f32 0.35355338, %v8397_v18 }
 0xf63   : > { %v6036_v24 = vpop.f32.mrf.mxu1 }
 0xf64   : > { %v6297_v27 = vmul.f32 0.35355338, %v6036_v24  ;;  %v6308_v29 = vsel %vm2318_vm3, %v6298_v23, -inf }
 0xf65   : > { %6309 = vmax.xlane.f32.xlu0 %v6308_v29  ;;  %v8402_v30 = vpop.f32.mrf.mxu1 }
 0xf66   : > { %v6300_v31 = vmul.f32 0.35355338, %v8402_v30  ;;  %v6305_v34 = vsel %vm2318_vm3, %v6297_v27, -inf }
 0xf67   : > { %6306 = vmax.xlane.f32.xlu1 %v6305_v34  ;;  %v6120_v56 = vpop.f32.mrf.mxu1 }
 0xf68   : > { %v6299_v35 = vmul.f32 0.35355338, %v6120_v56  ;;  %v6314_v37 = vsel %vm2318_vm3, %v6300_v31, -inf }
 0xf69   : > { %v8407_v36 = vpop.f32.mrf.mxu1 }
 0xf6a   : > { %v6311_v38 = vsel %vm2318_vm3, %v6299_v35, -inf  ;;  %v6302_v43 = vmul.f32 0.35355338, %v8407_v36 }
 0xf6b   : > { %6315 = vmax.xlane.f32.xlu1 %v6314_v37  ;;  %6312 = vmax.xlane.f32.xlu0 %v6311_v38  ;;  %v6204_v40 = vpop.f32.mrf.mxu1 }
 0xf6c   : > { %v6301_v57 = vmul.f32 0.35355338, %v6204_v40  ;;  %v6320_v33 = vsel %vm2318_vm3, %v6302_v43, -inf }
 0xf6d   : > { %v8412_v42 = vpop.f32.mrf.mxu1 }
 0xf6e   : > { %v6304_v44 = vmul.f32 0.35355338, %v8412_v42  ;;  %v6317_v6 = vsel %vm2318_vm3, %v6301_v57, -inf }
 0xf6f   : > { %6318 = vmax.xlane.f32.xlu0 %v6317_v6  ;;  %v6288_v45 = vpop.f32.mrf.mxu1 }
 0xf70   : > { %v6303_v46 = vmul.f32 0.35355338, %v6288_v45  ;;  %v6326_v47 = vsel %vm2318_vm3, %v6304_v44, -inf }
 0xf71   : > { %6327 = vmax.xlane.f32.xlu1 %v6326_v47 }
 0xf72   : > { %v6323_v50 = vsel %vm2318_vm3, %v6303_v46, -inf }
 0xf73   : > { %6321 = vmax.xlane.f32.xlu0 %v6320_v33 }
 0xf75   : > { %6324 = vmax.xlane.f32.xlu1 %v6323_v50 }
 0xfee   : > { %v6310_v11 = vpop.xlane.xlu0 %6309 }
 0xfef   : > { %v6330_v20 = vsub.f32 %v6298_v23, %v6310_v11 }
 0xff0   : > { %v6307_v25 = vpop.xlane.xlu1 %6306 }
 0xff1   : > { %v6339_v53 = vmul.f32 1.442695, %v6330_v20  ;;  %v6329_v54 = vsub.f32 %v6297_v27, %v6307_v25 }
 0xff3   : > { %8841 = vpow2.f32 %v6339_v53  ;;  %v6337_v41 = vmul.f32 1.442695, %v6329_v54 }
 0xff4   : > { %v6316_v55 = vpop.xlane.xlu1 %6315  ;;  %v6313_v58 = vpop.xlane.xlu0 %6312 }
 0xff5   : > { %8843 = vpow2.f32 %v6337_v41  ;;  %v6332_v4 = vsub.f32 %v6300_v31, %v6316_v55  ;;  %v6331_v8 = vsub.f32 %v6299_v35, %v6313_v58 }
 0xff7   : > { %v6343_v21 = vmul.f32 1.442695, %v6332_v4  ;;  %v6341_v19 = vmul.f32 1.442695, %v6331_v8 }
 0xff8   : > { %v6319_v22 = vpop.xlane.xlu0 %6318 }
 0xff9   : > { %8845 = vpow2.f32 %v6343_v21  ;;  %v6333_v61 = vsub.f32 %v6301_v57, %v6319_v22 }
 0xffa   : > { %8847 = vpow2.f32 %v6341_v19  ;;  %v6328_v7 = vpop.xlane.xlu1 %6327 }
 0xffb   : > { %v6345_v48 = vmul.f32 1.442695, %v6333_v61  ;;  %v6336_v15 = vsub.f32 %v6304_v44, %v6328_v7 }
 0xffc   : > { %v6322_v62 = vpop.xlane.xlu0 %6321 }
 0xffd   : > { %v6334_v63 = vsub.f32 %v6302_v43, %v6322_v62  ;;  %v6351_v17 = vmul.f32 1.442695, %v6336_v15 }
 0xffe   : > { %v6325_v16 = vpop.xlane.xlu1 %6324 }
 0xfff   : > { %v6347_v0 = vmul.f32 1.442695, %v6334_v63  ;;  %v6335_v18 = vsub.f32 %v6303_v46, %v6325_v16 }
0x1000   : > { %v10742_v10 = vpop.eup %8841 }
0x1001   : > { %8849 = vpow2.f32 %v6347_v0  ;;  %v6356_v26 = vsel %vm2318_vm3, %v10742_v10, 0.0  ;;  %v6349_v23 = vmul.f32 1.442695, %v6335_v18 }
0x1002   : > { %v8844_v59 = vpop.eup %8843  ;;  %6357 = vadd.xlane.f32.xlu0 %v6356_v26  ;;  %8851 = vpow2.f32 %v6345_v48 }
0x1003   : > { %v6353_v49 = vsel %vm2318_vm3, %v8844_v59, 0.0  ;;  %8853 = vpow2.f32 %v6351_v17 }
0x1004   : > { %8855 = vpow2.f32 %v6349_v23 }
0x1006   : > { %v10747_v60 = vpop.eup %8845  ;;  %6354 = vadd.xlane.f32.xlu0 %v6353_v49 }
0x1007   : > { %v6362_v9 = vsel %vm2318_vm3, %v10747_v60, 0.0  ;;  %v8848_v12 = vpop.eup %8847 }
0x1008   : > { %6363 = vadd.xlane.f32.xlu1 %v6362_v9  ;;  %v6359_v14 = vsel %vm2318_vm3, %v8848_v12, 0.0 }
0x100c   : > { %6360 = vadd.xlane.f32.xlu1 %v6359_v14 }
0x100e   : > { %v10752_v2 = vpop.eup %8849 }
0x100f   : > { %v6368_v3 = vsel %vm2318_vm3, %v10752_v2, 0.0  ;;  %v10756_v28 = vpop.eup %8851 }
0x1010   : > { %6369 = vadd.xlane.f32.xlu0 %v6368_v3  ;;  %v6365_v5 = vsel %vm2318_vm3, %v10756_v28, 0.0  ;;  %v10764_v24 = vpop.eup %8853 }
0x1011   : > { %v6374_v27 = vsel %vm2318_vm3, %v10764_v24, 0.0  ;;  %v10768_v29 = vpop.eup %8855 }
0x1012   : > { %v6371_v30 = vsel %vm2318_vm3, %v10768_v29, 0.0 }
0x1014   : > { %6366 = vadd.xlane.f32.xlu0 %v6365_v5 }
0x101d   : > { %5819 = vrot.lane.b32.xlu1 %v10740_v51, %s9543_s5 }
0x102a   : > { %5816 = vrot.lane.b32.xlu0 %v10740_v51, %s9542_s27 }
0x1041   : > { %6375 = vadd.xlane.f32.xlu1 %v6374_v27 }
0x1045   : > { %6372 = vadd.xlane.f32.xlu1 %v6371_v30 }
0x1056   : > { %5822 = vrot.lane.b32.xlu1 %v10740_v51, %s9541_s23 }
0x108b   : > { %v6358_v31 = vpop.xlane.xlu0 %6357 }
0x108f   : > { %v6355_v34 = vpop.xlane.xlu0 %6354 }
0x1090   : > { %8857 = vrcp.f32 %v6355_v34 }
0x1091   : > { %v6364_v56 = vpop.xlane.xlu1 %6363 }
0x1095   : > { %v6361_v35 = vpop.xlane.xlu1 %6360 }
0x1096   : > { %8859 = vrcp.f32 %v6361_v35 }
0x1097   : > { %8861 = vrcp.f32 %v6358_v31 }
0x1098   : > { %8863 = vrcp.f32 %v6364_v56 }
0x1099   : > { %v6370_v57 = vpop.xlane.xlu0 %6369  ;;  %v5820_v42 = vpop.permute.xlu1 %5819 }
0x109a   : > { %v5825_v45 = vcombine.low %v10740_v51, %v5820_v42  ;;  %v5826_v46 = vcombine.high %v10740_v51, %v5820_v42  ;;  %8865 = vrcp.f32 %v6370_v57 }
0x109c   : > { %v5833_v11 = vrot.slane %v5825_v45, %v10134_v32  ;;  %v5840_v20 = vrot.slane %v5826_v46, %v10134_v32 }
0x109d   : > { %v8858_v36 = vpop.eup %8857  ;;  %v6367_v44 = vpop.xlane.xlu0 %6366 }
0x109e   : > { %v6385_v37 = vmul.f32 %v8858_v36, %v8844_v59  ;;  %8867 = vrcp.f32 %v6367_v44 }
0x10a0   : > { %8415 = vmatprep.mubr.msk.f32.mxu0 %vm2318_vm3, %v6385_v37 }
0x10a1   : > { %v5817_v47 = vpop.permute.xlu0 %5816 }
0x10a3   : > { %v8860_v38 = vpop.eup %8859 }
0x10a4   : > { %v6387_v40 = vmul.f32 %v8860_v38, %v8848_v12  ;;  %v8862_v59 = vpop.eup %8861 }
0x10a5   : > { %v8864_v3 = vpop.eup %8863  ;;  %v6386_v34 = vmul.f32 %v8862_v59, %v10742_v10 }
0x10a6   : > { %8420 = vmatprep.mubr.msk.f32.mxu1 %vm2318_vm3, %v6387_v40  ;;  %v6388_v56 = vmul.f32 %v8864_v3, %v10747_v60 }
0x10a7   : > { %v8866_v5 = vpop.eup %8865 }
0x10a8   : > { %v6390_v10 = vmul.f32 %v8866_v5, %v10752_v2 }
0x10ab   : > { %v8868_v16 = vpop.eup %8867 }
0x10ac   : > { %v6389_v37 = vmul.f32 %v8868_v16, %v10756_v28 }
0x10ca   : > { %v6376_v43 = vpop.xlane.xlu1 %6375 }
0x10cb   : > { %8869 = vrcp.f32 %v6376_v43 }
0x10ce   : > { %v6373_v6 = vpop.xlane.xlu1 %6372 }
0x10cf   : > { %8871 = vrcp.f32 %v6373_v6 }
0x10d2   : > { %v5823_v33 = vpop.permute.xlu1 %5822 }
0x10d3   : > { %v5841_v50 = vcombine.low %v5817_v47, %v5823_v33  ;;  %v5842_v52 = vcombine.high %v5817_v47, %v5823_v33 }
0x10d5   : > { %v5849_v25 = vrot.slane %v5841_v50, %v10134_v32  ;;  %v5856_v53 = vrot.slane %v5842_v52, %v10134_v32 }
0x10d7   : > { %v5857_v54 = vcombine.low %v5833_v11, %v5849_v25  ;;  %v5858_v41 = vcombine.high %v5833_v11, %v5849_v25  ;;  %v5873_v51 = vcombine.low %v5840_v20, %v5856_v53  ;;  %v5874_v55 = vcombine.high %v5840_v20, %v5856_v53 }
0x10d8   : > { %v8870_v23 = vpop.eup %8869 }
0x10d9   : > { %v5865_v58 = vrot.slane %v5857_v54, %v10136_v39  ;;  %v5872_v4 = vrot.slane %v5858_v41, %v10136_v39  ;;  %v5881_v8 = vrot.slane %v5873_v51, %v10136_v39  ;;  %v5888_v21 = vrot.slane %v5874_v55, %v10136_v39 }
0x10da   : > { %v6392_v60 = vmul.f32 %v8870_v23, %v10764_v24 }
0x10db   : > { %v5893_v19 = vcombine.low %v5865_v58, %v5872_v4  ;;  %v7983_v22 = vcombine.high %v5865_v58, %v5872_v4  ;;  %v5909_v61 = vcombine.low %v5881_v8, %v5888_v21  ;;  %v7984_v62 = vcombine.high %v5881_v8, %v5888_v21 }
0x10dc   : > { %v8872_v31 = vpop.eup %8871 }
0x10dd   : > { %v5900_v63 = vrot.slane %v5893_v19, %v10134_v32  ;;  %v5908_v48 = vrot.slane %v7983_v22, %v10134_v32  ;;  %v5916_v0 = vrot.slane %v5909_v61, %v10134_v32  ;;  %v5924_v26 = vrot.slane %v7984_v62, %v10134_v32 }
0x10de   : > { %v6391_v38 = vmul.f32 %v8872_v31, %v10768_v29 }
0x10df   : > { %v5925_v49 = vcombine.low %v5900_v63, %v5908_v48  ;;  %v5941_v9 = vcombine.low %v5916_v0, %v5924_v26  ;;  %v5926_v12 = vcombine.high %v5900_v63, %v5908_v48  ;;  %v5942_v14 = vcombine.high %v5916_v0, %v5924_v26 }
0x10e1   : > { %v5933_v7 = vrot.slane %v5925_v49, %v10136_v39  ;;  %v5949_v15 = vrot.slane %v5941_v9, %v10136_v39  ;;  %v5940_v17 = vrot.slane %v5926_v12, %v10136_v39  ;;  %v5956_v18 = vrot.slane %v5942_v14, %v10136_v39 }
0x10e3   : > { %v5957_v27 = vcombine.low %v5933_v7, %v5949_v15  ;;  %v5958_v30 = vcombine.high %v5933_v7, %v5949_v15  ;;  %v5959_v35 = vcombine.low %v5940_v17, %v5956_v18  ;;  %v5960_v36 = vcombine.high %v5940_v17, %v5956_v18  ;;  %v7022_v15 = vld [vmem:[#allocation14 + $0x18] sm:$0xff] }
0x10e5   : > { %8413 = vmatprep.subr.mxu0 %v5957_v27  ;;  %8418 = vmatprep.subr.mxu1 %v5958_v30 }
0x10e6   : > { %8414 = vmatpush3.msra.mxu0 %v5957_v27  ;;  %8419 = vmatpush3.msra.mxu1 %v5958_v30 }
0x10e7   : > { %8416 = vmatmul.mubr.msk.f32.vlgmr.msra.gmra.mxu0 %vm2318_vm3, %v6386_v34  ;;  %8421 = vmatmul.mubr.msk.f32.vlgmr.msra.gmra.mxu1 %vm2318_vm3, %v6388_v56 }
0x10e8   : > { %8423 = vmatprep.subr.mxu0 %v5959_v35  ;;  %8428 = vmatprep.subr.mxu1 %v5960_v36 }
0x10e9   : > { %8424 = vmatpush3.msra.mxu0 %v5959_v35  ;;  %8425 = vmatprep.mubr.msk.f32.mxu0 %vm2318_vm3, %v6389_v37 }
0x10ea   : > { %8429 = vmatpush3.msra.mxu1 %v5960_v36  ;;  %8430 = vmatprep.mubr.msk.f32.mxu1 %vm2318_vm3, %v6391_v38  ;;  %v7021_v38 = vld [vmem:[#allocation14 + $0x10] sm:$0xff] }
0x10eb   : > { %8426 = vmatmul.mubr.msk.f32.vlgmr.msra.gmra.mxu0 %vm2318_vm3, %v6390_v10  ;;  %8431 = vmatmul.mubr.msk.f32.vlgmr.msra.gmra.mxu1 %vm2318_vm3, %v6392_v60 }
0x10ec   : > { %8444 = vmatprep.subr.mxu1 %v9539_v1  ;;  %8452 = vmatprep.mubr.msk.f32.mxu1 %vm9540_vm6, %v9539_v1 }
0x10ed   : > { %8433 = vmatprep.subr.mxu0 %v7022_v15 }
0x10ee   : > { %8434 = vmatpush3.msra.mxu0 %v7022_v15 }
0x10ef   : > { %8435 = vmatprep.subr.mxu0 %v7021_v38 }
0x10f0   : > { %8436 = vmatpush3.msra.mxu0 %v7021_v38  ;;  %v8012_v38 = vld [vmem:[#allocation17] ss:$0 sm:$0xff] }
0x11a7   : > { %v8417_v28 = vpop.f32.mrf.mxu0  ;;  %v8422_v29 = vpop.f32.mrf.mxu1 }
0x11a9   : > { %v6465_v40 = vpop.f32.mrf.mxu0  ;;  %v6546_v57 = vpop.f32.mrf.mxu1 }
0x11ab   : > { %v8427_v42 = vpop.f32.mrf.mxu0  ;;  %v8432_v2 = vpop.f32.mrf.mxu1 }
0x11ac   : > { %v6785_v43 = vcombine.low %v8417_v28, %v8427_v42  ;;  %v6786_v24 = vcombine.high %v8417_v28, %v8427_v42  ;;  %v6801_v44 = vcombine.low %v8422_v29, %v8432_v2  ;;  %v6802_v6 = vcombine.high %v8422_v29, %v8432_v2 }
0x11ad   : > { %v6627_v45 = vpop.f32.mrf.mxu0  ;;  %v6708_v46 = vpop.f32.mrf.mxu1 }
0x11ae   : > { %v6793_v47 = vrot.slane %v6785_v43, %v10134_v32  ;;  %v6800_v33 = vrot.slane %v6786_v24, %v10134_v32  ;;  %v6809_v50 = vrot.slane %v6801_v44, %v10134_v32  ;;  %v6816_v52 = vrot.slane %v6802_v6, %v10134_v32 }
0x11af   : > { %v6717_v11 = vcombine.low %v6465_v40, %v6627_v45  ;;  %v6718_v20 = vcombine.high %v6465_v40, %v6627_v45  ;;  %v6733_v25 = vcombine.low %v6546_v57, %v6708_v46  ;;  %v6734_v53 = vcombine.high %v6546_v57, %v6708_v46  ;;  %v7020_v40 = vld [vmem:[#allocation14 + $0x8] sm:$0xff] }
0x11b0   : > { %v6817_v54 = vcombine.low %v6793_v47, %v6809_v50  ;;  %v6818_v41 = vcombine.high %v6793_v47, %v6809_v50  ;;  %v6833_v51 = vcombine.low %v6800_v33, %v6816_v52  ;;  %v6834_v55 = vcombine.high %v6800_v33, %v6816_v52  ;;  %8437 = vmatprep.subr.mxu0 %v7020_v40 }
0x11b1   : > { %v6725_v58 = vrot.slane %v6717_v11, %v10134_v32  ;;  %v6732_v4 = vrot.slane %v6718_v20, %v10134_v32  ;;  %v6741_v8 = vrot.slane %v6733_v25, %v10134_v32  ;;  %v6748_v21 = vrot.slane %v6734_v53, %v10134_v32  ;;  %8438 = vmatpush3.msra.mxu0 %v7020_v40  ;;  %v7227_v40 = vld [vmem:[%s11085_s25 + $0x10] sm:$0xff] }
0x11b2   : > { %v6825_v19 = vrot.slane %v6817_v54, %v10136_v39  ;;  %v6832_v22 = vrot.slane %v6818_v41, %v10136_v39  ;;  %v6841_v61 = vrot.slane %v6833_v51, %v10136_v39  ;;  %v6848_v62 = vrot.slane %v6834_v55, %v10136_v39 }
0x11b3   : > { %v6749_v63 = vcombine.low %v6725_v58, %v6741_v8  ;;  %v6750_v48 = vcombine.high %v6725_v58, %v6741_v8  ;;  %v6765_v0 = vcombine.low %v6732_v4, %v6748_v21  ;;  %v6766_v26 = vcombine.high %v6732_v4, %v6748_v21 }
0x11b4   : > { %v6921_v59 = vcombine.low %v6825_v19, %v6832_v22  ;;  %v8007_v49 = vcombine.high %v6825_v19, %v6832_v22  ;;  %v6937_v9 = vcombine.low %v6841_v61, %v6848_v62  ;;  %v8008_v12 = vcombine.high %v6841_v61, %v6848_v62 }
0x11b5   : > { %v6757_v14 = vrot.slane %v6749_v63, %v10136_v39  ;;  %v6764_v3 = vrot.slane %v6750_v48, %v10136_v39  ;;  %v6773_v5 = vrot.slane %v6765_v0, %v10136_v39  ;;  %v6780_v7 = vrot.slane %v6766_v26, %v10136_v39  ;;  %v8009_v26 = vld [vmem:[#allocation15] ss:$0 sm:$0xff] }
0x11b6   : > { %v6928_v16 = vrot.slane %v6921_v59, %v10134_v32  ;;  %v6936_v17 = vrot.slane %v8007_v49, %v10134_v32  ;;  %v6944_v18 = vrot.slane %v6937_v9, %v10134_v32  ;;  %v6952_v23 = vrot.slane %v8008_v12, %v10134_v32 }
0x11b7   : > { %v6853_v27 = vcombine.low %v6757_v14, %v6764_v3  ;;  %v8005_v30 = vcombine.high %v6757_v14, %v6764_v3  ;;  %v6869_v31 = vcombine.low %v6773_v5, %v6780_v7  ;;  %v8006_v34 = vcombine.high %v6773_v5, %v6780_v7 }
0x11b8   : > { %v6953_v56 = vcombine.low %v6928_v16, %v6936_v17  ;;  %v6969_v35 = vcombine.low %v6944_v18, %v6952_v23  ;;  %v6954_v36 = vcombine.high %v6928_v16, %v6936_v17  ;;  %v6970_v37 = vcombine.high %v6944_v18, %v6952_v23  ;;  %v7143_v16 = vld [vmem:[#allocation23 + $0x18] sm:$0xff]  ;;  %v7142_v17 = vld [vmem:[#allocation23 + $0x10] sm:$0xff]  ;;  %v7140_v18 = vld [vmem:[#allocation23] sm:$0xff] }
0x11b9   : > { %v6860_v10 = vrot.slane %v6853_v27, %v10134_v32  ;;  %v6868_v60 = vrot.slane %v8005_v30, %v10134_v32  ;;  %v6876_v28 = vrot.slane %v6869_v31, %v10134_v32  ;;  %v6884_v29 = vrot.slane %v8006_v34, %v10134_v32  ;;  %v7019_v32 = vld [vmem:[#allocation14] sm:$0xff]  ;;  %8445 = vmatpush3.msra.mxu1 %v7143_v16  ;;  %v7230_v30 = vld [vmem:[%s11085_s25 + $0x28] sm:$0xff]  ;;  %v7229_v31 = vld [vmem:[%s11085_s25 + $0x20] sm:$0xff] }
0x11ba   : > { %v6961_v57 = vrot.slane %v6953_v56, %v10136_v39  ;;  %v6977_v42 = vrot.slane %v6969_v35, %v10136_v39  ;;  %v6968_v45 = vrot.slane %v6954_v36, %v10136_v39  ;;  %v6984_v46 = vrot.slane %v6970_v37, %v10136_v39  ;;  %8439 = vmatprep.subr.mxu0 %v7019_v32  ;;  %v7232_v23 = vld [vmem:[%s11084_s26 + $0x38] sm:$0xff]  ;;  %v7231_v27 = vld [vmem:[%s11085_s25 + $0x30] sm:$0xff] }
0x11bb   : > { %v6885_v2 = vcombine.low %v6860_v10, %v6868_v60  ;;  %v6901_v43 = vcombine.low %v6876_v28, %v6884_v29  ;;  %v6886_v24 = vcombine.high %v6860_v10, %v6868_v60  ;;  %v6902_v44 = vcombine.high %v6876_v28, %v6884_v29  ;;  %8440 = vmatpush3.msra.mxu0 %v7019_v32  ;;  %v7228_v34 = vld [vmem:[%s11085_s25 + $0x18] sm:$0xff] }
0x11bc   : > { %v6986_v6 = vcombine.high %v6961_v57, %v6977_v42  ;;  %v6985_v47 = vcombine.low %v6961_v57, %v6977_v42  ;;  %8455 = vmatprep.subr.mxu0 %v9539_v1  ;;  %v6987_v53 = vcombine.low %v6968_v45, %v6984_v46  ;;  %v6988_v41 = vcombine.high %v6968_v45, %v6984_v46  ;;  %v8013_v60 = vld [vmem:[#allocation18] ss:$0 sm:$0xff]  ;;  %v7226_v57 = vld [vmem:[%s11085_s25 + $0x8] sm:$0xff]  ;;  %v7225_v42 = vld [vmem:[%s11085_s25] sm:$0xff] }
0x11bd   : > { %v6893_v33 = vrot.slane %v6885_v2, %v10136_v39  ;;  %v6909_v50 = vrot.slane %v6901_v43, %v10136_v39  ;;  %v6900_v11 = vrot.slane %v6886_v24, %v10136_v39  ;;  %v6916_v20 = vrot.slane %v6902_v44, %v10136_v39  ;;  %8446 = vmatprep.subr.mxu1 %v9539_v1  ;;  %v8014_v2 = vld [vmem:[#allocation24] ss:$0 sm:$0xff]  ;;  %v8016_v45 = vld [vmem:[#allocation26] ss:$0 sm:$0xff] }
0x11be   : > { %6993 = vrot.lane.b32.xlu1 %v6986_v6, %s9544_s13  ;;  %8447 = vmatpush3.msra.mxu1 %v7142_v17 }
0x11bf   : > { %v6918_v52 = vcombine.high %v6893_v33, %v6909_v50  ;;  %v6917_v25 = vcombine.low %v6893_v33, %v6909_v50  ;;  %v6919_v54 = vcombine.low %v6900_v11, %v6916_v20  ;;  %v6920_v51 = vcombine.high %v6900_v11, %v6916_v20  ;;  %8448 = vmatprep.subr.mxu1 %v9539_v1 }
0x11c1   : > { %6991 = vrot.lane.b32.xlu0 %v6918_v52, %s9544_s13 }
0x11c2   : > { %7001 = vrot.lane.b32.xlu1 %v6987_v53, %s9545_s30 }
0x11c5   : > { %6999 = vrot.lane.b32.xlu0 %v6919_v54, %s9545_s30 }
0x11c6   : > { %7009 = vrot.lane.b32.xlu1 %v6988_v41, %s9546_s29 }
0x11c9   : > { %7007 = vrot.lane.b32.xlu0 %v6920_v51, %s9546_s29 }
0x1230   : > { %v6994_v55 = vpop.permute.xlu1 %6993 }
0x1231   : > { %v7014_v19 = vsel %vm2318_vm3, %v6985_v47, %v6994_v55 }
0x1233   : > { %v6992_v58 = vpop.permute.xlu0 %6991 }
0x1234   : > { %v7002_v4 = vpop.permute.xlu1 %7001  ;;  %v7013_v39 = vsel %vm2318_vm3, %v6917_v25, %v6992_v58  ;;  %v8018_v58 = vld [vmem:[#allocation20] ss:$0 sm:$0xff] }
0x1235   : > { %v7016_v62 = vsel %vm2639_vm4, %v7014_v19, %v7002_v4 }
0x1237   : > { %v7000_v8 = vpop.permute.xlu0 %6999 }
0x1238   : > { %v7010_v21 = vpop.permute.xlu1 %7009  ;;  %v7015_v22 = vsel %vm2639_vm4, %v7013_v39, %v7000_v8  ;;  %v8019_v8 = vld [vmem:[#allocation21] ss:$0 sm:$0xff] }
0x1239   : > { %v7018_v48 = vsel %vm3126_vm5, %v7016_v62, %v7010_v21 }
0x123b   : > { %v7008_v61 = vpop.permute.xlu0 %7007 }
0x123c   : > { %v7017_v63 = vsel %vm3126_vm5, %v7015_v22, %v7008_v61 }
0x123d   : > { %8441 = vmatprep.mubr.msk.f32.mxu0 %vm1358_vm1, %v7017_v63 }
0x123e   : > { %8442 = vmatmul.mubr.msk.f32.vlgmr.msra.gmra.mxu0 %vm1358_vm1, %v7018_v48 }
0x123f   : > { %8471 = vmatprep.mubr.msk.f32.mxu0 %vm9540_vm6, %v9539_v1  ;;  %8456 = vmatpush3.msra.mxu0 %v7232_v23 }
0x1240   : > { %8457 = vmatprep.subr.mxu0 %v9539_v1 }
0x1241   : > { %8458 = vmatpush3.msra.mxu0 %v7231_v27 }
0x1242   : > { %8459 = vmatprep.subr.mxu0 %v9539_v1 }
0x1243   : > { %8460 = vmatpush3.msra.mxu0 %v7230_v30 }
0x1244   : > { %8461 = vmatprep.subr.mxu0 %v9539_v1 }
0x1245   : > { %8462 = vmatpush3.msra.mxu0 %v7229_v31 }
0x1246   : > { %8463 = vmatprep.subr.mxu0 %v9539_v1 }
0x1247   : > { %8464 = vmatpush3.msra.mxu0 %v7228_v34 }
0x1248   : > { %8465 = vmatprep.subr.mxu0 %v9539_v1 }
0x1249   : > { %8466 = vmatpush3.msra.mxu0 %v7227_v40 }
0x124a   : > { %8467 = vmatprep.subr.mxu0 %v9539_v1 }
0x124b   : > { %8468 = vmatpush3.msra.mxu0 %v7226_v57 }
0x124c   : > { %8469 = vmatprep.subr.mxu0 %v9539_v1 }
0x124d   : > { %8470 = vmatpush3.msra.mxu0 %v7225_v42 }
0x12fe   : > { %v8443_v0 = vpop.f32.mrf.mxu0 }
0x12ff   : > { %v7376_v0 = vld [vmem:[%s11086_s3 + $0x18] sm:$0xff] }
0x1300   : > { %v7102_v59 = vpop.f32.mrf.mxu0 }
0x1301   : > { %v7103_v49 = vadd.f32 %v8009_v26, %v7102_v59  ;;  %v7375_v26 = vld [vmem:[%s11086_s3 + $0x10] sm:$0xff]  ;;  %v7374_v59 = vld [vmem:[%s11086_s3 + $0x8] sm:$0xff] }
0x1303   : > { %v7110_v9 = vadd.f32 %v7103_v49, %v10093_v13  ;;  %v7141_v13 = vld [vmem:[#allocation23 + $0x8] sm:$0xff]  ;;  %v7373_v49 = vld [vmem:[%s11086_s3] sm:$0xff] }
0x1304   : > { %8449 = vmatpush3.msra.mxu1 %v7141_v13  ;;  %v8022_v13 = vld [vmem:[%s11087_s1] ss:$0 sm:$0xff] }
0x1305   : > { %v7113_v12 = vsel %vm1358_vm1, %v7110_v9, 0.0  ;;  %8450 = vmatprep.subr.mxu1 %v9539_v1 }
0x1306   : > { %7114 = vadd.xlane.f32.xlu0 %v7113_v12  ;;  %8451 = vmatpush3.msra.mxu1 %v7140_v18 }
0x1307   : > { %8474 = vmatprep.subr.mxu1 %v9539_v1 }
0x138f   : > { %v7115_v14 = vpop.xlane.xlu0 %7114 }
0x1390   : > { %v7116_v3 = vmul.f32 0.03125, %v7115_v14 }
0x1392   : > { %v7117_v5 = vsub.f32 %v7110_v9, %v7116_v3 }
0x1394   : > { %v7118_v7 = vmul.f32 %v7117_v5, %v7117_v5 }
0x1396   : > { %v7119_v15 = vsel %vm1358_vm1, %v7118_v7, 0.0 }
0x1397   : > { %7120 = vadd.xlane.f32.xlu1 %v7119_v15  ;;  %v8021_v15 = vld [vmem:[#allocation29] ss:$0 sm:$0xff] }
0x1420   : > { %v7121_v56 = vpop.xlane.xlu1 %7120 }
0x1421   : > { %v7122_v35 = vmul.f32 0.03125, %v7121_v56 }
0x1423   : > { %v7123_v36 = vadd.f32 1e-05, %v7122_v35 }
0x1425   : > { %8873 = vrsqrt.f32 %v7123_v36 }
0x1432   : > { %v8874_v37 = vpop.eup %8873 }
0x1433   : > { %v7125_v10 = vmul.f32 %v8874_v37, %v7117_v5  ;;  %v8020_v5 = vld [vmem:[#allocation27] ss:$0 sm:$0xff] }
0x1435   : > { %v7132_v28 = vmul.f32 %v8012_v38, %v7125_v10 }
0x1437   : > { %v7139_v29 = vadd.f32 %v8013_v60, %v7132_v28 }
0x1439   : > { %8453 = vmatmul.mubr.msk.f32.vlgmr.msra.gmra.mxu1 %vm1358_vm1, %v7139_v29 }
0x143a   : > { %8482 = vmatprep.mubr.msk.f32.mxu1 %vm9540_vm6, %v9539_v1  ;;  %8475 = vmatpush3.msra.mxu1 %v7376_v0 }
0x143b   : > { %8476 = vmatprep.subr.mxu1 %v9539_v1 }
0x143c   : > { %8477 = vmatpush3.msra.mxu1 %v7375_v26 }
0x143d   : > { %8478 = vmatprep.subr.mxu1 %v9539_v1 }
0x143e   : > { %8479 = vmatpush3.msra.mxu1 %v7374_v59 }
0x143f   : > { %8480 = vmatprep.subr.mxu1 %v9539_v1 }
0x1440   : > { %8481 = vmatpush3.msra.mxu1 %v7373_v49 }
0x14f9   : > { %v7220_v43 = vpop.f32.mrf.mxu1 }
0x14fa   : > { %v7221_v24 = vadd.f32 %v8014_v2, %v7220_v43 }
0x14fb   : > { %v8454_v44 = vpop.f32.mrf.mxu1 }
0x14fc   : > { %v7224_v6 = vmax.f32 %v7221_v24, 0.0 }
0x14fe   : > { %8472 = vmatmul.mubr.msk.f32.vlgmr.msra.gmra.mxu0 %vm7240_vm7, %v7224_v6 }
0x15be   : > { %v7310_v46 = vpop.f32.mrf.mxu0 }
0x15bf   : > { %v7311_v47 = vadd.f32 %v8016_v45, %v7310_v46 }
0x15c0   : > { %v8473_v32 = vpop.f32.mrf.mxu0 }
0x15c1   : > { %v7314_v33 = vadd.f32 %v7311_v47, %v7139_v29 }
0x15c3   : > { %v7317_v50 = vsel %vm1358_vm1, %v7314_v33, 0.0 }
0x15c4   : > { %7318 = vadd.xlane.f32.xlu0 %v7317_v50 }
0x164d   : > { %v7319_v52 = vpop.xlane.xlu0 %7318 }
0x164e   : > { %v7320_v11 = vmul.f32 0.03125, %v7319_v52 }
0x1650   : > { %v7321_v20 = vsub.f32 %v7314_v33, %v7320_v11 }
0x1652   : > { %v7322_v25 = vmul.f32 %v7321_v20, %v7321_v20 }
0x1654   : > { %v7323_v53 = vsel %vm1358_vm1, %v7322_v25, 0.0 }
0x1655   : > { %7324 = vadd.xlane.f32.xlu0 %v7323_v53 }
0x16de   : > { %v7325_v54 = vpop.xlane.xlu0 %7324 }
0x16df   : > { %v7326_v41 = vmul.f32 0.03125, %v7325_v54 }
0x16e1   : > { %v7327_v51 = vadd.f32 1e-05, %v7326_v41 }
0x16e3   : > { %8875 = vrsqrt.f32 %v7327_v51 }
0x16f0   : > { %v8876_v55 = vpop.eup %8875 }
0x16f1   : > { %v7329_v4 = vmul.f32 %v8876_v55, %v7321_v20 }
0x16f3   : > { %v7336_v39 = vmul.f32 %v8018_v58, %v7329_v4 }
0x16f5   : > { %v7343_v21 = vadd.f32 %v8019_v8, %v7336_v39 }
0x16f7   : > { %v7346_v19 = vsel %vm1358_vm1, %v7343_v21, 0.0 }
0x16f8   : > { %7347 = vadd.xlane.f32.xlu1 %v7346_v19 }
0x1781   : > { %v7348_v22 = vpop.xlane.xlu1 %7347 }
0x1782   : > { %v7349_v61 = vmul.f32 0.03125, %v7348_v22 }
0x1784   : > { %v7350_v62 = vsub.f32 %v7343_v21, %v7349_v61 }
0x1786   : > { %v7351_v63 = vmul.f32 %v7350_v62, %v7350_v62 }
0x1788   : > { %v7352_v48 = vsel %vm1358_vm1, %v7351_v63, 0.0 }
0x1789   : > { %7353 = vadd.xlane.f32.xlu0 %v7352_v48 }
0x1812   : > { %v7354_v9 = vpop.xlane.xlu0 %7353 }
0x1813   : > { %v7355_v12 = vmul.f32 0.03125, %v7354_v9 }
0x1815   : > { %v7356_v14 = vadd.f32 1e-05, %v7355_v12 }
0x1817   : > { %8877 = vrsqrt.f32 %v7356_v14 }
0x1824   : > { %v8878_v3 = vpop.eup %8877 }
0x1825   : > { %v7358_v7 = vmul.f32 %v8878_v3, %v7350_v62 }
0x1827   : > { %v7365_v16 = vmul.f32 %v8020_v5, %v7358_v7 }
0x1829   : > { %v7372_v17 = vadd.f32 %v8021_v15, %v7365_v16 }
0x182b   : > { %8483 = vmatmul.mubr.msk.f32.vlgmr.msra.gmra.mxu1 %vm1358_vm1, %v7372_v17 }
0x18eb   : > { %v7453_v18 = vpop.f32.mrf.mxu1 }
0x18ec   : > { %v7454_v23 = vadd.f32 %v8022_v13, %v7453_v18 }
0x18ed   : > { %v8484_v27 = vpop.f32.mrf.mxu1 }
0x18ee   : > { %7457 = vst [vmem:[%s1294_s15] sm:$0xff] %v7454_v23 }
0x18ef PF: > { %s11088_s2 = sld [smem:[#allocation74_spill]]  ;;  %s7472_s8 = sshll.u32 %s1294_s15, 4  ;;  %s7473_s8 = int_to_ptr.vmem [resolvable:$true] %s7472_s8 }
0x18f0   : > { %s11089_s4 = sld [smem:[#allocation70_spill]]  ;;  %s11090_s20 = sand.u32 1, %s9443_s10  }
0x18f1   : > { %s7459_s19 = scalar_lea.sflag [#allocation5], %s11090_s20  ;;  %s9327_s6 = scalar_lea.vmem %s7473_s8, 128 }
0x18f2   : > { %p9328_p1 = scmp.ne.s32.totalorder %s7473_s8, %s9327_s6  ;;  %p11091_p10 = scmp.ne.s32.totalorder %s11033_s14, 0 }
0x18f3   : > { %s9547_s18 = smov [#allocation30]  }
0x18f4   : > { %p9329_p4 = pnand %p9328_p1, %p11091_p10  ;;  %s9331_s24 = sshll.u32 %s9547_s18, 4  ;;  %s9332_s24 = int_to_ptr.vmem [resolvable:$false] %s9331_s24 }
0x18f5   : > { %s8025_s16 = sshll.u32 %s11088_s2, 7  ;;  %s9333_s12 = scalar_lea.vmem %s9332_s24, 256 }
0x18f6   : > { %s7470_s21 = scalar_lea.hbm %s11089_s4, %s8025_s16  ;;  %p9330_p2 = pneg %p9329_p4 }
0x18f7   : > { %p9334_p9 = scmp.lt.s32.totalorder %s7473_s8, %s9332_s24  ;;  %p9335_p13 = scmp.lt.s32.totalorder %s9333_s12, %s9327_s6 }
0x18f9   : > { %p9336_p12 = por %p9335_p13, %p9334_p9 }
0x18fb   : > { %p9337_p0 = pnand %p9336_p12, %p9330_p2 }
0x18fd   : > { %9340 = shalt.err (!%p9337_p0)
}
0x18fe   : > { %s9341_s23 = scalar_lea.hbm %s7470_s21, 128  ;;  %s9345_s15 = scalar_lea.hbm %s11089_s4, 256 }
0x18ff   : > { %p9342_p3 = scmp.ne.s32.totalorder %s7470_s21, %s9341_s23  ;;  %p9346_p5 = scmp.lt.s32.totalorder %s7470_s21, %s11089_s4 }
0x1900   : > { %p9347_p6 = scmp.lt.s32.totalorder %s9345_s15, %s9341_s23 }
0x1901   : > { %p9343_p11 = pnand %p9342_p3, %p11091_p10 }
0x1902   : > { %p9348_p8 = por %p9347_p6, %p9346_p5 }
0x1903   : > { %p9344_p7 = pneg %p9343_p11 }
0x1905   : > { %p9349_p1 = pnand %p9348_p8, %p9344_p7 }
0x1907   : > { %9352 = shalt.err (!%p9349_p1)
}
0x1908   : > { %8547 = dma.vmem_to_hbm [thread:$0]  (%p11091_p10), %s7473_s8, 128, %s7470_s21, %s7459_s19  }
0x1909 PF: > { %p8635_p4 = scmp.ge.s32.totalorder %s9479_s28, 2  ;;  %s7484_s22 = sand.u32 1, %s9439_s7  }
0x190a   : > { %p11092_p2 = scmp.ne.s32.totalorder %s11034_s9, 0  ;;  %s7485_s27 = scalar_lea.sflag [#allocation5], %s7484_s22 }
0x190c   : > { %p8603_p9 = pnand %p8635_p4, %p11092_p2 }
0x190e   : > { %p8604_p13 = pneg %p8603_p9 }
0x1910   : > { %9434 = dma.done.wait (%p8604_p13), %s7485_s27, 128  }
0x1911   : > { %9436 = vsyncadd (%p8604_p13), %s7485_s27, 4294967168  ;;  %s85_s28 = sadd.s32 1, %s9479_s28   ;;  %s11093_s14 = sld [smem:[#allocation71_spill]] }
0x1912   : > { %p82_p12 = scmp.ge.s32.totalorder %s85_s28, 6   ;;  %s11094_s15 = sld [smem:[#allocation72_spill]] }
0x1913   : > { %s11095_s16 = sld [smem:[#allocation80_spill]]  ;;  %s11100_s7 = smov %s9443_s10 }
0x1914   : > { %s11096_s18 = sld [smem:[#allocation75_spill]]  ;;  %s11101_s10 = smov %s9447_s11 }
0x1915   : > { %s11097_s22 = sld [smem:[#allocation76_spill]]  ;;  %s11102_s11 = smov %s9861_s0 }
0x1916   : > { %s11098_s23 = sld [smem:[#allocation78_spill]]  ;;  %84 = sbr.rel (!%p82_p12) target bundleno = 79 (0x4f), region = 322 }
0x1917   : > { %s11099_s26 = sld [smem:[#allocation79_spill]]  ;;  %s11103_s0 = smov %s11093_s14 }
0x191b   :  { %7490 = vsyncpa [#allocation4], 1 }
0x191c   :  { %7492 = vsyncpa [#allocation4 + $0x1], 1 }
0x191d   :  { %7493 = vsyncpa [#allocation7], 1 }
0x191e   :  { %7495 = vsyncpa [#allocation7 + $0x1], 1 }
0x191f   :  { %7496 = vsyncpa [#allocation10], 1 }
0x1920   :  { %7497 = vsyncpa [#allocation13], 1 }
0x1921   :  { %7498 = vsyncpa [#allocation16], 1 }
0x1922   :  { %7499 = vsyncpa [#allocation19], 1 }
0x1923   :  { %7500 = vsyncpa [#allocation22], 1 }
0x1924   :  { %7501 = vsyncpa [#allocation25], 1 }
0x1925   :  { %7502 = vsyncpa [#allocation28], 1 }
0x1926   :  { %7503 = vsyncpa [#allocation5], 1 }
0x1927   :  { %7505 = vsyncpa [#allocation5 + $0x1], 1 }

</bundles_post_ra>
